<compile_context>
chip_gen: v6e
topology: v6e:2x2x1
jax: 0.10.0
libtpu: 0.0.40
codegen_flags: <defaults>
</compile_context>

<pallas_src>
import jax
import jax.numpy as jnp
from jax.experimental import pallas as pl
from jax.experimental.pallas import tpu as pltpu  # noqa: F401  (TPU backend assumed)

# ----------------------------- configuration --------------------------------
B = 2                 # batch
C_IN = 4              # channels
IMG = 16              # image height/width
P = 4                 # patch size
NP_SIDE = IMG // P    # patches per side = 4
NUM_PATCHES = NP_SIDE * NP_SIDE          # 16
PATCH_DIM = C_IN * P * P                 # 64
DIM = 32              # model dim
DEPTH = 2
HEADS = 4
DIM_HEAD = 8
INNER = HEADS * DIM_HEAD                 # 32
MLP_DIM = 64
NUM_CLASSES = 10
N_TOK = NUM_PATCHES + 1                  # 17 (cls + patches)
BT = B * N_TOK                           # 34 (batch folded into rows / M dim)
LN_EPS = 1e-5         # PyTorch nn.LayerNorm default
ATTN_SCALE = DIM_HEAD ** -0.5
NEG_INF = -1e30


# ------------------------------- kernel helpers ------------------------------
def _layernorm(x, gamma, beta):
    # PyTorch LayerNorm: biased variance over the last dim, eps inside sqrt.
    mean = jnp.mean(x, axis=-1, keepdims=True)
    var = jnp.mean((x - mean) ** 2, axis=-1, keepdims=True)
    return (x - mean) * jax.lax.rsqrt(var + LN_EPS) * gamma + beta


def _gelu(x):
    # TODO(synk): PyTorch nn.GELU defaults to the exact erf form; tanh approximation
    # used here for guaranteed Mosaic elementwise lowering (max deviation ~1e-3).
    return 0.5 * x * (1.0 + jnp.tanh(0.7978845608028654 * (x + 0.044715 * x * x * x)))


# ------------------------------ fused kernel ---------------------------------
def vit_fused_kernel(
    tok_ref,                 # (BT, PATCH_DIM)  patches; zero rows at cls slots
    cls_ref,                 # (1, DIM)         learned cls token
    pos_ref,                 # (BT, DIM)        positional embedding tiled per image
    pg1_ref, pb1_ref,        # (1, PATCH_DIM)   patch-embed LayerNorm 1
    pw_ref, pbi_ref,         # (PATCH_DIM, DIM), (1, DIM)
    pg2_ref, pb2_ref,        # (1, DIM)         patch-embed LayerNorm 2
    ag_ref, ab_ref,          # (DEPTH, 1, DIM)  attention pre-LN
    wqkv_ref,                # (DEPTH, DIM, 3*INNER)
    wo_ref, bo_ref,          # (DEPTH, INNER, DIM), (DEPTH, 1, DIM)
    fg_ref, fb_ref,          # (DEPTH, 1, DIM)  FF pre-LN
    w1_ref, b1_ref,          # (DEPTH, DIM, MLP_DIM), (DEPTH, 1, MLP_DIM)
    w2_ref, b2_ref,          # (DEPTH, MLP_DIM, DIM), (DEPTH, 1, DIM)
    hg_ref, hb_ref,          # (1, DIM)         final LayerNorm
    wh_ref, bh_ref,          # (DIM, NUM_CLASSES), (1, NUM_CLASSES)
    out_ref,                 # (B, NUM_CLASSES)
):
    f32 = jnp.float32

    # ---- patch embedding: LN -> Linear -> LN, batch+token folded (M = BT) ----
    t = tok_ref[...]                                                    # (BT, PATCH_DIM)
    e = _layernorm(t, pg1_ref[...], pb1_ref[...])
    e = jnp.dot(e, pw_ref[...], preferred_element_type=f32) + pbi_ref[...]
    e = _layernorm(e, pg2_ref[...], pb2_ref[...])                       # (BT, DIM)
    # (rows at the cls slots were embedded from zeros; they are overwritten below)

    # ---- insert learned cls token rows, add positional embedding ----
    row = jax.lax.broadcasted_iota(jnp.int32, (BT, DIM), 0)
    is_cls = row == 0
    for b in range(1, B):
        is_cls = jnp.logical_or(is_cls, row == b * N_TOK)
    cls_b = jnp.broadcast_to(cls_ref[...], (BT, DIM))
    x = jnp.where(is_cls, cls_b, e) + pos_ref[...]                      # (BT, DIM)

    # ---- block-diagonal attention bias: each image attends only to itself ----
    r = jax.lax.broadcasted_iota(jnp.int32, (BT, BT), 0)
    c = jax.lax.broadcasted_iota(jnp.int32, (BT, BT), 1)
    same = None
    for b in range(B):
        rb = jnp.logical_and(r >= b * N_TOK, r < (b + 1) * N_TOK)
        cb = jnp.logical_and(c >= b * N_TOK, c < (b + 1) * N_TOK)
        blk = jnp.logical_and(rb, cb)
        same = blk if same is None else jnp.logical_or(same, blk)
    attn_bias = jnp.where(same, 0.0, NEG_INF).astype(f32)               # (BT, BT)

    # ---- transformer layers (static unroll; activations stay in vregs/VMEM) ----
    for l in range(DEPTH):
        # pre-LN multi-head self-attention + residual
        xn = _layernorm(x, ag_ref[l], ab_ref[l])
        qkv = jnp.dot(xn, wqkv_ref[l], preferred_element_type=f32)      # (BT, 3*INNER)
        wo_l = wo_ref[l]                                                # (INNER, DIM)
        y = jnp.zeros((BT, DIM), f32)
        for h in range(HEADS):
            lo = h * DIM_HEAD
            q = qkv[:, lo:lo + DIM_HEAD]                                # (BT, dh)
            k = qkv[:, INNER + lo:INNER + lo + DIM_HEAD]
            v = qkv[:, 2 * INNER + lo:2 * INNER + lo + DIM_HEAD]
            dots = jax.lax.dot_general(q, k, (((1,), (1,)), ((), ())),
                                       preferred_element_type=f32) * ATTN_SCALE
            dots = dots + attn_bias                                     # mask other image
            dots = dots - jnp.max(dots, axis=-1, keepdims=True)
            ex = jnp.exp(dots)
            attn = ex * pl.reciprocal(jnp.sum(ex, axis=-1, keepdims=True), approx=True)
            oh = jnp.dot(attn, v, preferred_element_type=f32)           # (BT, dh)
            # fold the output projection into the head loop (no head-concat)
            y = y + jnp.dot(oh, wo_l[lo:lo + DIM_HEAD, :], preferred_element_type=f32)
        x = x + y + bo_ref[l]                                           # residual + out-bias

        # pre-LN feed-forward + residual
        xn = _layernorm(x, fg_ref[l], fb_ref[l])
        hmid = jnp.dot(xn, w1_ref[l], preferred_element_type=f32) + b1_ref[l]
        hmid = _gelu(hmid)
        x = x + jnp.dot(hmid, w2_ref[l], preferred_element_type=f32) + b2_ref[l]

    # ---- final LayerNorm + cls pooling + classifier head ----
    # one-hot selection matmul pulls out each image's cls row (stays on the MXU,
    # avoids unaligned sublane slicing); LN is per-token so LN-then-pool == pool-then-LN.
    rb2 = jax.lax.broadcasted_iota(jnp.int32, (B, BT), 0)
    cb2 = jax.lax.broadcasted_iota(jnp.int32, (B, BT), 1)
    sel = (cb2 == rb2 * N_TOK).astype(f32)                              # (B, BT) one-hot
    cls_tok = jnp.dot(sel, x, preferred_element_type=f32)               # (B, DIM)
    cls_tok = _layernorm(cls_tok, hg_ref[...], hb_ref[...])
    out_ref[...] = jnp.dot(cls_tok, wh_ref[...], preferred_element_type=f32) + bh_ref[...]


# ------------------------------ host wrapper ---------------------------------
def _rearrange_patches(img):
    # 'b c (h p1) (w p2) -> b (h w) (p1 p2 c)'  (channel fastest-varying)
    p = img.reshape(B, C_IN, NP_SIDE, P, NP_SIDE, P)
    p = p.transpose(0, 2, 4, 3, 5, 1)                    # (B, h, w, p1, p2, c)
    return p.reshape(B, NUM_PATCHES, PATCH_DIM)


@jax.jit
def vit_forward(img, params):
    patches = _rearrange_patches(img)                                   # (B, 16, 64)
    # Token-major layout with an all-zero slot at row b*N_TOK for the cls token;
    # the kernel overwrites those rows with the learned cls embedding.
    tokens = jnp.concatenate(
        [jnp.zeros((B, 1, PATCH_DIM), jnp.float32), patches], axis=1)   # (B, 17, 64)
    tokens = tokens.reshape(BT, PATCH_DIM)
    pos_tiled = jnp.tile(params["pos"], (B, 1))                         # (BT, DIM)

    kernel_args = (
        tokens, params["cls"], pos_tiled,
        params["pg1"], params["pb1"], params["pw"], params["pb"],
        params["pg2"], params["pb2"],
        params["ag"], params["ab"], params["wqkv"], params["wo"], params["bo"],
        params["fg"], params["fb"], params["w1"], params["b1"],
        params["w2"], params["b2"],
        params["hg"], params["hb"], params["wh"], params["bh"],
    )
    return pl.pallas_call(
        vit_fused_kernel,
        out_shape=jax.ShapeDtypeStruct((B, NUM_CLASSES), jnp.float32),
        # no grid: single invocation, every operand resident in VMEM in full
    )(*kernel_args)


# ------------------------------ parameter init --------------------------------
def init_params(key):
    ks = iter(jax.random.split(key, 16))

    def w(shape):
        return 0.02 * jax.random.normal(next(ks), shape, jnp.float32)

    return {
        "cls": jax.random.normal(next(ks), (1, DIM), jnp.float32),
        "pos": jax.random.normal(next(ks), (N_TOK, DIM), jnp.float32),
        # patch embedding: LN(patch_dim) -> Linear(patch_dim, dim) -> LN(dim)
        "pg1": jnp.ones((1, PATCH_DIM), jnp.float32),
        "pb1": jnp.zeros((1, PATCH_DIM), jnp.float32),
        "pw": w((PATCH_DIM, DIM)),
        "pb": jnp.zeros((1, DIM), jnp.float32),
        "pg2": jnp.ones((1, DIM), jnp.float32),
        "pb2": jnp.zeros((1, DIM), jnp.float32),
        # transformer layers, stacked along a leading DEPTH axis
        "ag": jnp.ones((DEPTH, 1, DIM), jnp.float32),
        "ab": jnp.zeros((DEPTH, 1, DIM), jnp.float32),
        "wqkv": w((DEPTH, DIM, 3 * INNER)),                  # to_qkv (bias=False)
        "wo": w((DEPTH, INNER, DIM)),
        "bo": jnp.zeros((DEPTH, 1, DIM), jnp.float32),
        "fg": jnp.ones((DEPTH, 1, DIM), jnp.float32),
        "fb": jnp.zeros((DEPTH, 1, DIM), jnp.float32),
        "w1": w((DEPTH, DIM, MLP_DIM)),
        "b1": jnp.zeros((DEPTH, 1, MLP_DIM), jnp.float32),
        "w2": w((DEPTH, MLP_DIM, DIM)),
        "b2": jnp.zeros((DEPTH, 1, DIM), jnp.float32),
        # final norm + classifier head
        "hg": jnp.ones((1, DIM), jnp.float32),
        "hb": jnp.zeros((1, DIM), jnp.float32),
        "wh": w((DIM, NUM_CLASSES)),
        "bh": jnp.zeros((1, NUM_CLASSES), jnp.float32),
    }


# ----------------------------------- main -------------------------------------
if __name__ == "__main__":
    key = jax.random.PRNGKey(0)
    k_img, k_param = jax.random.split(key)
    img = jax.random.normal(k_img, (B, C_IN, IMG, IMG), jnp.float32)    # NCHW
    params = init_params(k_param)

    logits = jax.block_until_ready(vit_forward(img, params))

    assert logits.shape == (B, NUM_CLASSES), logits.shape
    assert logits.dtype == jnp.float32
    assert bool(jnp.all(jnp.isfinite(logits)))
    print("KERNEL_OK")
</pallas_src>

<mosaic_0001>
module attributes {stable_mosaic.version = 11 : i64} {
  func.func @vit_fused_kernel(%arg0: memref<34x64xf32, #tpu.memory_space<vmem>>, %arg1: memref<1x32xf32, #tpu.memory_space<vmem>>, %arg2: memref<34x32xf32, #tpu.memory_space<vmem>>, %arg3: memref<1x64xf32, #tpu.memory_space<vmem>>, %arg4: memref<1x64xf32, #tpu.memory_space<vmem>>, %arg5: memref<64x32xf32, #tpu.memory_space<vmem>>, %arg6: memref<1x32xf32, #tpu.memory_space<vmem>>, %arg7: memref<1x32xf32, #tpu.memory_space<vmem>>, %arg8: memref<1x32xf32, #tpu.memory_space<vmem>>, %arg9: memref<2x1x32xf32, #tpu.memory_space<vmem>>, %arg10: memref<2x1x32xf32, #tpu.memory_space<vmem>>, %arg11: memref<2x32x96xf32, #tpu.memory_space<vmem>>, %arg12: memref<2x32x32xf32, #tpu.memory_space<vmem>>, %arg13: memref<2x1x32xf32, #tpu.memory_space<vmem>>, %arg14: memref<2x1x32xf32, #tpu.memory_space<vmem>>, %arg15: memref<2x1x32xf32, #tpu.memory_space<vmem>>, %arg16: memref<2x32x64xf32, #tpu.memory_space<vmem>>, %arg17: memref<2x1x64xf32, #tpu.memory_space<vmem>>, %arg18: memref<2x64x32xf32, #tpu.memory_space<vmem>>, %arg19: memref<2x1x32xf32, #tpu.memory_space<vmem>>, %arg20: memref<1x32xf32, #tpu.memory_space<vmem>>, %arg21: memref<1x32xf32, #tpu.memory_space<vmem>>, %arg22: memref<32x10xf32, #tpu.memory_space<vmem>>, %arg23: memref<1x10xf32, #tpu.memory_space<vmem>>, %arg24: memref<2x10xf32, #tpu.memory_space<vmem>>) attributes {dimension_semantics = [], scalar_prefetch = 0 : i64, scratch_operands = 0 : i64, tpu.core_type = #tpu.core_type<tc>} {
    %c0 = arith.constant 0 : index
    %c0_0 = arith.constant 0 : index
    %0 = vector.load %arg0[%c0, %c0_0] : memref<34x64xf32, #tpu.memory_space<vmem>>, vector<34x64xf32>
    %c0_1 = arith.constant 0 : index
    %c0_2 = arith.constant 0 : index
    %1 = vector.load %arg3[%c0_1, %c0_2] : memref<1x64xf32, #tpu.memory_space<vmem>>, vector<1x64xf32>
    %c0_3 = arith.constant 0 : index
    %c0_4 = arith.constant 0 : index
    %2 = vector.load %arg4[%c0_3, %c0_4] : memref<1x64xf32, #tpu.memory_space<vmem>>, vector<1x64xf32>
    %cst = arith.constant dense<0.000000e+00> : vector<34xf32>
    %3 = vector.multi_reduction <add>, %0, %cst [1] : vector<34x64xf32> to vector<34xf32>
    %4 = vector.shape_cast %3 : vector<34xf32> to vector<34x1xf32>
    %cst_5 = arith.constant 6.400000e+01 : f32
    %5 = vector.broadcast %cst_5 : f32 to vector<34x1xf32>
    %6 = arith.divf %4, %5 : vector<34x1xf32>
    %7 = vector.broadcast %6 : vector<34x1xf32> to vector<34x64xf32>
    %8 = arith.subf %0, %7 : vector<34x64xf32>
    %9 = arith.mulf %8, %8 : vector<34x64xf32>
    %cst_6 = arith.constant dense<0.000000e+00> : vector<34xf32>
    %10 = vector.multi_reduction <add>, %9, %cst_6 [1] : vector<34x64xf32> to vector<34xf32>
    %11 = vector.shape_cast %10 : vector<34xf32> to vector<34x1xf32>
    %cst_7 = arith.constant 6.400000e+01 : f32
    %12 = vector.broadcast %cst_7 : f32 to vector<34x1xf32>
    %13 = arith.divf %11, %12 : vector<34x1xf32>
    %14 = vector.broadcast %6 : vector<34x1xf32> to vector<34x64xf32>
    %15 = arith.subf %0, %14 : vector<34x64xf32>
    %cst_8 = arith.constant 9.99999974E-6 : f32
    %16 = vector.broadcast %cst_8 : f32 to vector<34x1xf32>
    %17 = arith.addf %13, %16 : vector<34x1xf32>
    %18 = math.rsqrt %17 : vector<34x1xf32>
    %19 = vector.broadcast %18 : vector<34x1xf32> to vector<34x64xf32>
    %20 = arith.mulf %15, %19 : vector<34x64xf32>
    %21 = vector.broadcast %1 : vector<1x64xf32> to vector<34x64xf32>
    %22 = arith.mulf %20, %21 : vector<34x64xf32>
    %23 = vector.broadcast %2 : vector<1x64xf32> to vector<34x64xf32>
    %24 = arith.addf %22, %23 : vector<34x64xf32>
    %c0_9 = arith.constant 0 : index
    %c0_10 = arith.constant 0 : index
    %25 = vector.load %arg5[%c0_9, %c0_10] : memref<64x32xf32, #tpu.memory_space<vmem>>, vector<64x32xf32>
    %cst_11 = arith.constant dense<0.000000e+00> : vector<34x32xf32>
    %26 = tpu.matmul %24, %25, %cst_11 {dimension_numbers = #tpu.dot_dimension_numbers<[1], [0], [0], [1], [0, 0, 1, 1], [], []>} : vector<34x64xf32>, vector<64x32xf32>, vector<34x32xf32> -> vector<34x32xf32>
    %c0_12 = arith.constant 0 : index
    %c0_13 = arith.constant 0 : index
    %27 = vector.load %arg6[%c0_12, %c0_13] : memref<1x32xf32, #tpu.memory_space<vmem>>, vector<1x32xf32>
    %28 = vector.broadcast %27 : vector<1x32xf32> to vector<34x32xf32>
    %29 = arith.addf %26, %28 : vector<34x32xf32>
    %c0_14 = arith.constant 0 : index
    %c0_15 = arith.constant 0 : index
    %30 = vector.load %arg7[%c0_14, %c0_15] : memref<1x32xf32, #tpu.memory_space<vmem>>, vector<1x32xf32>
    %c0_16 = arith.constant 0 : index
    %c0_17 = arith.constant 0 : index
    %31 = vector.load %arg8[%c0_16, %c0_17] : memref<1x32xf32, #tpu.memory_space<vmem>>, vector<1x32xf32>
    %cst_18 = arith.constant dense<0.000000e+00> : vector<34xf32>
    %32 = vector.multi_reduction <add>, %29, %cst_18 [1] : vector<34x32xf32> to vector<34xf32>
    %33 = vector.shape_cast %32 : vector<34xf32> to vector<34x1xf32>
    %cst_19 = arith.constant 3.200000e+01 : f32
    %34 = vector.broadcast %cst_19 : f32 to vector<34x1xf32>
    %35 = arith.divf %33, %34 : vector<34x1xf32>
    %36 = vector.broadcast %35 : vector<34x1xf32> to vector<34x32xf32>
    %37 = arith.subf %29, %36 : vector<34x32xf32>
    %38 = arith.mulf %37, %37 : vector<34x32xf32>
    %cst_20 = arith.constant dense<0.000000e+00> : vector<34xf32>
    %39 = vector.multi_reduction <add>, %38, %cst_20 [1] : vector<34x32xf32> to vector<34xf32>
    %40 = vector.shape_cast %39 : vector<34xf32> to vector<34x1xf32>
    %cst_21 = arith.constant 3.200000e+01 : f32
    %41 = vector.broadcast %cst_21 : f32 to vector<34x1xf32>
    %42 = arith.divf %40, %41 : vector<34x1xf32>
    %43 = vector.broadcast %35 : vector<34x1xf32> to vector<34x32xf32>
    %44 = arith.subf %29, %43 : vector<34x32xf32>
    %cst_22 = arith.constant 9.99999974E-6 : f32
    %45 = vector.broadcast %cst_22 : f32 to vector<34x1xf32>
    %46 = arith.addf %42, %45 : vector<34x1xf32>
    %47 = math.rsqrt %46 : vector<34x1xf32>
    %48 = vector.broadcast %47 : vector<34x1xf32> to vector<34x32xf32>
    %49 = arith.mulf %44, %48 : vector<34x32xf32>
    %50 = vector.broadcast %30 : vector<1x32xf32> to vector<34x32xf32>
    %51 = arith.mulf %49, %50 : vector<34x32xf32>
    %52 = vector.broadcast %31 : vector<1x32xf32> to vector<34x32xf32>
    %53 = arith.addf %51, %52 : vector<34x32xf32>
    %54 = tpu.iota {dimensions = array<i32: 0>} : vector<34x32xi32>
    %c0_i32 = arith.constant 0 : i32
    %55 = vector.broadcast %c0_i32 : i32 to vector<34x32xi32>
    %56 = arith.cmpi eq, %54, %55 : vector<34x32xi32>
    %c17_i32 = arith.constant 17 : i32
    %57 = vector.broadcast %c17_i32 : i32 to vector<34x32xi32>
    %58 = arith.cmpi eq, %54, %57 : vector<34x32xi32>
    %59 = arith.ori %56, %58 : vector<34x32xi1>
    %c0_23 = arith.constant 0 : index
    %c0_24 = arith.constant 0 : index
    %60 = vector.load %arg1[%c0_23, %c0_24] : memref<1x32xf32, #tpu.memory_space<vmem>>, vector<1x32xf32>
    %61 = vector.shape_cast %60 : vector<1x32xf32> to vector<1x32xf32>
    %62 = vector.broadcast %61 : vector<1x32xf32> to vector<34x32xf32>
    %63 = arith.select %59, %62, %53 : vector<34x32xi1>, vector<34x32xf32>
    %c0_25 = arith.constant 0 : index
    %c0_26 = arith.constant 0 : index
    %64 = vector.load %arg2[%c0_25, %c0_26] : memref<34x32xf32, #tpu.memory_space<vmem>>, vector<34x32xf32>
    %65 = arith.addf %63, %64 : vector<34x32xf32>
    %66 = tpu.iota {dimensions = array<i32: 0>} : vector<34x34xi32>
    %67 = tpu.iota {dimensions = array<i32: 1>} : vector<34x34xi32>
    %c0_i32_27 = arith.constant 0 : i32
    %68 = vector.broadcast %c0_i32_27 : i32 to vector<34x34xi32>
    %69 = arith.cmpi sge, %66, %68 : vector<34x34xi32>
    %c17_i32_28 = arith.constant 17 : i32
    %70 = vector.broadcast %c17_i32_28 : i32 to vector<34x34xi32>
    %71 = arith.cmpi slt, %66, %70 : vector<34x34xi32>
    %72 = arith.andi %69, %71 : vector<34x34xi1>
    %c0_i32_29 = arith.constant 0 : i32
    %73 = vector.broadcast %c0_i32_29 : i32 to vector<34x34xi32>
    %74 = arith.cmpi sge, %67, %73 : vector<34x34xi32>
    %c17_i32_30 = arith.constant 17 : i32
    %75 = vector.broadcast %c17_i32_30 : i32 to vector<34x34xi32>
    %76 = arith.cmpi slt, %67, %75 : vector<34x34xi32>
    %77 = arith.andi %74, %76 : vector<34x34xi1>
    %78 = arith.andi %72, %77 : vector<34x34xi1>
    %c17_i32_31 = arith.constant 17 : i32
    %79 = vector.broadcast %c17_i32_31 : i32 to vector<34x34xi32>
    %80 = arith.cmpi sge, %66, %79 : vector<34x34xi32>
    %c34_i32 = arith.constant 34 : i32
    %81 = vector.broadcast %c34_i32 : i32 to vector<34x34xi32>
    %82 = arith.cmpi slt, %66, %81 : vector<34x34xi32>
    %83 = arith.andi %80, %82 : vector<34x34xi1>
    %c17_i32_32 = arith.constant 17 : i32
    %84 = vector.broadcast %c17_i32_32 : i32 to vector<34x34xi32>
    %85 = arith.cmpi sge, %67, %84 : vector<34x34xi32>
    %c34_i32_33 = arith.constant 34 : i32
    %86 = vector.broadcast %c34_i32_33 : i32 to vector<34x34xi32>
    %87 = arith.cmpi slt, %67, %86 : vector<34x34xi32>
    %88 = arith.andi %85, %87 : vector<34x34xi1>
    %89 = arith.andi %83, %88 : vector<34x34xi1>
    %90 = arith.ori %78, %89 : vector<34x34xi1>
    %cst_34 = arith.constant 0.000000e+00 : f32
    %cst_35 = arith.constant -1.000000e+30 : f32
    %91 = vector.broadcast %cst_34 : f32 to vector<34x34xf32>
    %92 = vector.broadcast %cst_35 : f32 to vector<34x34xf32>
    %93 = arith.select %90, %91, %92 : vector<34x34xi1>, vector<34x34xf32>
    %c0_36 = arith.constant 0 : index
    %c0_37 = arith.constant 0 : index
    %c0_38 = arith.constant 0 : index
    %94 = vector.load %arg9[%c0_36, %c0_37, %c0_38] : memref<2x1x32xf32, #tpu.memory_space<vmem>>, vector<1x1x32xf32>
    %95 = vector.shape_cast %94 : vector<1x1x32xf32> to vector<1x32xf32>
    %c0_39 = arith.constant 0 : index
    %c0_40 = arith.constant 0 : index
    %c0_41 = arith.constant 0 : index
    %96 = vector.load %arg10[%c0_39, %c0_40, %c0_41] : memref<2x1x32xf32, #tpu.memory_space<vmem>>, vector<1x1x32xf32>
    %97 = vector.shape_cast %96 : vector<1x1x32xf32> to vector<1x32xf32>
    %cst_42 = arith.constant dense<0.000000e+00> : vector<34xf32>
    %98 = vector.multi_reduction <add>, %65, %cst_42 [1] : vector<34x32xf32> to vector<34xf32>
    %99 = vector.shape_cast %98 : vector<34xf32> to vector<34x1xf32>
    %cst_43 = arith.constant 3.200000e+01 : f32
    %100 = vector.broadcast %cst_43 : f32 to vector<34x1xf32>
    %101 = arith.divf %99, %100 : vector<34x1xf32>
    %102 = vector.broadcast %101 : vector<34x1xf32> to vector<34x32xf32>
    %103 = arith.subf %65, %102 : vector<34x32xf32>
    %104 = arith.mulf %103, %103 : vector<34x32xf32>
    %cst_44 = arith.constant dense<0.000000e+00> : vector<34xf32>
    %105 = vector.multi_reduction <add>, %104, %cst_44 [1] : vector<34x32xf32> to vector<34xf32>
    %106 = vector.shape_cast %105 : vector<34xf32> to vector<34x1xf32>
    %cst_45 = arith.constant 3.200000e+01 : f32
    %107 = vector.broadcast %cst_45 : f32 to vector<34x1xf32>
    %108 = arith.divf %106, %107 : vector<34x1xf32>
    %109 = vector.broadcast %101 : vector<34x1xf32> to vector<34x32xf32>
    %110 = arith.subf %65, %109 : vector<34x32xf32>
    %cst_46 = arith.constant 9.99999974E-6 : f32
    %111 = vector.broadcast %cst_46 : f32 to vector<34x1xf32>
    %112 = arith.addf %108, %111 : vector<34x1xf32>
    %113 = math.rsqrt %112 : vector<34x1xf32>
    %114 = vector.broadcast %113 : vector<34x1xf32> to vector<34x32xf32>
    %115 = arith.mulf %110, %114 : vector<34x32xf32>
    %116 = vector.broadcast %95 : vector<1x32xf32> to vector<34x32xf32>
    %117 = arith.mulf %115, %116 : vector<34x32xf32>
    %118 = vector.broadcast %97 : vector<1x32xf32> to vector<34x32xf32>
    %119 = arith.addf %117, %118 : vector<34x32xf32>
    %c0_47 = arith.constant 0 : index
    %c0_48 = arith.constant 0 : index
    %c0_49 = arith.constant 0 : index
    %120 = vector.load %arg11[%c0_47, %c0_48, %c0_49] : memref<2x32x96xf32, #tpu.memory_space<vmem>>, vector<1x32x96xf32>
    %121 = vector.shape_cast %120 : vector<1x32x96xf32> to vector<32x96xf32>
    %cst_50 = arith.constant dense<0.000000e+00> : vector<34x96xf32>
    %122 = tpu.matmul %119, %121, %cst_50 {dimension_numbers = #tpu.dot_dimension_numbers<[1], [0], [0], [1], [0, 0, 1, 1], [], []>} : vector<34x32xf32>, vector<32x96xf32>, vector<34x96xf32> -> vector<34x96xf32>
    %c0_51 = arith.constant 0 : index
    %c0_52 = arith.constant 0 : index
    %c0_53 = arith.constant 0 : index
    %123 = vector.load %arg12[%c0_51, %c0_52, %c0_53] : memref<2x32x32xf32, #tpu.memory_space<vmem>>, vector<1x32x32xf32>
    %124 = vector.shape_cast %123 : vector<1x32x32xf32> to vector<32x32xf32>
    %cst_54 = arith.constant 0.000000e+00 : f32
    %125 = vector.broadcast %cst_54 : f32 to vector<34x32xf32>
    %126 = vector.extract_strided_slice %122 {offsets = [0, 0], sizes = [34, 8], strides = [1, 1]} : vector<34x96xf32> to vector<34x8xf32>
    %127 = vector.extract_strided_slice %122 {offsets = [0, 32], sizes = [34, 8], strides = [1, 1]} : vector<34x96xf32> to vector<34x8xf32>
    %128 = vector.extract_strided_slice %122 {offsets = [0, 64], sizes = [34, 8], strides = [1, 1]} : vector<34x96xf32> to vector<34x8xf32>
    %cst_55 = arith.constant dense<0.000000e+00> : vector<34x34xf32>
    %129 = tpu.matmul %126, %127, %cst_55 {dimension_numbers = #tpu.dot_dimension_numbers<[1], [1], [0], [0], [0, 0, 1, 0], [], []>} : vector<34x8xf32>, vector<34x8xf32>, vector<34x34xf32> -> vector<34x34xf32>
    %cst_56 = arith.constant 0.353553385 : f32
    %130 = vector.broadcast %cst_56 : f32 to vector<34x34xf32>
    %131 = arith.mulf %129, %130 : vector<34x34xf32>
    %132 = arith.addf %131, %93 : vector<34x34xf32>
    %cst_57 = arith.constant dense<0xFF800000> : vector<34xf32>
    %133 = vector.multi_reduction <maximumf>, %132, %cst_57 [1] : vector<34x34xf32> to vector<34xf32>
    %134 = vector.shape_cast %133 : vector<34xf32> to vector<34x1xf32>
    %135 = vector.broadcast %134 : vector<34x1xf32> to vector<34x34xf32>
    %136 = arith.subf %132, %135 : vector<34x34xf32>
    %137 = math.exp %136 : vector<34x34xf32>
    %cst_58 = arith.constant dense<0.000000e+00> : vector<34xf32>
    %138 = vector.multi_reduction <add>, %137, %cst_58 [1] : vector<34x34xf32> to vector<34xf32>
    %139 = vector.shape_cast %138 : vector<34xf32> to vector<34x1xf32>
    %140 = tpu.reciprocal %139 {approx = true} : vector<34x1xf32> -> vector<34x1xf32>
    %141 = vector.broadcast %140 : vector<34x1xf32> to vector<34x34xf32>
    %142 = arith.mulf %137, %141 : vector<34x34xf32>
    %cst_59 = arith.constant dense<0.000000e+00> : vector<34x8xf32>
    %143 = tpu.matmul %142, %128, %cst_59 {dimension_numbers = #tpu.dot_dimension_numbers<[1], [0], [0], [1], [0, 0, 1, 1], [], []>} : vector<34x34xf32>, vector<34x8xf32>, vector<34x8xf32> -> vector<34x8xf32>
    %144 = vector.extract_strided_slice %124 {offsets = [0, 0], sizes = [8, 32], strides = [1, 1]} : vector<32x32xf32> to vector<8x32xf32>
    %cst_60 = arith.constant dense<0.000000e+00> : vector<34x32xf32>
    %145 = tpu.matmul %143, %144, %cst_60 {dimension_numbers = #tpu.dot_dimension_numbers<[1], [0], [0], [1], [0, 0, 1, 1], [], []>} : vector<34x8xf32>, vector<8x32xf32>, vector<34x32xf32> -> vector<34x32xf32>
    %146 = arith.addf %125, %145 : vector<34x32xf32>
    %147 = vector.extract_strided_slice %122 {offsets = [0, 8], sizes = [34, 8], strides = [1, 1]} : vector<34x96xf32> to vector<34x8xf32>
    %148 = vector.extract_strided_slice %122 {offsets = [0, 40], sizes = [34, 8], strides = [1, 1]} : vector<34x96xf32> to vector<34x8xf32>
    %149 = vector.extract_strided_slice %122 {offsets = [0, 72], sizes = [34, 8], strides = [1, 1]} : vector<34x96xf32> to vector<34x8xf32>
    %cst_61 = arith.constant dense<0.000000e+00> : vector<34x34xf32>
    %150 = tpu.matmul %147, %148, %cst_61 {dimension_numbers = #tpu.dot_dimension_numbers<[1], [1], [0], [0], [0, 0, 1, 0], [], []>} : vector<34x8xf32>, vector<34x8xf32>, vector<34x34xf32> -> vector<34x34xf32>
    %cst_62 = arith.constant 0.353553385 : f32
    %151 = vector.broadcast %cst_62 : f32 to vector<34x34xf32>
    %152 = arith.mulf %150, %151 : vector<34x34xf32>
    %153 = arith.addf %152, %93 : vector<34x34xf32>
    %cst_63 = arith.constant dense<0xFF800000> : vector<34xf32>
    %154 = vector.multi_reduction <maximumf>, %153, %cst_63 [1] : vector<34x34xf32> to vector<34xf32>
    %155 = vector.shape_cast %154 : vector<34xf32> to vector<34x1xf32>
    %156 = vector.broadcast %155 : vector<34x1xf32> to vector<34x34xf32>
    %157 = arith.subf %153, %156 : vector<34x34xf32>
    %158 = math.exp %157 : vector<34x34xf32>
    %cst_64 = arith.constant dense<0.000000e+00> : vector<34xf32>
    %159 = vector.multi_reduction <add>, %158, %cst_64 [1] : vector<34x34xf32> to vector<34xf32>
    %160 = vector.shape_cast %159 : vector<34xf32> to vector<34x1xf32>
    %161 = tpu.reciprocal %160 {approx = true} : vector<34x1xf32> -> vector<34x1xf32>
    %162 = vector.broadcast %161 : vector<34x1xf32> to vector<34x34xf32>
    %163 = arith.mulf %158, %162 : vector<34x34xf32>
    %cst_65 = arith.constant dense<0.000000e+00> : vector<34x8xf32>
    %164 = tpu.matmul %163, %149, %cst_65 {dimension_numbers = #tpu.dot_dimension_numbers<[1], [0], [0], [1], [0, 0, 1, 1], [], []>} : vector<34x34xf32>, vector<34x8xf32>, vector<34x8xf32> -> vector<34x8xf32>
    %165 = vector.extract_strided_slice %124 {offsets = [8, 0], sizes = [8, 32], strides = [1, 1]} : vector<32x32xf32> to vector<8x32xf32>
    %cst_66 = arith.constant dense<0.000000e+00> : vector<34x32xf32>
    %166 = tpu.matmul %164, %165, %cst_66 {dimension_numbers = #tpu.dot_dimension_numbers<[1], [0], [0], [1], [0, 0, 1, 1], [], []>} : vector<34x8xf32>, vector<8x32xf32>, vector<34x32xf32> -> vector<34x32xf32>
    %167 = arith.addf %146, %166 : vector<34x32xf32>
    %168 = vector.extract_strided_slice %122 {offsets = [0, 16], sizes = [34, 8], strides = [1, 1]} : vector<34x96xf32> to vector<34x8xf32>
    %169 = vector.extract_strided_slice %122 {offsets = [0, 48], sizes = [34, 8], strides = [1, 1]} : vector<34x96xf32> to vector<34x8xf32>
    %170 = vector.extract_strided_slice %122 {offsets = [0, 80], sizes = [34, 8], strides = [1, 1]} : vector<34x96xf32> to vector<34x8xf32>
    %cst_67 = arith.constant dense<0.000000e+00> : vector<34x34xf32>
    %171 = tpu.matmul %168, %169, %cst_67 {dimension_numbers = #tpu.dot_dimension_numbers<[1], [1], [0], [0], [0, 0, 1, 0], [], []>} : vector<34x8xf32>, vector<34x8xf32>, vector<34x34xf32> -> vector<34x34xf32>
    %cst_68 = arith.constant 0.353553385 : f32
    %172 = vector.broadcast %cst_68 : f32 to vector<34x34xf32>
    %173 = arith.mulf %171, %172 : vector<34x34xf32>
    %174 = arith.addf %173, %93 : vector<34x34xf32>
    %cst_69 = arith.constant dense<0xFF800000> : vector<34xf32>
    %175 = vector.multi_reduction <maximumf>, %174, %cst_69 [1] : vector<34x34xf32> to vector<34xf32>
    %176 = vector.shape_cast %175 : vector<34xf32> to vector<34x1xf32>
    %177 = vector.broadcast %176 : vector<34x1xf32> to vector<34x34xf32>
    %178 = arith.subf %174, %177 : vector<34x34xf32>
    %179 = math.exp %178 : vector<34x34xf32>
    %cst_70 = arith.constant dense<0.000000e+00> : vector<34xf32>
    %180 = vector.multi_reduction <add>, %179, %cst_70 [1] : vector<34x34xf32> to vector<34xf32>
    %181 = vector.shape_cast %180 : vector<34xf32> to vector<34x1xf32>
    %182 = tpu.reciprocal %181 {approx = true} : vector<34x1xf32> -> vector<34x1xf32>
    %183 = vector.broadcast %182 : vector<34x1xf32> to vector<34x34xf32>
    %184 = arith.mulf %179, %183 : vector<34x34xf32>
    %cst_71 = arith.constant dense<0.000000e+00> : vector<34x8xf32>
    %185 = tpu.matmul %184, %170, %cst_71 {dimension_numbers = #tpu.dot_dimension_numbers<[1], [0], [0], [1], [0, 0, 1, 1], [], []>} : vector<34x34xf32>, vector<34x8xf32>, vector<34x8xf32> -> vector<34x8xf32>
    %186 = vector.extract_strided_slice %124 {offsets = [16, 0], sizes = [8, 32], strides = [1, 1]} : vector<32x32xf32> to vector<8x32xf32>
    %cst_72 = arith.constant dense<0.000000e+00> : vector<34x32xf32>
    %187 = tpu.matmul %185, %186, %cst_72 {dimension_numbers = #tpu.dot_dimension_numbers<[1], [0], [0], [1], [0, 0, 1, 1], [], []>} : vector<34x8xf32>, vector<8x32xf32>, vector<34x32xf32> -> vector<34x32xf32>
    %188 = arith.addf %167, %187 : vector<34x32xf32>
    %189 = vector.extract_strided_slice %122 {offsets = [0, 24], sizes = [34, 8], strides = [1, 1]} : vector<34x96xf32> to vector<34x8xf32>
    %190 = vector.extract_strided_slice %122 {offsets = [0, 56], sizes = [34, 8], strides = [1, 1]} : vector<34x96xf32> to vector<34x8xf32>
    %191 = vector.extract_strided_slice %122 {offsets = [0, 88], sizes = [34, 8], strides = [1, 1]} : vector<34x96xf32> to vector<34x8xf32>
    %cst_73 = arith.constant dense<0.000000e+00> : vector<34x34xf32>
    %192 = tpu.matmul %189, %190, %cst_73 {dimension_numbers = #tpu.dot_dimension_numbers<[1], [1], [0], [0], [0, 0, 1, 0], [], []>} : vector<34x8xf32>, vector<34x8xf32>, vector<34x34xf32> -> vector<34x34xf32>
    %cst_74 = arith.constant 0.353553385 : f32
    %193 = vector.broadcast %cst_74 : f32 to vector<34x34xf32>
    %194 = arith.mulf %192, %193 : vector<34x34xf32>
    %195 = arith.addf %194, %93 : vector<34x34xf32>
    %cst_75 = arith.constant dense<0xFF800000> : vector<34xf32>
    %196 = vector.multi_reduction <maximumf>, %195, %cst_75 [1] : vector<34x34xf32> to vector<34xf32>
    %197 = vector.shape_cast %196 : vector<34xf32> to vector<34x1xf32>
    %198 = vector.broadcast %197 : vector<34x1xf32> to vector<34x34xf32>
    %199 = arith.subf %195, %198 : vector<34x34xf32>
    %200 = math.exp %199 : vector<34x34xf32>
    %cst_76 = arith.constant dense<0.000000e+00> : vector<34xf32>
    %201 = vector.multi_reduction <add>, %200, %cst_76 [1] : vector<34x34xf32> to vector<34xf32>
    %202 = vector.shape_cast %201 : vector<34xf32> to vector<34x1xf32>
    %203 = tpu.reciprocal %202 {approx = true} : vector<34x1xf32> -> vector<34x1xf32>
    %204 = vector.broadcast %203 : vector<34x1xf32> to vector<34x34xf32>
    %205 = arith.mulf %200, %204 : vector<34x34xf32>
    %cst_77 = arith.constant dense<0.000000e+00> : vector<34x8xf32>
    %206 = tpu.matmul %205, %191, %cst_77 {dimension_numbers = #tpu.dot_dimension_numbers<[1], [0], [0], [1], [0, 0, 1, 1], [], []>} : vector<34x34xf32>, vector<34x8xf32>, vector<34x8xf32> -> vector<34x8xf32>
    %207 = vector.extract_strided_slice %124 {offsets = [24, 0], sizes = [8, 32], strides = [1, 1]} : vector<32x32xf32> to vector<8x32xf32>
    %cst_78 = arith.constant dense<0.000000e+00> : vector<34x32xf32>
    %208 = tpu.matmul %206, %207, %cst_78 {dimension_numbers = #tpu.dot_dimension_numbers<[1], [0], [0], [1], [0, 0, 1, 1], [], []>} : vector<34x8xf32>, vector<8x32xf32>, vector<34x32xf32> -> vector<34x32xf32>
    %209 = arith.addf %188, %208 : vector<34x32xf32>
    %210 = arith.addf %65, %209 : vector<34x32xf32>
    %c0_79 = arith.constant 0 : index
    %c0_80 = arith.constant 0 : index
    %c0_81 = arith.constant 0 : index
    %211 = vector.load %arg13[%c0_79, %c0_80, %c0_81] : memref<2x1x32xf32, #tpu.memory_space<vmem>>, vector<1x1x32xf32>
    %212 = vector.shape_cast %211 : vector<1x1x32xf32> to vector<1x32xf32>
    %213 = vector.broadcast %212 : vector<1x32xf32> to vector<34x32xf32>
    %214 = arith.addf %210, %213 : vector<34x32xf32>
    %c0_82 = arith.constant 0 : index
    %c0_83 = arith.constant 0 : index
    %c0_84 = arith.constant 0 : index
    %215 = vector.load %arg14[%c0_82, %c0_83, %c0_84] : memref<2x1x32xf32, #tpu.memory_space<vmem>>, vector<1x1x32xf32>
    %216 = vector.shape_cast %215 : vector<1x1x32xf32> to vector<1x32xf32>
    %c0_85 = arith.constant 0 : index
    %c0_86 = arith.constant 0 : index
    %c0_87 = arith.constant 0 : index
    %217 = vector.load %arg15[%c0_85, %c0_86, %c0_87] : memref<2x1x32xf32, #tpu.memory_space<vmem>>, vector<1x1x32xf32>
    %218 = vector.shape_cast %217 : vector<1x1x32xf32> to vector<1x32xf32>
    %cst_88 = arith.constant dense<0.000000e+00> : vector<34xf32>
    %219 = vector.multi_reduction <add>, %214, %cst_88 [1] : vector<34x32xf32> to vector<34xf32>
    %220 = vector.shape_cast %219 : vector<34xf32> to vector<34x1xf32>
    %cst_89 = arith.constant 3.200000e+01 : f32
    %221 = vector.broadcast %cst_89 : f32 to vector<34x1xf32>
    %222 = arith.divf %220, %221 : vector<34x1xf32>
    %223 = vector.broadcast %222 : vector<34x1xf32> to vector<34x32xf32>
    %224 = arith.subf %214, %223 : vector<34x32xf32>
    %225 = arith.mulf %224, %224 : vector<34x32xf32>
    %cst_90 = arith.constant dense<0.000000e+00> : vector<34xf32>
    %226 = vector.multi_reduction <add>, %225, %cst_90 [1] : vector<34x32xf32> to vector<34xf32>
    %227 = vector.shape_cast %226 : vector<34xf32> to vector<34x1xf32>
    %cst_91 = arith.constant 3.200000e+01 : f32
    %228 = vector.broadcast %cst_91 : f32 to vector<34x1xf32>
    %229 = arith.divf %227, %228 : vector<34x1xf32>
    %230 = vector.broadcast %222 : vector<34x1xf32> to vector<34x32xf32>
    %231 = arith.subf %214, %230 : vector<34x32xf32>
    %cst_92 = arith.constant 9.99999974E-6 : f32
    %232 = vector.broadcast %cst_92 : f32 to vector<34x1xf32>
    %233 = arith.addf %229, %232 : vector<34x1xf32>
    %234 = math.rsqrt %233 : vector<34x1xf32>
    %235 = vector.broadcast %234 : vector<34x1xf32> to vector<34x32xf32>
    %236 = arith.mulf %231, %235 : vector<34x32xf32>
    %237 = vector.broadcast %216 : vector<1x32xf32> to vector<34x32xf32>
    %238 = arith.mulf %236, %237 : vector<34x32xf32>
    %239 = vector.broadcast %218 : vector<1x32xf32> to vector<34x32xf32>
    %240 = arith.addf %238, %239 : vector<34x32xf32>
    %c0_93 = arith.constant 0 : index
    %c0_94 = arith.constant 0 : index
    %c0_95 = arith.constant 0 : index
    %241 = vector.load %arg16[%c0_93, %c0_94, %c0_95] : memref<2x32x64xf32, #tpu.memory_space<vmem>>, vector<1x32x64xf32>
    %242 = vector.shape_cast %241 : vector<1x32x64xf32> to vector<32x64xf32>
    %cst_96 = arith.constant dense<0.000000e+00> : vector<34x64xf32>
    %243 = tpu.matmul %240, %242, %cst_96 {dimension_numbers = #tpu.dot_dimension_numbers<[1], [0], [0], [1], [0, 0, 1, 1], [], []>} : vector<34x32xf32>, vector<32x64xf32>, vector<34x64xf32> -> vector<34x64xf32>
    %c0_97 = arith.constant 0 : index
    %c0_98 = arith.constant 0 : index
    %c0_99 = arith.constant 0 : index
    %244 = vector.load %arg17[%c0_97, %c0_98, %c0_99] : memref<2x1x64xf32, #tpu.memory_space<vmem>>, vector<1x1x64xf32>
    %245 = vector.shape_cast %244 : vector<1x1x64xf32> to vector<1x64xf32>
    %246 = vector.broadcast %245 : vector<1x64xf32> to vector<34x64xf32>
    %247 = arith.addf %243, %246 : vector<34x64xf32>
    %cst_100 = arith.constant 5.000000e-01 : f32
    %248 = vector.broadcast %cst_100 : f32 to vector<34x64xf32>
    %249 = arith.mulf %248, %247 : vector<34x64xf32>
    %cst_101 = arith.constant 4.471500e-02 : f32
    %250 = vector.broadcast %cst_101 : f32 to vector<34x64xf32>
    %251 = arith.mulf %250, %247 : vector<34x64xf32>
    %252 = arith.mulf %251, %247 : vector<34x64xf32>
    %253 = arith.mulf %252, %247 : vector<34x64xf32>
    %254 = arith.addf %247, %253 : vector<34x64xf32>
    %cst_102 = arith.constant 0.797884583 : f32
    %255 = vector.broadcast %cst_102 : f32 to vector<34x64xf32>
    %256 = arith.mulf %255, %254 : vector<34x64xf32>
    %257 = math.tanh %256 : vector<34x64xf32>
    %cst_103 = arith.constant 1.000000e+00 : f32
    %258 = vector.broadcast %cst_103 : f32 to vector<34x64xf32>
    %259 = arith.addf %258, %257 : vector<34x64xf32>
    %260 = arith.mulf %249, %259 : vector<34x64xf32>
    %c0_104 = arith.constant 0 : index
    %c0_105 = arith.constant 0 : index
    %c0_106 = arith.constant 0 : index
    %261 = vector.load %arg18[%c0_104, %c0_105, %c0_106] : memref<2x64x32xf32, #tpu.memory_space<vmem>>, vector<1x64x32xf32>
    %262 = vector.shape_cast %261 : vector<1x64x32xf32> to vector<64x32xf32>
    %cst_107 = arith.constant dense<0.000000e+00> : vector<34x32xf32>
    %263 = tpu.matmul %260, %262, %cst_107 {dimension_numbers = #tpu.dot_dimension_numbers<[1], [0], [0], [1], [0, 0, 1, 1], [], []>} : vector<34x64xf32>, vector<64x32xf32>, vector<34x32xf32> -> vector<34x32xf32>
    %264 = arith.addf %214, %263 : vector<34x32xf32>
    %c0_108 = arith.constant 0 : index
    %c0_109 = arith.constant 0 : index
    %c0_110 = arith.constant 0 : index
    %265 = vector.load %arg19[%c0_108, %c0_109, %c0_110] : memref<2x1x32xf32, #tpu.memory_space<vmem>>, vector<1x1x32xf32>
    %266 = vector.shape_cast %265 : vector<1x1x32xf32> to vector<1x32xf32>
    %267 = vector.broadcast %266 : vector<1x32xf32> to vector<34x32xf32>
    %268 = arith.addf %264, %267 : vector<34x32xf32>
    %c1 = arith.constant 1 : index
    %c0_111 = arith.constant 0 : index
    %c0_112 = arith.constant 0 : index
    %269 = vector.load %arg9[%c1, %c0_111, %c0_112] : memref<2x1x32xf32, #tpu.memory_space<vmem>>, vector<1x1x32xf32>
    %270 = vector.shape_cast %269 : vector<1x1x32xf32> to vector<1x32xf32>
    %c1_113 = arith.constant 1 : index
    %c0_114 = arith.constant 0 : index
    %c0_115 = arith.constant 0 : index
    %271 = vector.load %arg10[%c1_113, %c0_114, %c0_115] : memref<2x1x32xf32, #tpu.memory_space<vmem>>, vector<1x1x32xf32>
    %272 = vector.shape_cast %271 : vector<1x1x32xf32> to vector<1x32xf32>
    %cst_116 = arith.constant dense<0.000000e+00> : vector<34xf32>
    %273 = vector.multi_reduction <add>, %268, %cst_116 [1] : vector<34x32xf32> to vector<34xf32>
    %274 = vector.shape_cast %273 : vector<34xf32> to vector<34x1xf32>
    %cst_117 = arith.constant 3.200000e+01 : f32
    %275 = vector.broadcast %cst_117 : f32 to vector<34x1xf32>
    %276 = arith.divf %274, %275 : vector<34x1xf32>
    %277 = vector.broadcast %276 : vector<34x1xf32> to vector<34x32xf32>
    %278 = arith.subf %268, %277 : vector<34x32xf32>
    %279 = arith.mulf %278, %278 : vector<34x32xf32>
    %cst_118 = arith.constant dense<0.000000e+00> : vector<34xf32>
    %280 = vector.multi_reduction <add>, %279, %cst_118 [1] : vector<34x32xf32> to vector<34xf32>
    %281 = vector.shape_cast %280 : vector<34xf32> to vector<34x1xf32>
    %cst_119 = arith.constant 3.200000e+01 : f32
    %282 = vector.broadcast %cst_119 : f32 to vector<34x1xf32>
    %283 = arith.divf %281, %282 : vector<34x1xf32>
    %284 = vector.broadcast %276 : vector<34x1xf32> to vector<34x32xf32>
    %285 = arith.subf %268, %284 : vector<34x32xf32>
    %cst_120 = arith.constant 9.99999974E-6 : f32
    %286 = vector.broadcast %cst_120 : f32 to vector<34x1xf32>
    %287 = arith.addf %283, %286 : vector<34x1xf32>
    %288 = math.rsqrt %287 : vector<34x1xf32>
    %289 = vector.broadcast %288 : vector<34x1xf32> to vector<34x32xf32>
    %290 = arith.mulf %285, %289 : vector<34x32xf32>
    %291 = vector.broadcast %270 : vector<1x32xf32> to vector<34x32xf32>
    %292 = arith.mulf %290, %291 : vector<34x32xf32>
    %293 = vector.broadcast %272 : vector<1x32xf32> to vector<34x32xf32>
    %294 = arith.addf %292, %293 : vector<34x32xf32>
    %c1_121 = arith.constant 1 : index
    %c0_122 = arith.constant 0 : index
    %c0_123 = arith.constant 0 : index
    %295 = vector.load %arg11[%c1_121, %c0_122, %c0_123] : memref<2x32x96xf32, #tpu.memory_space<vmem>>, vector<1x32x96xf32>
    %296 = vector.shape_cast %295 : vector<1x32x96xf32> to vector<32x96xf32>
    %cst_124 = arith.constant dense<0.000000e+00> : vector<34x96xf32>
    %297 = tpu.matmul %294, %296, %cst_124 {dimension_numbers = #tpu.dot_dimension_numbers<[1], [0], [0], [1], [0, 0, 1, 1], [], []>} : vector<34x32xf32>, vector<32x96xf32>, vector<34x96xf32> -> vector<34x96xf32>
    %c1_125 = arith.constant 1 : index
    %c0_126 = arith.constant 0 : index
    %c0_127 = arith.constant 0 : index
    %298 = vector.load %arg12[%c1_125, %c0_126, %c0_127] : memref<2x32x32xf32, #tpu.memory_space<vmem>>, vector<1x32x32xf32>
    %299 = vector.shape_cast %298 : vector<1x32x32xf32> to vector<32x32xf32>
    %cst_128 = arith.constant 0.000000e+00 : f32
    %300 = vector.broadcast %cst_128 : f32 to vector<34x32xf32>
    %301 = vector.extract_strided_slice %297 {offsets = [0, 0], sizes = [34, 8], strides = [1, 1]} : vector<34x96xf32> to vector<34x8xf32>
    %302 = vector.extract_strided_slice %297 {offsets = [0, 32], sizes = [34, 8], strides = [1, 1]} : vector<34x96xf32> to vector<34x8xf32>
    %303 = vector.extract_strided_slice %297 {offsets = [0, 64], sizes = [34, 8], strides = [1, 1]} : vector<34x96xf32> to vector<34x8xf32>
    %cst_129 = arith.constant dense<0.000000e+00> : vector<34x34xf32>
    %304 = tpu.matmul %301, %302, %cst_129 {dimension_numbers = #tpu.dot_dimension_numbers<[1], [1], [0], [0], [0, 0, 1, 0], [], []>} : vector<34x8xf32>, vector<34x8xf32>, vector<34x34xf32> -> vector<34x34xf32>
    %cst_130 = arith.constant 0.353553385 : f32
    %305 = vector.broadcast %cst_130 : f32 to vector<34x34xf32>
    %306 = arith.mulf %304, %305 : vector<34x34xf32>
    %307 = arith.addf %306, %93 : vector<34x34xf32>
    %cst_131 = arith.constant dense<0xFF800000> : vector<34xf32>
    %308 = vector.multi_reduction <maximumf>, %307, %cst_131 [1] : vector<34x34xf32> to vector<34xf32>
    %309 = vector.shape_cast %308 : vector<34xf32> to vector<34x1xf32>
    %310 = vector.broadcast %309 : vector<34x1xf32> to vector<34x34xf32>
    %311 = arith.subf %307, %310 : vector<34x34xf32>
    %312 = math.exp %311 : vector<34x34xf32>
    %cst_132 = arith.constant dense<0.000000e+00> : vector<34xf32>
    %313 = vector.multi_reduction <add>, %312, %cst_132 [1] : vector<34x34xf32> to vector<34xf32>
    %314 = vector.shape_cast %313 : vector<34xf32> to vector<34x1xf32>
    %315 = tpu.reciprocal %314 {approx = true} : vector<34x1xf32> -> vector<34x1xf32>
    %316 = vector.broadcast %315 : vector<34x1xf32> to vector<34x34xf32>
    %317 = arith.mulf %312, %316 : vector<34x34xf32>
    %cst_133 = arith.constant dense<0.000000e+00> : vector<34x8xf32>
    %318 = tpu.matmul %317, %303, %cst_133 {dimension_numbers = #tpu.dot_dimension_numbers<[1], [0], [0], [1], [0, 0, 1, 1], [], []>} : vector<34x34xf32>, vector<34x8xf32>, vector<34x8xf32> -> vector<34x8xf32>
    %319 = vector.extract_strided_slice %299 {offsets = [0, 0], sizes = [8, 32], strides = [1, 1]} : vector<32x32xf32> to vector<8x32xf32>
    %cst_134 = arith.constant dense<0.000000e+00> : vector<34x32xf32>
    %320 = tpu.matmul %318, %319, %cst_134 {dimension_numbers = #tpu.dot_dimension_numbers<[1], [0], [0], [1], [0, 0, 1, 1], [], []>} : vector<34x8xf32>, vector<8x32xf32>, vector<34x32xf32> -> vector<34x32xf32>
    %321 = arith.addf %300, %320 : vector<34x32xf32>
    %322 = vector.extract_strided_slice %297 {offsets = [0, 8], sizes = [34, 8], strides = [1, 1]} : vector<34x96xf32> to vector<34x8xf32>
    %323 = vector.extract_strided_slice %297 {offsets = [0, 40], sizes = [34, 8], strides = [1, 1]} : vector<34x96xf32> to vector<34x8xf32>
    %324 = vector.extract_strided_slice %297 {offsets = [0, 72], sizes = [34, 8], strides = [1, 1]} : vector<34x96xf32> to vector<34x8xf32>
    %cst_135 = arith.constant dense<0.000000e+00> : vector<34x34xf32>
    %325 = tpu.matmul %322, %323, %cst_135 {dimension_numbers = #tpu.dot_dimension_numbers<[1], [1], [0], [0], [0, 0, 1, 0], [], []>} : vector<34x8xf32>, vector<34x8xf32>, vector<34x34xf32> -> vector<34x34xf32>
    %cst_136 = arith.constant 0.353553385 : f32
    %326 = vector.broadcast %cst_136 : f32 to vector<34x34xf32>
    %327 = arith.mulf %325, %326 : vector<34x34xf32>
    %328 = arith.addf %327, %93 : vector<34x34xf32>
    %cst_137 = arith.constant dense<0xFF800000> : vector<34xf32>
    %329 = vector.multi_reduction <maximumf>, %328, %cst_137 [1] : vector<34x34xf32> to vector<34xf32>
    %330 = vector.shape_cast %329 : vector<34xf32> to vector<34x1xf32>
    %331 = vector.broadcast %330 : vector<34x1xf32> to vector<34x34xf32>
    %332 = arith.subf %328, %331 : vector<34x34xf32>
    %333 = math.exp %332 : vector<34x34xf32>
    %cst_138 = arith.constant dense<0.000000e+00> : vector<34xf32>
    %334 = vector.multi_reduction <add>, %333, %cst_138 [1] : vector<34x34xf32> to vector<34xf32>
    %335 = vector.shape_cast %334 : vector<34xf32> to vector<34x1xf32>
    %336 = tpu.reciprocal %335 {approx = true} : vector<34x1xf32> -> vector<34x1xf32>
    %337 = vector.broadcast %336 : vector<34x1xf32> to vector<34x34xf32>
    %338 = arith.mulf %333, %337 : vector<34x34xf32>
    %cst_139 = arith.constant dense<0.000000e+00> : vector<34x8xf32>
    %339 = tpu.matmul %338, %324, %cst_139 {dimension_numbers = #tpu.dot_dimension_numbers<[1], [0], [0], [1], [0, 0, 1, 1], [], []>} : vector<34x34xf32>, vector<34x8xf32>, vector<34x8xf32> -> vector<34x8xf32>
    %340 = vector.extract_strided_slice %299 {offsets = [8, 0], sizes = [8, 32], strides = [1, 1]} : vector<32x32xf32> to vector<8x32xf32>
    %cst_140 = arith.constant dense<0.000000e+00> : vector<34x32xf32>
    %341 = tpu.matmul %339, %340, %cst_140 {dimension_numbers = #tpu.dot_dimension_numbers<[1], [0], [0], [1], [0, 0, 1, 1], [], []>} : vector<34x8xf32>, vector<8x32xf32>, vector<34x32xf32> -> vector<34x32xf32>
    %342 = arith.addf %321, %341 : vector<34x32xf32>
    %343 = vector.extract_strided_slice %297 {offsets = [0, 16], sizes = [34, 8], strides = [1, 1]} : vector<34x96xf32> to vector<34x8xf32>
    %344 = vector.extract_strided_slice %297 {offsets = [0, 48], sizes = [34, 8], strides = [1, 1]} : vector<34x96xf32> to vector<34x8xf32>
    %345 = vector.extract_strided_slice %297 {offsets = [0, 80], sizes = [34, 8], strides = [1, 1]} : vector<34x96xf32> to vector<34x8xf32>
    %cst_141 = arith.constant dense<0.000000e+00> : vector<34x34xf32>
    %346 = tpu.matmul %343, %344, %cst_141 {dimension_numbers = #tpu.dot_dimension_numbers<[1], [1], [0], [0], [0, 0, 1, 0], [], []>} : vector<34x8xf32>, vector<34x8xf32>, vector<34x34xf32> -> vector<34x34xf32>
    %cst_142 = arith.constant 0.353553385 : f32
    %347 = vector.broadcast %cst_142 : f32 to vector<34x34xf32>
    %348 = arith.mulf %346, %347 : vector<34x34xf32>
    %349 = arith.addf %348, %93 : vector<34x34xf32>
    %cst_143 = arith.constant dense<0xFF800000> : vector<34xf32>
    %350 = vector.multi_reduction <maximumf>, %349, %cst_143 [1] : vector<34x34xf32> to vector<34xf32>
    %351 = vector.shape_cast %350 : vector<34xf32> to vector<34x1xf32>
    %352 = vector.broadcast %351 : vector<34x1xf32> to vector<34x34xf32>
    %353 = arith.subf %349, %352 : vector<34x34xf32>
    %354 = math.exp %353 : vector<34x34xf32>
    %cst_144 = arith.constant dense<0.000000e+00> : vector<34xf32>
    %355 = vector.multi_reduction <add>, %354, %cst_144 [1] : vector<34x34xf32> to vector<34xf32>
    %356 = vector.shape_cast %355 : vector<34xf32> to vector<34x1xf32>
    %357 = tpu.reciprocal %356 {approx = true} : vector<34x1xf32> -> vector<34x1xf32>
    %358 = vector.broadcast %357 : vector<34x1xf32> to vector<34x34xf32>
    %359 = arith.mulf %354, %358 : vector<34x34xf32>
    %cst_145 = arith.constant dense<0.000000e+00> : vector<34x8xf32>
    %360 = tpu.matmul %359, %345, %cst_145 {dimension_numbers = #tpu.dot_dimension_numbers<[1], [0], [0], [1], [0, 0, 1, 1], [], []>} : vector<34x34xf32>, vector<34x8xf32>, vector<34x8xf32> -> vector<34x8xf32>
    %361 = vector.extract_strided_slice %299 {offsets = [16, 0], sizes = [8, 32], strides = [1, 1]} : vector<32x32xf32> to vector<8x32xf32>
    %cst_146 = arith.constant dense<0.000000e+00> : vector<34x32xf32>
    %362 = tpu.matmul %360, %361, %cst_146 {dimension_numbers = #tpu.dot_dimension_numbers<[1], [0], [0], [1], [0, 0, 1, 1], [], []>} : vector<34x8xf32>, vector<8x32xf32>, vector<34x32xf32> -> vector<34x32xf32>
    %363 = arith.addf %342, %362 : vector<34x32xf32>
    %364 = vector.extract_strided_slice %297 {offsets = [0, 24], sizes = [34, 8], strides = [1, 1]} : vector<34x96xf32> to vector<34x8xf32>
    %365 = vector.extract_strided_slice %297 {offsets = [0, 56], sizes = [34, 8], strides = [1, 1]} : vector<34x96xf32> to vector<34x8xf32>
    %366 = vector.extract_strided_slice %297 {offsets = [0, 88], sizes = [34, 8], strides = [1, 1]} : vector<34x96xf32> to vector<34x8xf32>
    %cst_147 = arith.constant dense<0.000000e+00> : vector<34x34xf32>
    %367 = tpu.matmul %364, %365, %cst_147 {dimension_numbers = #tpu.dot_dimension_numbers<[1], [1], [0], [0], [0, 0, 1, 0], [], []>} : vector<34x8xf32>, vector<34x8xf32>, vector<34x34xf32> -> vector<34x34xf32>
    %cst_148 = arith.constant 0.353553385 : f32
    %368 = vector.broadcast %cst_148 : f32 to vector<34x34xf32>
    %369 = arith.mulf %367, %368 : vector<34x34xf32>
    %370 = arith.addf %369, %93 : vector<34x34xf32>
    %cst_149 = arith.constant dense<0xFF800000> : vector<34xf32>
    %371 = vector.multi_reduction <maximumf>, %370, %cst_149 [1] : vector<34x34xf32> to vector<34xf32>
    %372 = vector.shape_cast %371 : vector<34xf32> to vector<34x1xf32>
    %373 = vector.broadcast %372 : vector<34x1xf32> to vector<34x34xf32>
    %374 = arith.subf %370, %373 : vector<34x34xf32>
    %375 = math.exp %374 : vector<34x34xf32>
    %cst_150 = arith.constant dense<0.000000e+00> : vector<34xf32>
    %376 = vector.multi_reduction <add>, %375, %cst_150 [1] : vector<34x34xf32> to vector<34xf32>
    %377 = vector.shape_cast %376 : vector<34xf32> to vector<34x1xf32>
    %378 = tpu.reciprocal %377 {approx = true} : vector<34x1xf32> -> vector<34x1xf32>
    %379 = vector.broadcast %378 : vector<34x1xf32> to vector<34x34xf32>
    %380 = arith.mulf %375, %379 : vector<34x34xf32>
    %cst_151 = arith.constant dense<0.000000e+00> : vector<34x8xf32>
    %381 = tpu.matmul %380, %366, %cst_151 {dimension_numbers = #tpu.dot_dimension_numbers<[1], [0], [0], [1], [0, 0, 1, 1], [], []>} : vector<34x34xf32>, vector<34x8xf32>, vector<34x8xf32> -> vector<34x8xf32>
    %382 = vector.extract_strided_slice %299 {offsets = [24, 0], sizes = [8, 32], strides = [1, 1]} : vector<32x32xf32> to vector<8x32xf32>
    %cst_152 = arith.constant dense<0.000000e+00> : vector<34x32xf32>
    %383 = tpu.matmul %381, %382, %cst_152 {dimension_numbers = #tpu.dot_dimension_numbers<[1], [0], [0], [1], [0, 0, 1, 1], [], []>} : vector<34x8xf32>, vector<8x32xf32>, vector<34x32xf32> -> vector<34x32xf32>
    %384 = arith.addf %363, %383 : vector<34x32xf32>
    %385 = arith.addf %268, %384 : vector<34x32xf32>
    %c1_153 = arith.constant 1 : index
    %c0_154 = arith.constant 0 : index
    %c0_155 = arith.constant 0 : index
    %386 = vector.load %arg13[%c1_153, %c0_154, %c0_155] : memref<2x1x32xf32, #tpu.memory_space<vmem>>, vector<1x1x32xf32>
    %387 = vector.shape_cast %386 : vector<1x1x32xf32> to vector<1x32xf32>
    %388 = vector.broadcast %387 : vector<1x32xf32> to vector<34x32xf32>
    %389 = arith.addf %385, %388 : vector<34x32xf32>
    %c1_156 = arith.constant 1 : index
    %c0_157 = arith.constant 0 : index
    %c0_158 = arith.constant 0 : index
    %390 = vector.load %arg14[%c1_156, %c0_157, %c0_158] : memref<2x1x32xf32, #tpu.memory_space<vmem>>, vector<1x1x32xf32>
    %391 = vector.shape_cast %390 : vector<1x1x32xf32> to vector<1x32xf32>
    %c1_159 = arith.constant 1 : index
    %c0_160 = arith.constant 0 : index
    %c0_161 = arith.constant 0 : index
    %392 = vector.load %arg15[%c1_159, %c0_160, %c0_161] : memref<2x1x32xf32, #tpu.memory_space<vmem>>, vector<1x1x32xf32>
    %393 = vector.shape_cast %392 : vector<1x1x32xf32> to vector<1x32xf32>
    %cst_162 = arith.constant dense<0.000000e+00> : vector<34xf32>
    %394 = vector.multi_reduction <add>, %389, %cst_162 [1] : vector<34x32xf32> to vector<34xf32>
    %395 = vector.shape_cast %394 : vector<34xf32> to vector<34x1xf32>
    %cst_163 = arith.constant 3.200000e+01 : f32
    %396 = vector.broadcast %cst_163 : f32 to vector<34x1xf32>
    %397 = arith.divf %395, %396 : vector<34x1xf32>
    %398 = vector.broadcast %397 : vector<34x1xf32> to vector<34x32xf32>
    %399 = arith.subf %389, %398 : vector<34x32xf32>
    %400 = arith.mulf %399, %399 : vector<34x32xf32>
    %cst_164 = arith.constant dense<0.000000e+00> : vector<34xf32>
    %401 = vector.multi_reduction <add>, %400, %cst_164 [1] : vector<34x32xf32> to vector<34xf32>
    %402 = vector.shape_cast %401 : vector<34xf32> to vector<34x1xf32>
    %cst_165 = arith.constant 3.200000e+01 : f32
    %403 = vector.broadcast %cst_165 : f32 to vector<34x1xf32>
    %404 = arith.divf %402, %403 : vector<34x1xf32>
    %405 = vector.broadcast %397 : vector<34x1xf32> to vector<34x32xf32>
    %406 = arith.subf %389, %405 : vector<34x32xf32>
    %cst_166 = arith.constant 9.99999974E-6 : f32
    %407 = vector.broadcast %cst_166 : f32 to vector<34x1xf32>
    %408 = arith.addf %404, %407 : vector<34x1xf32>
    %409 = math.rsqrt %408 : vector<34x1xf32>
    %410 = vector.broadcast %409 : vector<34x1xf32> to vector<34x32xf32>
    %411 = arith.mulf %406, %410 : vector<34x32xf32>
    %412 = vector.broadcast %391 : vector<1x32xf32> to vector<34x32xf32>
    %413 = arith.mulf %411, %412 : vector<34x32xf32>
    %414 = vector.broadcast %393 : vector<1x32xf32> to vector<34x32xf32>
    %415 = arith.addf %413, %414 : vector<34x32xf32>
    %c1_167 = arith.constant 1 : index
    %c0_168 = arith.constant 0 : index
    %c0_169 = arith.constant 0 : index
    %416 = vector.load %arg16[%c1_167, %c0_168, %c0_169] : memref<2x32x64xf32, #tpu.memory_space<vmem>>, vector<1x32x64xf32>
    %417 = vector.shape_cast %416 : vector<1x32x64xf32> to vector<32x64xf32>
    %cst_170 = arith.constant dense<0.000000e+00> : vector<34x64xf32>
    %418 = tpu.matmul %415, %417, %cst_170 {dimension_numbers = #tpu.dot_dimension_numbers<[1], [0], [0], [1], [0, 0, 1, 1], [], []>} : vector<34x32xf32>, vector<32x64xf32>, vector<34x64xf32> -> vector<34x64xf32>
    %c1_171 = arith.constant 1 : index
    %c0_172 = arith.constant 0 : index
    %c0_173 = arith.constant 0 : index
    %419 = vector.load %arg17[%c1_171, %c0_172, %c0_173] : memref<2x1x64xf32, #tpu.memory_space<vmem>>, vector<1x1x64xf32>
    %420 = vector.shape_cast %419 : vector<1x1x64xf32> to vector<1x64xf32>
    %421 = vector.broadcast %420 : vector<1x64xf32> to vector<34x64xf32>
    %422 = arith.addf %418, %421 : vector<34x64xf32>
    %cst_174 = arith.constant 5.000000e-01 : f32
    %423 = vector.broadcast %cst_174 : f32 to vector<34x64xf32>
    %424 = arith.mulf %423, %422 : vector<34x64xf32>
    %cst_175 = arith.constant 4.471500e-02 : f32
    %425 = vector.broadcast %cst_175 : f32 to vector<34x64xf32>
    %426 = arith.mulf %425, %422 : vector<34x64xf32>
    %427 = arith.mulf %426, %422 : vector<34x64xf32>
    %428 = arith.mulf %427, %422 : vector<34x64xf32>
    %429 = arith.addf %422, %428 : vector<34x64xf32>
    %cst_176 = arith.constant 0.797884583 : f32
    %430 = vector.broadcast %cst_176 : f32 to vector<34x64xf32>
    %431 = arith.mulf %430, %429 : vector<34x64xf32>
    %432 = math.tanh %431 : vector<34x64xf32>
    %cst_177 = arith.constant 1.000000e+00 : f32
    %433 = vector.broadcast %cst_177 : f32 to vector<34x64xf32>
    %434 = arith.addf %433, %432 : vector<34x64xf32>
    %435 = arith.mulf %424, %434 : vector<34x64xf32>
    %c1_178 = arith.constant 1 : index
    %c0_179 = arith.constant 0 : index
    %c0_180 = arith.constant 0 : index
    %436 = vector.load %arg18[%c1_178, %c0_179, %c0_180] : memref<2x64x32xf32, #tpu.memory_space<vmem>>, vector<1x64x32xf32>
    %437 = vector.shape_cast %436 : vector<1x64x32xf32> to vector<64x32xf32>
    %cst_181 = arith.constant dense<0.000000e+00> : vector<34x32xf32>
    %438 = tpu.matmul %435, %437, %cst_181 {dimension_numbers = #tpu.dot_dimension_numbers<[1], [0], [0], [1], [0, 0, 1, 1], [], []>} : vector<34x64xf32>, vector<64x32xf32>, vector<34x32xf32> -> vector<34x32xf32>
    %439 = arith.addf %389, %438 : vector<34x32xf32>
    %c1_182 = arith.constant 1 : index
    %c0_183 = arith.constant 0 : index
    %c0_184 = arith.constant 0 : index
    %440 = vector.load %arg19[%c1_182, %c0_183, %c0_184] : memref<2x1x32xf32, #tpu.memory_space<vmem>>, vector<1x1x32xf32>
    %441 = vector.shape_cast %440 : vector<1x1x32xf32> to vector<1x32xf32>
    %442 = vector.broadcast %441 : vector<1x32xf32> to vector<34x32xf32>
    %443 = arith.addf %439, %442 : vector<34x32xf32>
    %444 = tpu.iota {dimensions = array<i32: 0>} : vector<2x34xi32>
    %445 = tpu.iota {dimensions = array<i32: 1>} : vector<2x34xi32>
    %c17_i32_185 = arith.constant 17 : i32
    %446 = vector.broadcast %c17_i32_185 : i32 to vector<2x34xi32>
    %447 = arith.muli %444, %446 : vector<2x34xi32>
    %448 = arith.cmpi eq, %445, %447 : vector<2x34xi32>
    %449 = arith.extui %448 : vector<2x34xi1> to vector<2x34xi32>
    %450 = arith.sitofp %449 : vector<2x34xi32> to vector<2x34xf32>
    %cst_186 = arith.constant dense<0.000000e+00> : vector<2x32xf32>
    %451 = tpu.matmul %450, %443, %cst_186 {dimension_numbers = #tpu.dot_dimension_numbers<[1], [0], [0], [1], [0, 0, 1, 1], [], []>} : vector<2x34xf32>, vector<34x32xf32>, vector<2x32xf32> -> vector<2x32xf32>
    %c0_187 = arith.constant 0 : index
    %c0_188 = arith.constant 0 : index
    %452 = vector.load %arg20[%c0_187, %c0_188] : memref<1x32xf32, #tpu.memory_space<vmem>>, vector<1x32xf32>
    %c0_189 = arith.constant 0 : index
    %c0_190 = arith.constant 0 : index
    %453 = vector.load %arg21[%c0_189, %c0_190] : memref<1x32xf32, #tpu.memory_space<vmem>>, vector<1x32xf32>
    %cst_191 = arith.constant dense<0.000000e+00> : vector<2xf32>
    %454 = vector.multi_reduction <add>, %451, %cst_191 [1] : vector<2x32xf32> to vector<2xf32>
    %455 = vector.shape_cast %454 : vector<2xf32> to vector<2x1xf32>
    %cst_192 = arith.constant 3.200000e+01 : f32
    %456 = vector.broadcast %cst_192 : f32 to vector<2x1xf32>
    %457 = arith.divf %455, %456 : vector<2x1xf32>
    %458 = vector.broadcast %457 : vector<2x1xf32> to vector<2x32xf32>
    %459 = arith.subf %451, %458 : vector<2x32xf32>
    %460 = arith.mulf %459, %459 : vector<2x32xf32>
    %cst_193 = arith.constant dense<0.000000e+00> : vector<2xf32>
    %461 = vector.multi_reduction <add>, %460, %cst_193 [1] : vector<2x32xf32> to vector<2xf32>
    %462 = vector.shape_cast %461 : vector<2xf32> to vector<2x1xf32>
    %cst_194 = arith.constant 3.200000e+01 : f32
    %463 = vector.broadcast %cst_194 : f32 to vector<2x1xf32>
    %464 = arith.divf %462, %463 : vector<2x1xf32>
    %465 = vector.broadcast %457 : vector<2x1xf32> to vector<2x32xf32>
    %466 = arith.subf %451, %465 : vector<2x32xf32>
    %cst_195 = arith.constant 9.99999974E-6 : f32
    %467 = vector.broadcast %cst_195 : f32 to vector<2x1xf32>
    %468 = arith.addf %464, %467 : vector<2x1xf32>
    %469 = math.rsqrt %468 : vector<2x1xf32>
    %470 = vector.broadcast %469 : vector<2x1xf32> to vector<2x32xf32>
    %471 = arith.mulf %466, %470 : vector<2x32xf32>
    %472 = vector.broadcast %452 : vector<1x32xf32> to vector<2x32xf32>
    %473 = arith.mulf %471, %472 : vector<2x32xf32>
    %474 = vector.broadcast %453 : vector<1x32xf32> to vector<2x32xf32>
    %475 = arith.addf %473, %474 : vector<2x32xf32>
    %c0_196 = arith.constant 0 : index
    %c0_197 = arith.constant 0 : index
    %476 = vector.load %arg22[%c0_196, %c0_197] : memref<32x10xf32, #tpu.memory_space<vmem>>, vector<32x10xf32>
    %cst_198 = arith.constant dense<0.000000e+00> : vector<2x10xf32>
    %477 = tpu.matmul %475, %476, %cst_198 {dimension_numbers = #tpu.dot_dimension_numbers<[1], [0], [0], [1], [0, 0, 1, 1], [], []>} : vector<2x32xf32>, vector<32x10xf32>, vector<2x10xf32> -> vector<2x10xf32>
    %c0_199 = arith.constant 0 : index
    %c0_200 = arith.constant 0 : index
    %478 = vector.load %arg23[%c0_199, %c0_200] : memref<1x10xf32, #tpu.memory_space<vmem>>, vector<1x10xf32>
    %479 = vector.broadcast %478 : vector<1x10xf32> to vector<2x10xf32>
    %480 = arith.addf %477, %479 : vector<2x10xf32>
    %c0_201 = arith.constant 0 : index
    %c0_202 = arith.constant 0 : index
    %481 = vector.load %arg24[%c0_201, %c0_202] : memref<2x10xf32, #tpu.memory_space<vmem>>, vector<2x10xf32>
    tpu.vector_store %arg24[%c0_201, %c0_202], %480 {strides = array<i32>} : memref<2x10xf32, #tpu.memory_space<vmem>>, vector<2x10xf32>,
    return
  }
}

</mosaic_0001>

<bundles_post_ra>
// kernel: tile.9
= control target key start
LH: loop header
LB: loop body
LE: loop exit
PB: predicated region body
PF: predicated region fallthrough
CT: control target
= control target key end

     0   :  { %vm3_vm0 = vcmask 261120   ;;  %s11_s6 = smov 3  ;;  %s74_s0 = inlined_call_operand.vmem [shape: f32[2,17,32], index: 0, kind: input, shape index: {}]   ;;  %s75_s1 = inlined_call_operand.vmem [shape: f32[34,32], index: 1, kind: output, shape index: {}]  }
   0x1   :  { %v2_v0 = vld [vmem:[%s74_s0] sm:$0xff]   ;;  %v26_v1 = vld [vmem:[%s74_s0 + $0x8] sm:$0xff]  }
   0x2   :  { %v28_v2 = vld [vmem:[%s74_s0 + $0x10] ss:$8 sm:%s11_s6]   ;;  %4 = vst.msk [vmem:[%s75_s1] sm:$0xff] %vm3_vm0, %v2_v0   ;;  %27 = vst.msk [vmem:[%s75_s1 + $0x8] sm:$0xff] %vm3_vm0, %v26_v1  }
   0x3   :  { %29 = vst.msk [vmem:[%s75_s1 + $0x10] sm:$0x3] %vm3_vm0, %v28_v2   ;;  %v30_v3 = vld [vmem:[%s74_s0 + $0x19] sm:$0xff]   ;;  %v32_v4 = vld [vmem:[%s74_s0 + $0x21] sm:$0xff]  }
   0x4   :  { %31 = vst.msk [vmem:[%s75_s1 + $0x12] sm:$0xff] %vm3_vm0, %v30_v3   ;;  %33 = vst.msk [vmem:[%s75_s1 + $0x1a] sm:$0xff] %vm3_vm0, %v32_v4  }

// kernel: vit_forward.1
= control target key start
LH: loop header
LB: loop body
LE: loop exit
PB: predicated region body
PF: predicated region fallthrough
CT: control target
= control target key end

     0   :  { %s8817_s0 = inlined_call_operand.vmem [shape: f32[34,64], index: 0, kind: input, shape index: {}]   ;;  %s8818_s1 = inlined_call_operand.vmem [shape: f32[1,32], index: 1, kind: input, shape index: {}]   ;;  %s8819_s2 = inlined_call_operand.vmem [shape: f32[34,32], index: 2, kind: input, shape index: {}]   ;;  %s8820_s3 = inlined_call_operand.vmem [shape: f32[1,64], index: 3, kind: input, shape index: {}]   ;;  %s8821_s4 = inlined_call_operand.vmem [shape: f32[1,64], index: 4, kind: input, shape index: {}]   ;;  %s8822_s5 = inlined_call_operand.vmem [shape: f32[64,32], index: 5, kind: input, shape index: {}]   ;;  %s8823_s6 = inlined_call_operand.vmem [shape: f32[1,32], index: 6, kind: input, shape index: {}]   ;;  %s8824_s7 = inlined_call_operand.vmem [shape: f32[1,32], index: 7, kind: input, shape index: {}]   ;;  %s8825_s8 = inlined_call_operand.vmem [shape: f32[1,32], index: 8, kind: input, shape index: {}]   ;;  %s8826_s9 = inlined_call_operand.vmem [shape: f32[2,1,32], index: 9, kind: input, shape index: {}]   ;;  %s8827_s10 = inlined_call_operand.vmem [shape: f32[2,1,32], index: 10, kind: input, shape index: {}]   ;;  %s8828_s11 = inlined_call_operand.vmem [shape: f32[2,32,96], index: 11, kind: input, shape index: {}]   ;;  %s8829_s12 = inlined_call_operand.vmem [shape: f32[2,32,32], index: 12, kind: input, shape index: {}]   ;;  %s8830_s13 = inlined_call_operand.vmem [shape: f32[2,1,32], index: 13, kind: input, shape index: {}]   ;;  %s8831_s14 = inlined_call_operand.vmem [shape: f32[2,1,32], index: 14, kind: input, shape index: {}]   ;;  %s8832_s15 = inlined_call_operand.vmem [shape: f32[2,1,32], index: 15, kind: input, shape index: {}]   ;;  %s8833_s16 = inlined_call_operand.vmem [shape: f32[2,32,64], index: 16, kind: input, shape index: {}]   ;;  %s8834_s17 = inlined_call_operand.vmem [shape: f32[2,1,64], index: 17, kind: input, shape index: {}]   ;;  %s8835_s18 = inlined_call_operand.vmem [shape: f32[2,64,32], index: 18, kind: input, shape index: {}]   ;;  %s8836_s19 = inlined_call_operand.vmem [shape: f32[2,1,32], index: 19, kind: input, shape index: {}]   ;;  %s8837_s20 = inlined_call_operand.vmem [shape: f32[1,32], index: 20, kind: input, shape index: {}]   ;;  %s8838_s21 = inlined_call_operand.vmem [shape: f32[1,32], index: 21, kind: input, shape index: {}]   ;;  %s8839_s22 = inlined_call_operand.vmem [shape: f32[32,10], index: 22, kind: input, shape index: {}]   ;;  %s8840_s23 = inlined_call_operand.vmem [shape: f32[1,10], index: 23, kind: input, shape index: {}]   ;;  %s8841_s24 = inlined_call_operand.hbm [shape: f32[2,10], index: 24, kind: output, shape index: {}]  }
   0x1   :  { %8853 = sst [smem:[#allocation5_spill]] %s8817_s0 }
   0x2   :  { %8854 = sst [smem:[#allocation6_spill]] %s8818_s1 }
   0x3   :  { %8855 = sst [smem:[#allocation7_spill]] %s8819_s2 }
   0x4   :  { %8856 = sst [smem:[#allocation8_spill]] %s8820_s3 }
   0x5   :  { %8857 = sst [smem:[#allocation9_spill]] %s8821_s4 }
   0x6   :  { %8858 = sst [smem:[#allocation10_spill]] %s8822_s5 }
   0x7   :  { %8859 = sst [smem:[#allocation11_spill]] %s8823_s6 }
   0x8   :  { %8860 = sst [smem:[#allocation12_spill]] %s8824_s7 }
   0x9   :  { %8861 = sst [smem:[#allocation13_spill]] %s8825_s8 }
   0xa   :  { %s8862_s27 = sld [smem:[#allocation5_spill]]  ;;  %vm85_vm0 = vcmask 523264  }
  0x10   :  { %v78_v0 = vld [vmem:[%s8862_s27] sm:$0xff]  ;;  %v80_v1 = vld [vmem:[%s8862_s27 + $0x10] sm:$0xff]  ;;  %v79_v2 = vld [vmem:[%s8862_s27 + $0x8] sm:$0xff] }
  0x11   :  { %v86_v3 = vsel %vm85_vm0, %v78_v0, 0.0  ;;  %v92_v4 = vsel %vm85_vm0, %v80_v1, 0.0  ;;  %v81_v5 = vld [vmem:[%s8862_s27 + $0x18] sm:$0xff] }
  0x12   :  { %87 = vadd.xlane.f32.xlu0 %v86_v3  ;;  %93 = vadd.xlane.f32.xlu1 %v92_v4 }
  0x13   :  { %29 = vsyncpa [#allocation3], 0  ;;  %v89_v6 = vsel %vm85_vm0, %v79_v2, 0.0  ;;  %v95_v7 = vsel %vm85_vm0, %v81_v5, 0.0  ;;  %v82_v8 = vld [vmem:[%s8862_s27 + $0x20] sm:$0x3] }
  0x14   :  { %vm98_vm1 = vcmask 517120   ;;  %v6863_v35 = vmov 0.0   ;;  %s8863_s4 = sld [smem:[#allocation10_spill]]  ;;  %vm6864_vm2 = vmmov 0   ;;  %vm297_vm3 = vcmask 261120   ;;  %s6866_s3 = smov 88  }
  0x15   :  { %v99_v9 = vsel %vm98_vm1, %v82_v8, 0.0  ;;  %5839 = vmatprep.subr.mxu0 %v6863_v35  ;;  %5870 = vmatprep.subr.mxu1 %v6863_v35  ;;  %s8864_s5 = sld [smem:[#allocation8_spill]]  ;;  %vm310_vm4 = vcmask 254976   ;;  %s6867_s25 = smov 120   ;;  %vm705_vm7 = vcmask 64512   ;;  %vm912_vm8 = vcmask 1041408  }
  0x16   :  { %90 = vadd.xlane.f32.xlu0 %v89_v6  ;;  %96 = vadd.xlane.f32.xlu1 %v95_v7  ;;  %s8865_s28 = sld [smem:[#allocation9_spill]]  ;;  %s6871_s1 = smov 80  }
  0x17   :  { %5855 = vmatprep.mubr.msk.f32.mxu0 %vm6864_vm2, %v6863_v35  ;;  %5878 = vmatprep.mubr.msk.f32.mxu1 %vm6864_vm2, %v6863_v35  ;;  %s8866_s29 = sld [smem:[#allocation11_spill]]  ;;  %s8851_s26 = smov 48  }
  0x18   :  { %s8867_s30 = sld [smem:[#allocation12_spill]]  ;;  %s8847_s0 = smov 104  }
  0x19   :  { %s8868_s8 = sld [smem:[#allocation13_spill]]  ;;  %s6877_s6 = smov [#allocation2]  }
  0x1a   :  { %100 = vadd.xlane.f32.xlu0 %v99_v9  ;;  %v182_v36 = vld [vmem:[%s8863_s4 + $0x38] sm:$0xff]  ;;  %v181_v37 = vld [vmem:[%s8863_s4 + $0x30] sm:$0xff]  ;;  %v180_v38 = vld [vmem:[%s8863_s4 + $0x28] sm:$0xff]  ;;  %s5280_s2 = sshll.u32 %s6877_s6, 4  ;;  %s5281_s2 = int_to_ptr.vmem [resolvable:$true] %s5280_s2 }
  0x1b   :  { %5840 = vmatpush3.msra.mxu0 %v182_v36  ;;  %v179_v39 = vld [vmem:[%s8863_s4 + $0x20] sm:$0xff]  ;;  %v178_v40 = vld [vmem:[%s8863_s4 + $0x18] sm:$0xff]  ;;  %v177_v41 = vld [vmem:[%s8863_s4 + $0x10] sm:$0xff]  ;;  %p6846_p1 = scmp.lt.s32.totalorder %s5281_s2, %s5281_s2 }
  0x1c   :  { %5841 = vmatprep.subr.mxu0 %v6863_v35  ;;  %v176_v42 = vld [vmem:[%s8863_s4 + $0x8] sm:$0xff]  ;;  %v175_v43 = vld [vmem:[%s8863_s4] sm:$0xff]  ;;  %s6870_s4 = smov 56  }
  0x1d   :  { %5842 = vmatpush3.msra.mxu0 %v181_v37  ;;  %v5288_v60 = vld [vmem:[%s8864_s5] ss:$0 sm:$0xff]  ;;  %s8869_s5 = sld [smem:[#allocation6_spill]] }
  0x1e   :  { %5843 = vmatprep.subr.mxu0 %v6863_v35  ;;  %v5289_v62 = vld [vmem:[%s8865_s28] ss:$0 sm:$0xff]  ;;  %s8870_s28 = sld [smem:[#allocation7_spill]] }
  0x1f   :  { %5844 = vmatpush3.msra.mxu0 %v180_v38 }
  0x20   :  { %5845 = vmatprep.subr.mxu0 %v6863_v35 }
  0x21   :  { %5846 = vmatpush3.msra.mxu0 %v179_v39 }
  0x22   :  { %5847 = vmatprep.subr.mxu0 %v6863_v35 }
  0x23   :  { %5848 = vmatpush3.msra.mxu0 %v178_v40 }
  0x24   :  { %5849 = vmatprep.subr.mxu0 %v6863_v35 }
  0x25   :  { %5850 = vmatpush3.msra.mxu0 %v177_v41 }
  0x26   :  { %5851 = vmatprep.subr.mxu0 %v6863_v35 }
  0x27   :  { %5852 = vmatpush3.msra.mxu0 %v176_v42 }
  0x28   :  { %5853 = vmatprep.subr.mxu0 %v6863_v35 }
  0x29   :  { %5854 = vmatpush3.msra.mxu0 %v175_v43 }
  0x2a   :  { %5918 = vmatprep.subr.mxu0 %v6863_v35 }
  0x9b   :  { %v88_v10 = vpop.xlane.xlu0 %87  ;;  %v94_v11 = vpop.xlane.xlu1 %93 }
  0x9c   :  { %v103_v12 = vmul.f32 0.015625, %v88_v10  ;;  %v105_v13 = vmul.f32 0.015625, %v94_v11 }
  0x9e   :  { %v7023_v14 = vsub.f32 %v78_v0, %v103_v12  ;;  %v7025_v15 = vsub.f32 %v80_v1, %v105_v13 }
  0x9f   :  { %v91_v16 = vpop.xlane.xlu0 %90  ;;  %v97_v17 = vpop.xlane.xlu1 %96 }
  0xa0   :  { %v104_v18 = vmul.f32 0.015625, %v91_v16  ;;  %v106_v19 = vmul.f32 0.015625, %v97_v17  ;;  %v113_v20 = vmul.f32 %v7023_v14, %v7023_v14  ;;  %v115_v21 = vmul.f32 %v7025_v15, %v7025_v15  ;;  %v5290_v17 = vld [vmem:[%s8866_s29] ss:$0 sm:$0xff]  ;;  %s8849_s29 = smov 72  }
  0xa2   :  { %v7031_v22 = vsub.f32 %v79_v2, %v104_v18  ;;  %v7033_v23 = vsub.f32 %v81_v5, %v106_v19  ;;  %v118_v24 = vsel %vm85_vm0, %v113_v20, 0.0  ;;  %v124_v27 = vsel %vm85_vm0, %v115_v21, 0.0 }
  0xa3   :  { %119 = vadd.xlane.f32.xlu1 %v118_v24  ;;  %v101_v25 = vpop.xlane.xlu0 %100 }
  0xa4   :  { %v107_v26 = vmul.f32 0.015625, %v101_v25  ;;  %v114_v28 = vmul.f32 %v7031_v22, %v7031_v22  ;;  %v116_v29 = vmul.f32 %v7033_v23, %v7033_v23 }
  0xa6   :  { %v7041_v30 = vsub.f32 %v82_v8, %v107_v26  ;;  %v121_v31 = vsel %vm85_vm0, %v114_v28, 0.0  ;;  %v127_v32 = vsel %vm85_vm0, %v116_v29, 0.0 }
  0xa7   :  { %125 = vadd.xlane.f32.xlu1 %v124_v27  ;;  %122 = vadd.xlane.f32.xlu0 %v121_v31 }
  0xa8   :  { %v117_v33 = vmul.f32 %v7041_v30, %v7041_v30 }
  0xaa   :  { %v130_v34 = vsel %vm98_vm1, %v117_v33, 0.0 }
  0xab   :  { %128 = vadd.xlane.f32.xlu0 %v127_v32  ;;  %131 = vadd.xlane.f32.xlu1 %v130_v34 }
 0x12c   :  { %v120_v44 = vpop.xlane.xlu1 %119 }
 0x12d   :  { %v133_v45 = vmul.f32 0.015625, %v120_v44 }
 0x12f   :  { %v138_v46 = vadd.f32 1e-05, %v133_v45 }
 0x130   :  { %v126_v47 = vpop.xlane.xlu1 %125  ;;  %v123_v48 = vpop.xlane.xlu0 %122 }
 0x131   :  { %6599 = vrsqrt.f32 %v138_v46  ;;  %v135_v49 = vmul.f32 0.015625, %v126_v47  ;;  %v134_v50 = vmul.f32 0.015625, %v123_v48 }
 0x133   :  { %v140_v51 = vadd.f32 1e-05, %v135_v49  ;;  %v139_v52 = vadd.f32 1e-05, %v134_v50 }
 0x134   :  { %v132_v53 = vpop.xlane.xlu1 %131  ;;  %v129_v54 = vpop.xlane.xlu0 %128 }
 0x135   :  { %6601 = vrsqrt.f32 %v140_v51  ;;  %v137_v55 = vmul.f32 0.015625, %v132_v53  ;;  %v136_v56 = vmul.f32 0.015625, %v129_v54 }
 0x136   :  { %6603 = vrsqrt.f32 %v139_v52 }
 0x137   :  { %v141_v57 = vadd.f32 1e-05, %v136_v56  ;;  %v142_v58 = vadd.f32 1e-05, %v137_v55 }
 0x139   :  { %6605 = vrsqrt.f32 %v141_v57 }
 0x13a   :  { %6607 = vrsqrt.f32 %v142_v58 }
 0x13e   :  { %v6600_v59 = vpop.eup %6599 }
 0x13f   :  { %v148_v61 = vmul.f32 %v6600_v59, %v7023_v14 }
 0x141   :  { %v159_v63 = vmul.f32 %v5288_v60, %v148_v61 }
 0x142   :  { %v6602_v0 = vpop.eup %6601 }
 0x143   :  { %v6604_v1 = vpop.eup %6603  ;;  %v170_v2 = vadd.f32 %v5289_v62, %v159_v63  ;;  %v150_v4 = vmul.f32 %v6602_v0, %v7025_v15 }
 0x144   :  { %v149_v3 = vmul.f32 %v6604_v1, %v7031_v22 }
 0x145   :  { %5856 = vmatmul.mubr.msk.f32.vlgmr.msra.gmra.mxu0 %vm85_vm0, %v170_v2  ;;  %v161_v8 = vmul.f32 %v5288_v60, %v150_v4 }
 0x146   :  { %5858 = vmatprep.mubr.msk.f32.mxu0 %vm6864_vm2, %v6863_v35  ;;  %v160_v5 = vmul.f32 %v5288_v60, %v149_v3  ;;  %v6606_v6 = vpop.eup %6605 }
 0x147   :  { %v151_v9 = vmul.f32 %v6606_v6, %v7033_v23  ;;  %v6608_v10 = vpop.eup %6607  ;;  %v172_v11 = vadd.f32 %v5289_v62, %v161_v8 }
 0x148   :  { %v171_v7 = vadd.f32 %v5289_v62, %v160_v5  ;;  %v152_v13 = vmul.f32 %v6608_v10, %v7041_v30 }
 0x149   :  { %v162_v12 = vmul.f32 %v5288_v60, %v151_v9 }
 0x14a   :  { %5859 = vmatmul.mubr.msk.f32.gmra.mxu0 %vm85_vm0, %v171_v7  ;;  %v163_v15 = vmul.f32 %v5288_v60, %v152_v13 }
 0x14b   :  { %5861 = vmatprep.mubr.msk.f32.mxu0 %vm6864_vm2, %v6863_v35  ;;  %v173_v14 = vadd.f32 %v5289_v62, %v162_v12 }
 0x14c   :  { %v174_v16 = vadd.f32 %v5289_v62, %v163_v15 }
 0x14e   :  { %5862 = vmatmul.mubr.msk.f32.gmra.mxu0 %vm85_vm0, %v172_v11  ;;  %v387_v11 = vlaneseq }
 0x14f   :  { %5864 = vmatprep.mubr.msk.f32.mxu0 %vm6864_vm2, %v6863_v35 }
 0x152   :  { %5865 = vmatmul.mubr.msk.f32.gmra.mxu0 %vm85_vm0, %v173_v14 }
 0x153   :  { %5867 = vmatprep.mubr.msk.f32.mxu0 %vm6864_vm2, %v6863_v35 }
 0x156   :  { %5868 = vmatmul.mubr.msk.f32.gmra.mxu0 %vm85_vm0, %v174_v16  ;;  %v5296_v16 = vld [vmem:[%s8867_s30] ss:$0 sm:$0xff]  ;;  %s6865_s30 = smov 96  }
 0x157   :  { %5928 = vmatprep.mubr.msk.f32.mxu0 %vm6864_vm2, %v6863_v35 }
 0x205   :  { %v271_v18 = vpop.f32.mrf.mxu0 }
 0x206   :  { %v272_v19 = vadd.f32 %v5290_v17, %v271_v18 }
 0x207   :  { %v5857_v20 = vpop.f32.mrf.mxu0 }
 0x208   :  { %v298_v21 = vsel %vm297_vm3, %v272_v19, 0.0  ;;  %v5297_v20 = vld [vmem:[%s8868_s8] ss:$0 sm:$0xff]  ;;  %s6868_s8 = smov 64  }
 0x209   :  { %299 = vadd.xlane.f32.xlu0 %v298_v21 }
 0x20a   :  { %v276_v22 = vpop.f32.mrf.mxu0 }
 0x20b   :  { %v277_v23 = vadd.f32 %v5290_v17, %v276_v22  ;;  %v5298_v22 = vld [vmem:[%s8869_s5] ss:$0 sm:$0xff]  ;;  %s6872_s5 = smov 112  }
 0x20c   :  { %v5860_v24 = vpop.f32.mrf.mxu0 }
 0x20d   :  { %v301_v25 = vsel %vm297_vm3, %v277_v23, 0.0 }
 0x20e   :  { %302 = vadd.xlane.f32.xlu1 %v301_v25  ;;  %v281_v26 = vpop.f32.mrf.mxu0  ;;  %v420_v25 = vld [vmem:[%s8870_s28] sm:$0xff] }
 0x20f   :  { %v282_v27 = vadd.f32 %v5290_v17, %v281_v26 }
 0x210   :  { %v5863_v28 = vpop.f32.mrf.mxu0 }
 0x211   :  { %v304_v29 = vsel %vm297_vm3, %v282_v27, 0.0 }
 0x212   :  { %305 = vadd.xlane.f32.xlu0 %v304_v29  ;;  %v286_v30 = vpop.f32.mrf.mxu0 }
 0x213   :  { %v287_v31 = vadd.f32 %v5290_v17, %v286_v30 }
 0x214   :  { %v5866_v32 = vpop.f32.mrf.mxu0 }
 0x215   :  { %v307_v33 = vsel %vm297_vm3, %v287_v31, 0.0 }
 0x216   :  { %308 = vadd.xlane.f32.xlu1 %v307_v33  ;;  %v291_v34 = vpop.f32.mrf.mxu0 }
 0x217   :  { %v292_v36 = vadd.f32 %v5290_v17, %v291_v34  ;;  %v7133_v17 = vshrl.u32 %v387_v11, 7 }
 0x218   :  { %v5869_v37 = vpop.f32.mrf.mxu0 }
 0x219   :  { %v311_v38 = vsel %vm310_vm4, %v292_v36, 0.0  ;;  %vm393_vm5 = vcmp.eq.s32.totalorder %v7133_v17, 0  ;;  %v7151_v32 = vadd.s32 16, %v7133_v17 }
 0x21a   :  { %312 = vadd.xlane.f32.xlu0 %v311_v38 }
 0x21b   :  { %vm400_vm6 = vcmp.eq.s32.totalorder %v7151_v32, 17  ;;  %vm439_vm12 = vcmp.lt.s32.totalorder %v7151_v32, 17  ;;  %vm457_vm13 = vcmp.ge.s32.totalorder %v7151_v32, 17 }
 0x292   :  { %v300_v39 = vpop.xlane.xlu0 %299 }
 0x293   :  { %v315_v40 = vmul.f32 0.03125, %v300_v39 }
 0x295   :  { %v320_v41 = vsub.f32 %v272_v19, %v315_v40 }
 0x297   :  { %v303_v42 = vpop.xlane.xlu1 %302  ;;  %v325_v43 = vmul.f32 %v320_v41, %v320_v41 }
 0x298   :  { %v316_v44 = vmul.f32 0.03125, %v303_v42  ;;  %v422_v42 = vld [vmem:[%s8870_s28 + $0x10] sm:$0xff] }
 0x299   :  { %v330_v45 = vsel %vm297_vm3, %v325_v43, 0.0 }
 0x29a   :  { %v321_v46 = vsub.f32 %v277_v23, %v316_v44  ;;  %331 = vadd.xlane.f32.xlu1 %v330_v45 }
 0x29b   :  { %v306_v47 = vpop.xlane.xlu0 %305 }
 0x29c   :  { %v317_v48 = vmul.f32 0.03125, %v306_v47  ;;  %v326_v49 = vmul.f32 %v321_v46, %v321_v46 }
 0x29e   :  { %v322_v50 = vsub.f32 %v282_v27, %v317_v48  ;;  %v333_v51 = vsel %vm297_vm3, %v326_v49, 0.0  ;;  %v423_v48 = vld [vmem:[%s8870_s28 + $0x18] sm:$0xff] }
 0x29f   :  { %v309_v52 = vpop.xlane.xlu1 %308  ;;  %334 = vadd.xlane.f32.xlu0 %v333_v51 }
 0x2a0   :  { %v318_v53 = vmul.f32 0.03125, %v309_v52  ;;  %v327_v54 = vmul.f32 %v322_v50, %v322_v50 }
 0x2a2   :  { %v323_v55 = vsub.f32 %v287_v31, %v318_v53  ;;  %v336_v56 = vsel %vm297_vm3, %v327_v54, 0.0  ;;  %v421_v31 = vld [vmem:[%s8870_s28 + $0x8] sm:$0xff]  ;;  %v424_v54 = vld [vmem:[%s8870_s28 + $0x20] sm:$0x3]  ;;  %s8845_s28 = smov 40  }
 0x2a3   :  { %337 = vadd.xlane.f32.xlu1 %v336_v56  ;;  %v313_v57 = vpop.xlane.xlu0 %312 }
 0x2a4   :  { %v319_v58 = vmul.f32 0.03125, %v313_v57  ;;  %v328_v59 = vmul.f32 %v323_v55, %v323_v55 }
 0x2a6   :  { %v7123_v60 = vsub.f32 %v292_v36, %v319_v58  ;;  %v339_v61 = vsel %vm297_vm3, %v328_v59, 0.0 }
 0x2a7   :  { %340 = vadd.xlane.f32.xlu0 %v339_v61 }
 0x2a8   :  { %v329_v62 = vmul.f32 %v7123_v60, %v7123_v60 }
 0x2aa   :  { %v342_v63 = vsel %vm310_vm4, %v329_v62, 0.0 }
 0x2ab   :  { %343 = vadd.xlane.f32.xlu1 %v342_v63 }
 0x323   :  { %v332_v0 = vpop.xlane.xlu1 %331 }
 0x324   :  { %v345_v1 = vmul.f32 0.03125, %v332_v0 }
 0x326   :  { %v350_v2 = vadd.f32 1e-05, %v345_v1 }
 0x328   :  { %6609 = vrsqrt.f32 %v350_v2  ;;  %v335_v3 = vpop.xlane.xlu0 %334 }
 0x329   :  { %v346_v4 = vmul.f32 0.03125, %v335_v3 }
 0x32b   :  { %v351_v5 = vadd.f32 1e-05, %v346_v4 }
 0x32c   :  { %v338_v6 = vpop.xlane.xlu1 %337 }
 0x32d   :  { %6611 = vrsqrt.f32 %v351_v5  ;;  %v347_v7 = vmul.f32 0.03125, %v338_v6 }
 0x32f   :  { %v352_v8 = vadd.f32 1e-05, %v347_v7 }
 0x330   :  { %v341_v9 = vpop.xlane.xlu0 %340 }
 0x331   :  { %6613 = vrsqrt.f32 %v352_v8  ;;  %v348_v10 = vmul.f32 0.03125, %v341_v9 }
 0x333   :  { %v353_v12 = vadd.f32 1e-05, %v348_v10 }
 0x334   :  { %v344_v13 = vpop.xlane.xlu1 %343 }
 0x335   :  { %v6610_v14 = vpop.eup %6609  ;;  %6615 = vrsqrt.f32 %v353_v12  ;;  %v349_v15 = vmul.f32 0.03125, %v344_v13 }
 0x336   :  { %v360_v18 = vmul.f32 %v6610_v14, %v320_v41 }
 0x337   :  { %v354_v19 = vadd.f32 1e-05, %v349_v15 }
 0x338   :  { %v371_v21 = vmul.f32 %v5296_v16, %v360_v18 }
 0x339   :  { %6617 = vrsqrt.f32 %v354_v19 }
 0x33a   :  { %v6612_v23 = vpop.eup %6611  ;;  %v382_v24 = vadd.f32 %v5297_v20, %v371_v21 }
 0x33b   :  { %v361_v26 = vmul.f32 %v6612_v23, %v321_v46  ;;  %v579_v23 = vld [vmem:[%s8828_s11 + $0x10] sm:$0xff] }
 0x33c   :  { %v415_v27 = vsel %vm393_vm5, %v5298_v22, %v382_v24  ;;  %v578_v24 = vld [vmem:[%s8828_s11 + $0x8] sm:$0xff]  ;;  %vm826_vm5 = vcmask 277504  }
 0x33d   :  { %v7145_v28 = vadd.f32 %v420_v25, %v415_v27  ;;  %v372_v29 = vmul.f32 %v5296_v16, %v361_v26  ;;  %v577_v25 = vld [vmem:[%s8828_s11] sm:$0xff] }
 0x33e   :  { %v6614_v30 = vpop.eup %6613 }
 0x33f   :  { %v490_v33 = vsel %vm297_vm3, %v7145_v28, 0.0  ;;  %v383_v34 = vadd.f32 %v5297_v20, %v372_v29  ;;  %v362_v36 = vmul.f32 %v6614_v30, %v322_v50 }
 0x340   :  { %491 = vadd.xlane.f32.xlu0 %v490_v33 }
 0x341   :  { %v7155_v37 = vadd.f32 %v421_v31, %v383_v34  ;;  %v373_v38 = vmul.f32 %v5296_v16, %v362_v36 }
 0x342   :  { %v6616_v39 = vpop.eup %6615 }
 0x343   :  { %v493_v40 = vsel %vm297_vm3, %v7155_v37, 0.0  ;;  %v384_v41 = vadd.f32 %v5297_v20, %v373_v38  ;;  %v363_v43 = vmul.f32 %v6616_v39, %v323_v55 }
 0x344   :  { %494 = vadd.xlane.f32.xlu1 %v493_v40 }
 0x345   :  { %v417_v44 = vsel %vm400_vm6, %v5298_v22, %v384_v41  ;;  %v374_v45 = vmul.f32 %v5296_v16, %v363_v43  ;;  %v580_v22 = vld [vmem:[%s8828_s11 + $0x18] sm:$0xff] }
 0x346   :  { %v6618_v46 = vpop.eup %6617  ;;  %v7163_v47 = vadd.f32 %v422_v42, %v417_v44  ;;  %5871 = vmatpush3.msra.mxu1 %v580_v22 }
 0x347   :  { %v385_v49 = vadd.f32 %v5297_v20, %v374_v45  ;;  %v364_v50 = vmul.f32 %v6618_v46, %v7123_v60  ;;  %5872 = vmatprep.subr.mxu1 %v6863_v35  ;;  %v5299_v45 = vld [vmem:[%s8826_s9] ss:$0 sm:$0xff] }
 0x348   :  { %v496_v51 = vsel %vm297_vm3, %v7163_v47, 0.0  ;;  %5873 = vmatpush3.msra.mxu1 %v579_v23 }
 0x349   :  { %497 = vadd.xlane.f32.xlu0 %v496_v51  ;;  %v7171_v52 = vadd.f32 %v423_v48, %v385_v49  ;;  %v375_v53 = vmul.f32 %v5296_v16, %v364_v50  ;;  %5874 = vmatprep.subr.mxu1 %v6863_v35  ;;  %v5300_v49 = vld [vmem:[%s8827_s10] ss:$0 sm:$0xff] }
 0x34a   :  { %5875 = vmatpush3.msra.mxu1 %v578_v24 }
 0x34b   :  { %v499_v55 = vsel %vm297_vm3, %v7171_v52, 0.0  ;;  %v386_v56 = vadd.f32 %v5297_v20, %v375_v53  ;;  %5876 = vmatprep.subr.mxu1 %v6863_v35 }
 0x34c   :  { %500 = vadd.xlane.f32.xlu1 %v499_v55  ;;  %5877 = vmatpush3.msra.mxu1 %v577_v25 }
 0x34d   :  { %v7178_v57 = vadd.f32 %v424_v54, %v386_v56  ;;  %5893 = vmatprep.subr.mxu1 %v6863_v35 }
 0x34f   :  { %v502_v58 = vsel %vm310_vm4, %v7178_v57, 0.0 }
 0x350   :  { %503 = vadd.xlane.f32.xlu0 %v502_v58 }
 0x3c9   :  { %v492_v59 = vpop.xlane.xlu0 %491 }
 0x3ca   :  { %v505_v60 = vmul.f32 0.03125, %v492_v59 }
 0x3cc   :  { %v510_v61 = vsub.f32 %v7145_v28, %v505_v60 }
 0x3cd   :  { %v495_v62 = vpop.xlane.xlu1 %494 }
 0x3ce   :  { %v506_v63 = vmul.f32 0.03125, %v495_v62  ;;  %v515_v0 = vmul.f32 %v510_v61, %v510_v61 }
 0x3d0   :  { %v7184_v1 = vsub.f32 %v7155_v37, %v506_v63  ;;  %v520_v2 = vsel %vm297_vm3, %v515_v0, 0.0 }
 0x3d1   :  { %521 = vadd.xlane.f32.xlu1 %v520_v2 }
 0x3d2   :  { %v498_v3 = vpop.xlane.xlu0 %497  ;;  %v516_v4 = vmul.f32 %v7184_v1, %v7184_v1 }
 0x3d3   :  { %v507_v5 = vmul.f32 0.03125, %v498_v3 }
 0x3d4   :  { %v523_v6 = vsel %vm297_vm3, %v516_v4, 0.0 }
 0x3d5   :  { %v512_v7 = vsub.f32 %v7163_v47, %v507_v5  ;;  %524 = vadd.xlane.f32.xlu0 %v523_v6  ;;  %v501_v8 = vpop.xlane.xlu1 %500 }
 0x3d6   :  { %v508_v9 = vmul.f32 0.03125, %v501_v8 }
 0x3d7   :  { %v517_v10 = vmul.f32 %v512_v7, %v512_v7 }
 0x3d8   :  { %v513_v12 = vsub.f32 %v7171_v52, %v508_v9 }
 0x3d9   :  { %v504_v13 = vpop.xlane.xlu0 %503  ;;  %v526_v14 = vsel %vm297_vm3, %v517_v10, 0.0 }
 0x3da   :  { %v509_v15 = vmul.f32 0.03125, %v504_v13  ;;  %527 = vadd.xlane.f32.xlu1 %v526_v14  ;;  %v518_v16 = vmul.f32 %v513_v12, %v513_v12 }
 0x3dc   :  { %v7194_v18 = vsub.f32 %v7178_v57, %v509_v15  ;;  %v529_v19 = vsel %vm297_vm3, %v518_v16, 0.0 }
 0x3dd   :  { %530 = vadd.xlane.f32.xlu0 %v529_v19 }
 0x3de   :  { %v519_v20 = vmul.f32 %v7194_v18, %v7194_v18 }
 0x3e0   :  { %v532_v21 = vsel %vm310_vm4, %v519_v20, 0.0 }
 0x3e1   :  { %533 = vadd.xlane.f32.xlu1 %v532_v21 }
 0x45a   :  { %v522_v26 = vpop.xlane.xlu1 %521 }
 0x45b   :  { %v535_v27 = vmul.f32 0.03125, %v522_v26 }
 0x45d   :  { %v540_v29 = vadd.f32 1e-05, %v535_v27 }
 0x45e   :  { %v525_v30 = vpop.xlane.xlu0 %524 }
 0x45f   :  { %6619 = vrsqrt.f32 %v540_v29  ;;  %v536_v31 = vmul.f32 0.03125, %v525_v30 }
 0x461   :  { %v541_v33 = vadd.f32 1e-05, %v536_v31 }
 0x463   :  { %6621 = vrsqrt.f32 %v541_v33  ;;  %v528_v34 = vpop.xlane.xlu1 %527 }
 0x464   :  { %v537_v36 = vmul.f32 0.03125, %v528_v34 }
 0x466   :  { %v542_v38 = vadd.f32 1e-05, %v537_v36  ;;  %v531_v39 = vpop.xlane.xlu0 %530 }
 0x467   :  { %v538_v40 = vmul.f32 0.03125, %v531_v39 }
 0x468   :  { %6623 = vrsqrt.f32 %v542_v38 }
 0x469   :  { %v543_v41 = vadd.f32 1e-05, %v538_v40 }
 0x46a   :  { %v534_v42 = vpop.xlane.xlu1 %533 }
 0x46b   :  { %6625 = vrsqrt.f32 %v543_v41  ;;  %v539_v43 = vmul.f32 0.03125, %v534_v42  ;;  %v7348_v41 = vand.u32 127, %v387_v11 }
 0x46c   :  { %v6620_v44 = vpop.eup %6619 }
 0x46d   :  { %v544_v46 = vadd.f32 1e-05, %v539_v43  ;;  %v550_v48 = vmul.f32 %v6620_v44, %v510_v61  ;;  %vm470_vm9 = vcmp.ge.s32.totalorder %v7348_v41, 17  ;;  %vm471_vm10 = vcmp.lt.s32.totalorder %v7348_v41, 34 }
 0x46e   :  { %vm448_vm11 = vcmp.lt.s32.totalorder %v7348_v41, 17  ;;  %vm7355_vm14 = vmand %vm470_vm9, %vm471_vm10  ;;  %v6869_v43 = vmov -1e+30  }
 0x46f   :  { %6627 = vrsqrt.f32 %v544_v46  ;;  %v561_v50 = vmul.f32 %v5299_v45, %v550_v48  ;;  %v7359_v44 = vsel %vm448_vm11, 0.0, %v6869_v43  ;;  %vm7361_vm15 = vmand %vm439_vm12, %vm448_vm11  ;;  %vm839_vm11 = vcmask 271360  }
 0x470   :  { %v6622_v51 = vpop.eup %6621  ;;  %vm475_vm1 = vmand %vm457_vm13, %vm7355_vm14 }
 0x471   :  { %v572_v53 = vadd.f32 %v5300_v49, %v561_v50  ;;  %v551_v54 = vmul.f32 %v6622_v51, %v7184_v1  ;;  %vm480_vm6 = vmor %vm7361_vm15, %vm475_vm1 }
 0x473   :  { %5879 = vmatmul.mubr.msk.f32.vlgmr.msra.gmra.mxu1 %vm297_vm3, %v572_v53  ;;  %v562_v55 = vmul.f32 %v5299_v45, %v551_v54  ;;  %v392_v54 = vadd.s32 32, %v7133_v17 }
 0x474   :  { %5881 = vmatprep.mubr.msk.f32.mxu1 %vm6864_vm2, %v6863_v35 }
 0x475   :  { %v6624_v56 = vpop.eup %6623  ;;  %v573_v58 = vadd.f32 %v5300_v49, %v562_v55  ;;  %vm464_vm9 = vcmp.lt.s32.totalorder %v392_v54, 34 }
 0x476   :  { %v552_v59 = vmul.f32 %v6624_v56, %v512_v7  ;;  %vm477_vm10 = vmand %vm464_vm9, %vm7355_vm14 }
 0x477   :  { %5882 = vmatmul.mubr.msk.f32.gmra.mxu1 %vm297_vm3, %v573_v58  ;;  %v7378_v58 = vsel %vm480_vm6, 0.0, %v6869_v43 }
 0x478   :  { %v6626_v60 = vpop.eup %6625  ;;  %5884 = vmatprep.mubr.msk.f32.mxu1 %vm6864_vm2, %v6863_v35  ;;  %v563_v61 = vmul.f32 %v5299_v45, %v552_v59 }
 0x479   :  { %v553_v62 = vmul.f32 %v6626_v60, %v513_v12 }
 0x47a   :  { %v574_v63 = vadd.f32 %v5300_v49, %v563_v61 }
 0x47b   :  { %v564_v0 = vmul.f32 %v5299_v45, %v553_v62 }
 0x47c   :  { %v6628_v1 = vpop.eup %6627  ;;  %5885 = vmatmul.mubr.msk.f32.gmra.mxu1 %vm297_vm3, %v574_v63 }
 0x47d   :  { %5887 = vmatprep.mubr.msk.f32.mxu1 %vm6864_vm2, %v6863_v35  ;;  %v575_v2 = vadd.f32 %v5300_v49, %v564_v0  ;;  %v554_v3 = vmul.f32 %v6628_v1, %v7194_v18  ;;  %v7387_v0 = vsel %vm7355_vm14, 0.0, %v6869_v43 }
 0x47f   :  { %v565_v4 = vmul.f32 %v5299_v45, %v554_v3 }
 0x480   :  { %5888 = vmatmul.mubr.msk.f32.gmra.mxu1 %vm297_vm3, %v575_v2 }
 0x481   :  { %5890 = vmatprep.mubr.msk.f32.mxu1 %vm6864_vm2, %v6863_v35  ;;  %v576_v5 = vadd.f32 %v5300_v49, %v565_v4 }
 0x484   :  { %5891 = vmatmul.mubr.msk.f32.gmra.mxu1 %vm297_vm3, %v576_v5 }
 0x485   :  { %5903 = vmatprep.mubr.msk.f32.mxu1 %vm6864_vm2, %v6863_v35 }
 0x533   :  { %v7239_v6 = vpop.f32.mrf.mxu1 }
 0x535   :  { %v5880_v7 = vpop.f32.mrf.mxu1 }
 0x536   :  { %v7394_v7 = vsel %vm477_vm10, 0.0, %v6869_v43 }
 0x537   :  { %v7241_v8 = vpop.f32.mrf.mxu1 }
 0x539   :  { %v5883_v9 = vpop.f32.mrf.mxu1 }
 0x53c   :  { %v7243_v10 = vpop.f32.mrf.mxu1 }
 0x53e   :  { %v5886_v12 = vpop.f32.mrf.mxu1 }
 0x540   :  { %v7245_v13 = vpop.f32.mrf.mxu1 }
 0x541   :  { %701 = vrot.lane.b32.xlu1 %v7245_v13, %s6865_s30 }
 0x542   :  { %v5889_v14 = vpop.f32.mrf.mxu1 }
 0x544   :  { %v7249_v15 = vpop.f32.mrf.mxu1 }
 0x545   :  { %699 = vrot.lane.b32.xlu1 %v7243_v10, %s6865_s30  ;;  %703 = vrot.lane.b32.xlu0 %v7249_v15, %s6865_s30 }
 0x546   :  { %v5892_v16 = vpop.f32.mrf.mxu1 }
 0x549   :  { %697 = vrot.lane.b32.xlu1 %v7241_v8, %s6865_s30  ;;  %695 = vrot.lane.b32.xlu0 %v7239_v6, %s6865_s30 }
 0x54d   :  { %1023 = vrot.lane.b32.xlu1 %v7249_v15, %s6866_s3  ;;  %1021 = vrot.lane.b32.xlu0 %v7245_v13, %s6866_s3 }
 0x551   :  { %1019 = vrot.lane.b32.xlu1 %v7243_v10, %s6866_s3  ;;  %1017 = vrot.lane.b32.xlu0 %v7241_v8, %s6866_s3 }
 0x555   :  { %1015 = vrot.lane.b32.xlu1 %v7239_v6, %s6866_s3  ;;  %1005 = vrot.lane.b32.xlu0 %v7239_v6, %s6867_s25 }
 0x559   :  { %1007 = vrot.lane.b32.xlu1 %v7241_v8, %s6867_s25  ;;  %1009 = vrot.lane.b32.xlu0 %v7243_v10, %s6867_s25 }
 0x55d   :  { %1011 = vrot.lane.b32.xlu1 %v7245_v13, %s6867_s25  ;;  %1013 = vrot.lane.b32.xlu0 %v7249_v15, %s6867_s25 }
 0x561   :  { %889 = vrot.lane.b32.xlu1 %v7245_v13, %s6868_s8  ;;  %891 = vrot.lane.b32.xlu0 %v7249_v15, %s6868_s8 }
 0x565   :  { %887 = vrot.lane.b32.xlu1 %v7243_v10, %s6868_s8 }
 0x569   :  { %885 = vrot.lane.b32.xlu1 %v7241_v8, %s6868_s8 }
 0x5b3   :  { %v702_v18 = vpop.permute.xlu1 %701 }
 0x5b7   :  { %v700_v19 = vpop.permute.xlu1 %699  ;;  %v704_v20 = vpop.permute.xlu0 %703 }
 0x5b8   :  { %5894 = vmatpush3.xpose.msk.msra.mxu1 %vm705_vm7, %v704_v20 }
 0x5b9   :  { %5895 = vmatprep.subr.mxu1 %v6863_v35 }
 0x5bb   :  { %v698_v21 = vpop.permute.xlu1 %697  ;;  %v696_v22 = vpop.permute.xlu0 %695 }
 0x5bc   :  { %5896 = vmatpush3.xpose.msk.msra.mxu1 %vm705_vm7, %v702_v18 }
 0x5bd   :  { %5897 = vmatprep.subr.mxu1 %v6863_v35 }
 0x5bf   :  { %v1024_v23 = vpop.permute.xlu1 %1023  ;;  %v1022_v24 = vpop.permute.xlu0 %1021 }
 0x5c0   :  { %5898 = vmatpush3.xpose.msk.msra.mxu1 %vm705_vm7, %v700_v19 }
 0x5c1   :  { %5899 = vmatprep.subr.mxu1 %v6863_v35 }
 0x5c3   :  { %v1020_v25 = vpop.permute.xlu1 %1019  ;;  %v1018_v26 = vpop.permute.xlu0 %1017 }
 0x5c4   :  { %5900 = vmatpush3.xpose.msk.msra.mxu1 %vm705_vm7, %v698_v21 }
 0x5c5   :  { %5901 = vmatprep.subr.mxu1 %v6863_v35 }
 0x5c7   :  { %v1016_v27 = vpop.permute.xlu1 %1015  ;;  %v1006_v29 = vpop.permute.xlu0 %1005 }
 0x5c8   :  { %5902 = vmatpush3.xpose.msk.msra.mxu1 %vm705_vm7, %v696_v22 }
 0x5c9   :  { %5943 = vmatprep.subr.mxu1 %v6863_v35 }
 0x5cb   :  { %v1008_v30 = vpop.permute.xlu1 %1007  ;;  %5904 = vmatmul.mubr.msk.f32.vlgmr.msra.gmra.mxu1 %vm705_vm7, %v7239_v6  ;;  %v1010_v31 = vpop.permute.xlu0 %1009 }
 0x5cc   :  { %5944 = vmatpush3.xpose.msk.msra.mxu1 %vm705_vm7, %v1024_v23  ;;  %5906 = vmatprep.mubr.msk.f32.mxu1 %vm6864_vm2, %v6863_v35 }
 0x5cd   :  { %5945 = vmatprep.subr.mxu1 %v6863_v35 }
 0x5cf   :  { %v1012_v33 = vpop.permute.xlu1 %1011  ;;  %5907 = vmatmul.mubr.msk.f32.gmra.mxu1 %vm705_vm7, %v7241_v8  ;;  %v1014_v34 = vpop.permute.xlu0 %1013 }
 0x5d0   :  { %5946 = vmatpush3.xpose.msk.msra.mxu1 %vm705_vm7, %v1022_v24  ;;  %5909 = vmatprep.mubr.msk.f32.mxu1 %vm6864_vm2, %v6863_v35 }
 0x5d1   :  { %5947 = vmatprep.subr.mxu1 %v6863_v35 }
 0x5d3   :  { %v890_v36 = vpop.permute.xlu1 %889  ;;  %5910 = vmatmul.mubr.msk.f32.gmra.mxu1 %vm705_vm7, %v7243_v10  ;;  %v892_v38 = vpop.permute.xlu0 %891 }
 0x5d4   :  { %5919 = vmatpush3.msk.msra.mxu0 %vm912_vm8, %v892_v38  ;;  %5948 = vmatpush3.xpose.msk.msra.mxu1 %vm705_vm7, %v1020_v25 }
 0x5d5   :  { %5920 = vmatprep.subr.mxu0 %v6863_v35  ;;  %5912 = vmatprep.mubr.msk.f32.mxu1 %vm6864_vm2, %v6863_v35 }
 0x5d6   :  { %5921 = vmatpush3.msra.mxu0 %v890_v36  ;;  %5949 = vmatprep.subr.mxu1 %v6863_v35 }
 0x5d7   :  { %v888_v39 = vpop.permute.xlu1 %887  ;;  %5913 = vmatmul.mubr.msk.f32.gmra.mxu1 %vm705_vm7, %v7245_v13  ;;  %5922 = vmatprep.subr.mxu0 %v6863_v35 }
 0x5d8   :  { %5923 = vmatpush3.msra.mxu0 %v888_v39  ;;  %5950 = vmatpush3.xpose.msk.msra.mxu1 %vm705_vm7, %v1018_v26 }
 0x5d9   :  { %5915 = vmatprep.mubr.msk.f32.mxu1 %vm6864_vm2, %v6863_v35  ;;  %5924 = vmatprep.subr.mxu0 %v6863_v35 }
 0x5da   :  { %5951 = vmatprep.subr.mxu1 %v6863_v35 }
 0x5db   :  { %v886_v40 = vpop.permute.xlu1 %885  ;;  %5916 = vmatmul.mubr.msk.f32.gmra.mxu1 %vm705_vm7, %v7249_v15 }
 0x5dc   :  { %5925 = vmatpush3.msra.mxu0 %v886_v40  ;;  %5952 = vmatpush3.xpose.msk.msra.mxu1 %vm705_vm7, %v1016_v27 }
 0x5dd   :  { %5953 = vmatprep.mubr.msk.f32.mxu1 %vm6864_vm2, %v6863_v35  ;;  %5926 = vmatprep.subr.mxu0 %v6863_v35 }
 0x5de   :  { %5993 = vmatprep.subr.mxu1 %v6863_v35 }
 0x5df   :  { %5954 = vmatmul.mubr.msk.f32.vlgmr.msra.gmra.mxu1 %vm705_vm7, %v1006_v29 }
 0x5e0   :  { %5956 = vmatprep.mubr.msk.f32.mxu1 %vm6864_vm2, %v6863_v35 }
 0x5e3   :  { %5957 = vmatmul.mubr.msk.f32.gmra.mxu1 %vm705_vm7, %v1008_v30 }
 0x5e4   :  { %5959 = vmatprep.mubr.msk.f32.mxu1 %vm6864_vm2, %v6863_v35 }
 0x5e7   :  { %5960 = vmatmul.mubr.msk.f32.gmra.mxu1 %vm705_vm7, %v1010_v31 }
 0x5e8   :  { %5962 = vmatprep.mubr.msk.f32.mxu1 %vm6864_vm2, %v6863_v35 }
 0x5eb   :  { %5963 = vmatmul.mubr.msk.f32.gmra.mxu1 %vm705_vm7, %v1012_v33 }
 0x5ec   :  { %5965 = vmatprep.mubr.msk.f32.mxu1 %vm6864_vm2, %v6863_v35 }
 0x5ef   :  { %5966 = vmatmul.mubr.msk.f32.gmra.mxu1 %vm705_vm7, %v1014_v34 }
 0x5f0   :  { %5995 = vmatprep.mubr.msk.f32.mxu1 %vm6864_vm2, %v6863_v35 }
 0x68b   :  { %v792_v45 = vpop.f32.mrf.mxu1 }
 0x68c   :  { %v816_v46 = vmul.f32 0.35355338, %v792_v45 }
 0x68d   :  { %v5905_v48 = vpop.f32.mrf.mxu1 }
 0x68e   :  { %v7368_v32 = vadd.f32 %v816_v46, %v7359_v44 }
 0x68f   :  { %v797_v49 = vpop.f32.mrf.mxu1 }
 0x690   :  { %v817_v50 = vmul.f32 0.35355338, %v797_v49  ;;  %v827_v51 = vsel %vm826_vm5, %v7368_v32, -inf }
 0x691   :  { %828 = vmax.xlane.f32.xlu1 %v827_v51  ;;  %v5908_v53 = vpop.f32.mrf.mxu1 }
 0x692   :  { %v7376_v55 = vadd.f32 %v817_v50, %v7359_v44 }
 0x693   :  { %v802_v56 = vpop.f32.mrf.mxu1 }
 0x694   :  { %v818_v59 = vmul.f32 0.35355338, %v802_v56  ;;  %v830_v60 = vsel %vm826_vm5, %v7376_v55, -inf }
 0x695   :  { %831 = vmax.xlane.f32.xlu0 %v830_v60  ;;  %v5911_v61 = vpop.f32.mrf.mxu1 }
 0x696   :  { %v7383_v62 = vadd.f32 %v818_v59, %v7378_v58 }
 0x697   :  { %v807_v63 = vpop.f32.mrf.mxu1 }
 0x698   :  { %v819_v1 = vmul.f32 0.35355338, %v807_v63  ;;  %v833_v2 = vsel %vm826_vm5, %v7383_v62, -inf }
 0x699   :  { %834 = vmax.xlane.f32.xlu0 %v833_v2  ;;  %v5914_v3 = vpop.f32.mrf.mxu1 }
 0x69a   :  { %v824_v4 = vadd.f32 %v819_v1, %v7387_v0 }
 0x69b   :  { %v812_v5 = vpop.f32.mrf.mxu1 }
 0x69c   :  { %v820_v9 = vmul.f32 0.35355338, %v812_v5  ;;  %v836_v12 = vsel %vm826_vm5, %v824_v4, -inf }
 0x69d   :  { %837 = vmax.xlane.f32.xlu0 %v836_v12  ;;  %v5917_v14 = vpop.f32.mrf.mxu1 }
 0x69e   :  { %v825_v16 = vadd.f32 %v820_v9, %v7394_v7 }
 0x69f   :  { %v1111_v18 = vpop.f32.mrf.mxu1 }
 0x6a0   :  { %v1135_v19 = vmul.f32 0.35355338, %v1111_v18  ;;  %v840_v20 = vsel %vm839_vm11, %v825_v16, -inf }
 0x6a1   :  { %841 = vmax.xlane.f32.xlu1 %v840_v20  ;;  %v5955_v21 = vpop.f32.mrf.mxu1 }
 0x6a2   :  { %v1140_v22 = vadd.f32 %v1135_v19, %v7359_v44 }
 0x6a3   :  { %v1116_v23 = vpop.f32.mrf.mxu1 }
 0x6a4   :  { %v1136_v24 = vmul.f32 0.35355338, %v1116_v23  ;;  %v1145_v25 = vsel %vm826_vm5, %v1140_v22, -inf }
 0x6a5   :  { %1146 = vmax.xlane.f32.xlu0 %v1145_v25  ;;  %v5958_v26 = vpop.f32.mrf.mxu1 }
 0x6a6   :  { %v1141_v27 = vadd.f32 %v1136_v24, %v7359_v44 }
 0x6a7   :  { %v1121_v29 = vpop.f32.mrf.mxu1 }
 0x6a8   :  { %v1137_v30 = vmul.f32 0.35355338, %v1121_v29  ;;  %v1148_v31 = vsel %vm826_vm5, %v1141_v27, -inf }
 0x6a9   :  { %1149 = vmax.xlane.f32.xlu1 %v1148_v31  ;;  %v5961_v33 = vpop.f32.mrf.mxu1 }
 0x6aa   :  { %v7404_v34 = vadd.f32 %v1137_v30, %v7378_v58 }
 0x6ab   :  { %v1126_v36 = vpop.f32.mrf.mxu1 }
 0x6ac   :  { %v1151_v38 = vsel %vm826_vm5, %v7404_v34, -inf  ;;  %v1138_v43 = vmul.f32 0.35355338, %v1126_v36 }
 0x6ad   :  { %1152 = vmax.xlane.f32.xlu0 %v1151_v38  ;;  %v5964_v39 = vpop.f32.mrf.mxu1 }
 0x6ae   :  { %v7413_v11 = vadd.f32 %v1138_v43, %v7387_v0 }
 0x6af   :  { %v1131_v40 = vpop.f32.mrf.mxu1 }
 0x6b0   :  { %v1139_v45 = vmul.f32 0.35355338, %v1131_v40  ;;  %v1154_v46 = vsel %vm826_vm5, %v7413_v11, -inf }
 0x6b1   :  { %v5967_v42 = vpop.f32.mrf.mxu1 }
 0x6b2   :  { %v7418_v48 = vadd.f32 %v1139_v45, %v7394_v7 }
 0x6b4   :  { %v1157_v49 = vsel %vm839_vm11, %v7418_v48, -inf }
 0x6ba   :  { %883 = vrot.lane.b32.xlu1 %v7239_v6, %s6868_s8 }
 0x6c3   :  { %1208 = vrot.lane.b32.xlu0 %v7249_v15, %s6870_s4 }
 0x6de   :  { %1155 = vmax.xlane.f32.xlu1 %v1154_v46 }
 0x6e2   :  { %1158 = vmax.xlane.f32.xlu0 %v1157_v49 }
 0x6ef   :  { %1206 = vrot.lane.b32.xlu1 %v7245_v13, %s6870_s4 }
 0x6f8   :  { %1204 = vrot.lane.b32.xlu0 %v7243_v10, %s6870_s4 }
 0x71a   :  { %v829_v50 = vpop.xlane.xlu1 %828 }
 0x71b   :  { %v843_v51 = vsub.f32 %v7368_v32, %v829_v50 }
 0x71d   :  { %v848_v53 = vmul.f32 1.442695, %v843_v51 }
 0x71e   :  { %v832_v54 = vpop.xlane.xlu0 %831 }
 0x71f   :  { %6629 = vpow2.f32 %v848_v53  ;;  %v844_v56 = vsub.f32 %v7376_v55, %v832_v54 }
 0x721   :  { %v850_v59 = vmul.f32 1.442695, %v844_v56 }
 0x722   :  { %v835_v60 = vpop.xlane.xlu0 %834 }
 0x723   :  { %6631 = vpow2.f32 %v850_v59  ;;  %v845_v61 = vsub.f32 %v7383_v62, %v835_v60 }
 0x725   :  { %v852_v63 = vmul.f32 1.442695, %v845_v61 }
 0x726   :  { %v838_v1 = vpop.xlane.xlu0 %837 }
 0x727   :  { %6633 = vpow2.f32 %v852_v63  ;;  %v846_v2 = vsub.f32 %v824_v4, %v838_v1 }
 0x729   :  { %v854_v3 = vmul.f32 1.442695, %v846_v2 }
 0x72a   :  { %v842_v5 = vpop.xlane.xlu1 %841 }
 0x72b   :  { %6635 = vpow2.f32 %v854_v3  ;;  %v847_v9 = vsub.f32 %v825_v16, %v842_v5 }
 0x72c   :  { %v7429_v12 = vpop.eup %6629 }
 0x72d   :  { %v856_v32 = vmul.f32 1.442695, %v847_v9  ;;  %v858_v14 = vsel %vm826_vm5, %v7429_v12, 0.0 }
 0x72e   :  { %v1147_v55 = vpop.xlane.xlu0 %1146  ;;  %859 = vadd.xlane.f32.xlu1 %v858_v14 }
 0x72f   :  { %6637 = vpow2.f32 %v856_v32  ;;  %v1160_v18 = vsub.f32 %v1140_v22, %v1147_v55 }
 0x730   :  { %v7433_v19 = vpop.eup %6631 }
 0x731   :  { %v1165_v62 = vmul.f32 1.442695, %v1160_v18  ;;  %v861_v4 = vsel %vm826_vm5, %v7433_v19, 0.0 }
 0x732   :  { %v1150_v20 = vpop.xlane.xlu1 %1149  ;;  %862 = vadd.xlane.f32.xlu0 %v861_v4 }
 0x733   :  { %6639 = vpow2.f32 %v1165_v62  ;;  %v1161_v16 = vsub.f32 %v1141_v27, %v1150_v20 }
 0x734   :  { %v7437_v21 = vpop.eup %6633 }
 0x735   :  { %v1167_v23 = vmul.f32 1.442695, %v1161_v16  ;;  %v864_v24 = vsel %vm826_vm5, %v7437_v21, 0.0 }
 0x736   :  { %v884_v25 = vpop.permute.xlu1 %883  ;;  %v1153_v26 = vpop.xlane.xlu0 %1152  ;;  %865 = vadd.xlane.f32.xlu1 %v864_v24 }
 0x737   :  { %6641 = vpow2.f32 %v1167_v23  ;;  %v1162_v22 = vsub.f32 %v7404_v34, %v1153_v26  ;;  %5927 = vmatpush3.msra.mxu0 %v884_v25 }
 0x738   :  { %v7442_v29 = vpop.eup %6635  ;;  %5968 = vmatprep.subr.mxu0 %v6863_v35 }
 0x739   :  { %v1169_v30 = vmul.f32 1.442695, %v1162_v22  ;;  %v867_v27 = vsel %vm826_vm5, %v7442_v29, 0.0 }
 0x73a   :  { %868 = vadd.xlane.f32.xlu0 %v867_v27  ;;  %v1209_v43 = vpop.permute.xlu0 %1208 }
 0x73b   :  { %6643 = vpow2.f32 %v1169_v30  ;;  %v686_v30 = vld [vmem:[%s8829_s12] sm:$0xff] }
 0x73c   :  { %v7447_v31 = vpop.eup %6637 }
 0x73d   :  { %v870_v33 = vsel %vm839_vm11, %v7447_v31, 0.0 }
 0x73e   :  { %871 = vadd.xlane.f32.xlu1 %v870_v33 }
 0x740   :  { %v7451_v36 = vpop.eup %6639 }
 0x741   :  { %v1175_v34 = vsel %vm826_vm5, %v7451_v36, 0.0 }
 0x742   :  { %1176 = vadd.xlane.f32.xlu1 %v1175_v34 }
 0x744   :  { %v7455_v38 = vpop.eup %6641 }
 0x745   :  { %v1178_v39 = vsel %vm826_vm5, %v7455_v38, 0.0 }
 0x746   :  { %1179 = vadd.xlane.f32.xlu0 %v1178_v39 }
 0x748   :  { %v7459_v40 = vpop.eup %6643 }
 0x749   :  { %v1181_v42 = vsel %vm826_vm5, %v7459_v40, 0.0 }
 0x74a   :  { %1182 = vadd.xlane.f32.xlu1 %v1181_v42 }
 0x75b   :  { %1202 = vrot.lane.b32.xlu1 %v7241_v8, %s6870_s4 }
 0x75f   :  { %1549 = vrot.lane.b32.xlu1 %v7249_v15, %s6871_s1 }
 0x763   :  { %1545 = vrot.lane.b32.xlu1 %v7243_v10, %s6871_s1 }
 0x767   :  { %1541 = vrot.lane.b32.xlu1 %v7239_v6, %s6871_s1  ;;  %v1156_v45 = vpop.xlane.xlu1 %1155 }
 0x768   :  { %v1163_v46 = vsub.f32 %v7413_v11, %v1156_v45 }
 0x76a   :  { %v1171_v49 = vmul.f32 1.442695, %v1163_v46 }
 0x76b   :  { %1533 = vrot.lane.b32.xlu1 %v7241_v8, %s6872_s5  ;;  %v1159_v50 = vpop.xlane.xlu0 %1158  ;;  %v1207_v59 = vpop.permute.xlu1 %1206 }
 0x76c   :  { %6645 = vpow2.f32 %v1171_v49  ;;  %v1164_v51 = vsub.f32 %v7418_v48, %v1159_v50 }
 0x76e   :  { %v1173_v53 = vmul.f32 1.442695, %v1164_v51 }
 0x76f   :  { %1537 = vrot.lane.b32.xlu1 %v7245_v13, %s6872_s5  ;;  %v1205_v60 = vpop.permute.xlu0 %1204 }
 0x770   :  { %6647 = vpow2.f32 %v1173_v53 }
 0x773   :  { %1734 = vrot.lane.b32.xlu1 %v7249_v15, %s8851_s26 }
 0x777   :  { %1730 = vrot.lane.b32.xlu1 %v7243_v10, %s8851_s26 }
 0x779   :  { %v7481_v11 = vpop.eup %6645 }
 0x77a   :  { %v1184_v54 = vsel %vm826_vm5, %v7481_v11, 0.0 }
 0x77b   :  { %1728 = vrot.lane.b32.xlu1 %v7241_v8, %s8851_s26  ;;  %1185 = vadd.xlane.f32.xlu0 %v1184_v54 }
 0x77d   :  { %v7487_v48 = vpop.eup %6647 }
 0x77e   :  { %v1187_v56 = vsel %vm839_vm11, %v7487_v48, 0.0 }
 0x77f   :  { %1726 = vrot.lane.b32.xlu1 %v7239_v6, %s8851_s26  ;;  %1188 = vadd.xlane.f32.xlu0 %v1187_v56 }
 0x795   :  { %1200 = vrot.lane.b32.xlu0 %v7239_v6, %s6870_s4 }
 0x799   :  { %1547 = vrot.lane.b32.xlu0 %v7245_v13, %s6871_s1 }
 0x79d   :  { %1543 = vrot.lane.b32.xlu0 %v7241_v8, %s6871_s1 }
 0x7a1   :  { %1531 = vrot.lane.b32.xlu0 %v7239_v6, %s6872_s5 }
 0x7a5   :  { %1535 = vrot.lane.b32.xlu0 %v7243_v10, %s6872_s5 }
 0x7a9   :  { %1539 = vrot.lane.b32.xlu0 %v7249_v15, %s6872_s5 }
 0x7ad   :  { %1732 = vrot.lane.b32.xlu0 %v7245_v13, %s8851_s26 }
 0x7b7   :  { %v860_v61 = vpop.xlane.xlu1 %859 }
 0x7b8   :  { %6649 = vrcp.f32 %v860_v61 }
 0x7bb   :  { %v863_v63 = vpop.xlane.xlu0 %862 }
 0x7bc   :  { %6651 = vrcp.f32 %v863_v63 }
 0x7bf   :  { %v866_v1 = vpop.xlane.xlu1 %865 }
 0x7c0   :  { %6653 = vrcp.f32 %v866_v1 }
 0x7c3   :  { %v869_v2 = vpop.xlane.xlu0 %868 }
 0x7c4   :  { %6655 = vrcp.f32 %v869_v2 }
 0x7c5   :  { %v6650_v3 = vpop.eup %6649 }
 0x7c6   :  { %v878_v5 = vmul.f32 %v6650_v3, %v7429_v12 }
 0x7c7   :  { %v872_v9 = vpop.xlane.xlu1 %871 }
 0x7c8   :  { %6657 = vrcp.f32 %v872_v9  ;;  %5929 = vmatmul.mubr.msk.f32.vlgmr.msra.gmra.mxu0 %vm826_vm5, %v878_v5 }
 0x7c9   :  { %v6652_v32 = vpop.eup %6651  ;;  %5969 = vmatpush3.msk.msra.mxu0 %vm912_vm8, %v1209_v43  ;;  %5931 = vmatprep.mubr.msk.f32.mxu0 %vm6864_vm2, %v6863_v35 }
 0x7ca   :  { %5970 = vmatprep.subr.mxu0 %v6863_v35  ;;  %v879_v14 = vmul.f32 %v6652_v32, %v7433_v19 }
 0x7cb   :  { %5971 = vmatpush3.msra.mxu0 %v1207_v59  ;;  %v1177_v18 = vpop.xlane.xlu1 %1176 }
 0x7cc   :  { %5972 = vmatprep.subr.mxu0 %v6863_v35  ;;  %5932 = vmatmul.mubr.msk.f32.gmra.mxu0 %vm826_vm5, %v879_v14  ;;  %6659 = vrcp.f32 %v1177_v18 }
 0x7cd   :  { %v6654_v12 = vpop.eup %6653  ;;  %5973 = vmatpush3.msra.mxu0 %v1205_v60  ;;  %5934 = vmatprep.mubr.msk.f32.mxu0 %vm6864_vm2, %v6863_v35 }
 0x7ce   :  { %v880_v55 = vmul.f32 %v6654_v12, %v7437_v21  ;;  %5974 = vmatprep.subr.mxu0 %v6863_v35 }
 0x7cf   :  { %v1180_v23 = vpop.xlane.xlu0 %1179 }
 0x7d0   :  { %5935 = vmatmul.mubr.msk.f32.gmra.mxu0 %vm826_vm5, %v880_v55  ;;  %6661 = vrcp.f32 %v1180_v23 }
 0x7d1   :  { %v6656_v62 = vpop.eup %6655  ;;  %5937 = vmatprep.mubr.msk.f32.mxu0 %vm6864_vm2, %v6863_v35 }
 0x7d2   :  { %v881_v19 = vmul.f32 %v6656_v62, %v7442_v29 }
 0x7d3   :  { %v1183_v4 = vpop.xlane.xlu1 %1182 }
 0x7d4   :  { %5938 = vmatmul.mubr.msk.f32.gmra.mxu0 %vm826_vm5, %v881_v19  ;;  %6663 = vrcp.f32 %v1183_v4 }
 0x7d5   :  { %v6658_v20 = vpop.eup %6657  ;;  %5940 = vmatprep.mubr.msk.f32.mxu0 %vm6864_vm2, %v6863_v35 }
 0x7d6   :  { %v882_v16 = vmul.f32 %v6658_v20, %v7447_v31 }
 0x7d7   :  { %v1203_v21 = vpop.permute.xlu1 %1202 }
 0x7d8   :  { %5941 = vmatmul.mubr.msk.f32.gmra.mxu0 %vm826_vm5, %v882_v16 }
 0x7d9   :  { %5975 = vmatpush3.msra.mxu0 %v1203_v21  ;;  %5978 = vmatprep.mubr.msk.f32.mxu0 %vm6864_vm2, %v6863_v35  ;;  %v6660_v26 = vpop.eup %6659 }
 0x7da   :  { %5976 = vmatprep.subr.mxu0 %v6863_v35  ;;  %v1195_v22 = vmul.f32 %v6660_v26, %v7451_v36 }
 0x7db   :  { %v1550_v43 = vpop.permute.xlu1 %1549 }
 0x7dd   :  { %v6662_v27 = vpop.eup %6661 }
 0x7de   :  { %v1196_v31 = vmul.f32 %v6662_v27, %v7455_v38  ;;  %v687_v38 = vld [vmem:[%s8829_s12 + $0x8] sm:$0xff] }
 0x7df   :  { %5994 = vmatpush3.msra.mxu1 %v687_v38  ;;  %v1546_v45 = vpop.permute.xlu1 %1545 }
 0x7e0   :  { %6027 = vmatprep.subr.mxu1 %v6863_v35 }
 0x7e1   :  { %v6664_v33 = vpop.eup %6663 }
 0x7e2   :  { %v1197_v36 = vmul.f32 %v6664_v33, %v7459_v40 }
 0x7e3   :  { %v7561_v46 = vpop.permute.xlu1 %1541 }
 0x7e7   :  { %v7563_v50 = vpop.permute.xlu1 %1533 }
 0x7eb   :  { %v7565_v53 = vpop.permute.xlu1 %1537 }
 0x7ef   :  { %v1735_v54 = vpop.permute.xlu1 %1734 }
 0x7f3   :  { %v1731_v56 = vpop.permute.xlu1 %1730 }
 0x7f7   :  { %v1729_v63 = vpop.permute.xlu1 %1728 }
 0x7fb   :  { %v1727_v9 = vpop.permute.xlu1 %1726 }
 0x804   :  { %v1186_v24 = vpop.xlane.xlu0 %1185 }
 0x805   :  { %6665 = vrcp.f32 %v1186_v24 }
 0x808   :  { %v1189_v25 = vpop.xlane.xlu0 %1188 }
 0x809   :  { %6667 = vrcp.f32 %v1189_v25 }
 0x80c   :  { %v1201_v29 = vpop.permute.xlu0 %1200 }
 0x80d   :  { %5977 = vmatpush3.msra.mxu0 %v1201_v29 }
 0x80e   :  { %5979 = vmatmul.mubr.msk.f32.vlgmr.msra.gmra.mxu0 %vm826_vm5, %v1195_v22  ;;  %6010 = vmatprep.subr.mxu0 %v6863_v35 }
 0x80f   :  { %5981 = vmatprep.mubr.msk.f32.mxu0 %vm6864_vm2, %v6863_v35  ;;  %6011 = vmatpush3.msra.mxu0 %v686_v30 }
 0x810   :  { %6052 = vmatprep.subr.mxu0 %v6863_v35  ;;  %v1548_v49 = vpop.permute.xlu0 %1547 }
 0x812   :  { %5982 = vmatmul.mubr.msk.f32.gmra.mxu0 %vm826_vm5, %v1196_v31  ;;  %v6666_v34 = vpop.eup %6665 }
 0x813   :  { %5984 = vmatprep.mubr.msk.f32.mxu0 %vm6864_vm2, %v6863_v35  ;;  %v1198_v39 = vmul.f32 %v6666_v34, %v7481_v11 }
 0x814   :  { %v1544_v51 = vpop.permute.xlu0 %1543 }
 0x816   :  { %5985 = vmatmul.mubr.msk.f32.gmra.mxu0 %vm826_vm5, %v1197_v36  ;;  %v6668_v42 = vpop.eup %6667 }
 0x817   :  { %5987 = vmatprep.mubr.msk.f32.mxu0 %vm6864_vm2, %v6863_v35  ;;  %v1199_v40 = vmul.f32 %v6668_v42, %v7487_v48 }
 0x818   :  { %v7567_v11 = vpop.permute.xlu0 %1531 }
 0x81a   :  { %5988 = vmatmul.mubr.msk.f32.gmra.mxu0 %vm826_vm5, %v1198_v39 }
 0x81b   :  { %5990 = vmatprep.mubr.msk.f32.mxu0 %vm6864_vm2, %v6863_v35 }
 0x81c   :  { %v7569_v48 = vpop.permute.xlu0 %1535 }
 0x81e   :  { %5991 = vmatmul.mubr.msk.f32.gmra.mxu0 %vm826_vm5, %v1199_v40 }
 0x81f   :  { %6012 = vmatprep.mubr.msk.f32.mxu0 %vm6864_vm2, %v6863_v35 }
 0x820   :  { %v7571_v59 = vpop.permute.xlu0 %1539 }
 0x824   :  { %v1733_v1 = vpop.permute.xlu0 %1732 }
 0x888   :  { %v981_v60 = vpop.f32.mrf.mxu0 }
 0x889   :  { %6013 = vmatmul.mubr.msk.f32.vlgmr.msra.gmra.mxu0 %vm705_vm7, %v981_v60 }
 0x88a   :  { %6053 = vmatpush3.msk.msra.mxu0 %vm912_vm8, %v1735_v54  ;;  %v5930_v61 = vpop.f32.mrf.mxu0  ;;  %6015 = vmatprep.mubr.msk.f32.mxu0 %vm6864_vm2, %v6863_v35 }
 0x88b   :  { %6054 = vmatprep.subr.mxu0 %v6863_v35 }
 0x88c   :  { %6055 = vmatpush3.msra.mxu0 %v1733_v1  ;;  %v986_v2 = vpop.f32.mrf.mxu0 }
 0x88d   :  { %6056 = vmatprep.subr.mxu0 %v6863_v35  ;;  %6016 = vmatmul.mubr.msk.f32.gmra.mxu0 %vm705_vm7, %v986_v2 }
 0x88e   :  { %6057 = vmatpush3.msra.mxu0 %v1731_v56  ;;  %v5933_v3 = vpop.f32.mrf.mxu0  ;;  %6018 = vmatprep.mubr.msk.f32.mxu0 %vm6864_vm2, %v6863_v35 }
 0x88f   :  { %6058 = vmatprep.subr.mxu0 %v6863_v35 }
 0x890   :  { %6059 = vmatpush3.msra.mxu0 %v1729_v63  ;;  %v991_v5 = vpop.f32.mrf.mxu0 }
 0x891   :  { %6060 = vmatprep.subr.mxu0 %v6863_v35  ;;  %6019 = vmatmul.mubr.msk.f32.gmra.mxu0 %vm705_vm7, %v991_v5 }
 0x892   :  { %6061 = vmatpush3.msra.mxu0 %v1727_v9  ;;  %v5936_v32 = vpop.f32.mrf.mxu0  ;;  %6021 = vmatprep.mubr.msk.f32.mxu0 %vm6864_vm2, %v6863_v35 }
 0x893   :  { %6094 = vmatprep.subr.mxu0 %v6863_v35 }
 0x894   :  { %v996_v14 = vpop.f32.mrf.mxu0 }
 0x895   :  { %6022 = vmatmul.mubr.msk.f32.gmra.mxu0 %vm705_vm7, %v996_v14 }
 0x896   :  { %v5939_v12 = vpop.f32.mrf.mxu0  ;;  %6024 = vmatprep.mubr.msk.f32.mxu0 %vm6864_vm2, %v6863_v35 }
 0x898   :  { %v1001_v55 = vpop.f32.mrf.mxu0 }
 0x899   :  { %6025 = vmatmul.mubr.msk.f32.gmra.mxu0 %vm705_vm7, %v1001_v55 }
 0x89a   :  { %v5942_v18 = vpop.f32.mrf.mxu0  ;;  %6062 = vmatprep.mubr.msk.f32.mxu0 %vm6864_vm2, %v6863_v35 }
 0x8ce   :  { %v1297_v62 = vpop.f32.mrf.mxu0 }
 0x8cf   :  { %5996 = vmatmul.mubr.msk.f32.vlgmr.msra.gmra.mxu1 %vm705_vm7, %v1297_v62 }
 0x8d0   :  { %6028 = vmatpush3.xpose.msk.msra.mxu1 %vm705_vm7, %v1550_v43  ;;  %v5980_v19 = vpop.f32.mrf.mxu0  ;;  %5998 = vmatprep.mubr.msk.f32.mxu1 %vm6864_vm2, %v6863_v35 }
 0x8d1   :  { %6029 = vmatprep.subr.mxu1 %v6863_v35 }
 0x8d2   :  { %v1302_v4 = vpop.f32.mrf.mxu0 }
 0x8d3   :  { %5999 = vmatmul.mubr.msk.f32.gmra.mxu1 %vm705_vm7, %v1302_v4 }
 0x8d4   :  { %6030 = vmatpush3.xpose.msk.msra.mxu1 %vm705_vm7, %v1548_v49  ;;  %v5983_v20 = vpop.f32.mrf.mxu0  ;;  %6001 = vmatprep.mubr.msk.f32.mxu1 %vm6864_vm2, %v6863_v35 }
 0x8d5   :  { %6031 = vmatprep.subr.mxu1 %v6863_v35 }
 0x8d6   :  { %v1307_v16 = vpop.f32.mrf.mxu0 }
 0x8d7   :  { %6002 = vmatmul.mubr.msk.f32.gmra.mxu1 %vm705_vm7, %v1307_v16 }
 0x8d8   :  { %6032 = vmatpush3.xpose.msk.msra.mxu1 %vm705_vm7, %v1546_v45  ;;  %v5986_v21 = vpop.f32.mrf.mxu0  ;;  %6004 = vmatprep.mubr.msk.f32.mxu1 %vm6864_vm2, %v6863_v35 }
 0x8d9   :  { %6033 = vmatprep.subr.mxu1 %v6863_v35 }
 0x8da   :  { %v1312_v23 = vpop.f32.mrf.mxu0 }
 0x8db   :  { %6005 = vmatmul.mubr.msk.f32.gmra.mxu1 %vm705_vm7, %v1312_v23 }
 0x8dc   :  { %6034 = vmatpush3.xpose.msk.msra.mxu1 %vm705_vm7, %v1544_v51  ;;  %v5989_v24 = vpop.f32.mrf.mxu0  ;;  %6007 = vmatprep.mubr.msk.f32.mxu1 %vm6864_vm2, %v6863_v35 }
 0x8dd   :  { %6035 = vmatprep.subr.mxu1 %v6863_v35 }
 0x8de   :  { %v1317_v25 = vpop.f32.mrf.mxu0 }
 0x8df   :  { %6008 = vmatmul.mubr.msk.f32.gmra.mxu1 %vm705_vm7, %v1317_v25 }
 0x8e0   :  { %6036 = vmatpush3.xpose.msk.msra.mxu1 %vm705_vm7, %v7561_v46  ;;  %v5992_v26 = vpop.f32.mrf.mxu0  ;;  %6037 = vmatprep.mubr.msk.f32.mxu1 %vm6864_vm2, %v6863_v35 }
 0x8e1   :  { %6077 = vmatprep.subr.mxu1 %v6863_v35 }
 0x8e3   :  { %6038 = vmatmul.mubr.msk.f32.vlgmr.msra.gmra.mxu1 %vm705_vm7, %v7567_v11 }
 0x8e4   :  { %6040 = vmatprep.mubr.msk.f32.mxu1 %vm6864_vm2, %v6863_v35 }
 0x8e7   :  { %6041 = vmatmul.mubr.msk.f32.gmra.mxu1 %vm705_vm7, %v7563_v50 }
 0x8e8   :  { %6043 = vmatprep.mubr.msk.f32.mxu1 %vm6864_vm2, %v6863_v35 }
 0x8eb   :  { %6044 = vmatmul.mubr.msk.f32.gmra.mxu1 %vm705_vm7, %v7569_v48 }
 0x8ec   :  { %6046 = vmatprep.mubr.msk.f32.mxu1 %vm6864_vm2, %v6863_v35 }
 0x8ef   :  { %6047 = vmatmul.mubr.msk.f32.gmra.mxu1 %vm705_vm7, %v7565_v53 }
 0x8f0   :  { %6049 = vmatprep.mubr.msk.f32.mxu1 %vm6864_vm2, %v6863_v35 }
 0x8f3   :  { %6050 = vmatmul.mubr.msk.f32.gmra.mxu1 %vm705_vm7, %v7571_v59 }
 0x8f4   :  { %6079 = vmatprep.mubr.msk.f32.mxu1 %vm6864_vm2, %v6863_v35 }
 0x949   :  { %v7640_v22 = vpop.f32.mrf.mxu0 }
 0x94b   :  { %v6014_v29 = vpop.f32.mrf.mxu0 }
 0x94d   :  { %v7642_v30 = vpop.f32.mrf.mxu0 }
 0x94f   :  { %v6017_v27 = vpop.f32.mrf.mxu0 }
 0x951   :  { %v7644_v31 = vpop.f32.mrf.mxu0 }
 0x953   :  { %v6020_v33 = vpop.f32.mrf.mxu0 }
 0x955   :  { %v7646_v36 = vpop.f32.mrf.mxu0 }
 0x957   :  { %v6023_v34 = vpop.f32.mrf.mxu0 }
 0x959   :  { %v7648_v39 = vpop.f32.mrf.mxu0 }
 0x95b   :  { %v6026_v42 = vpop.f32.mrf.mxu0 }
 0x98f   :  { %v7650_v38 = vpop.f32.mrf.mxu1 }
 0x991   :  { %v5997_v40 = vpop.f32.mrf.mxu1 }
 0x993   :  { %v7652_v43 = vpop.f32.mrf.mxu1 }
 0x995   :  { %v6000_v45 = vpop.f32.mrf.mxu1 }
 0x997   :  { %v7654_v46 = vpop.f32.mrf.mxu1 }
 0x999   :  { %v6003_v49 = vpop.f32.mrf.mxu1 }
 0x99b   :  { %v7656_v50 = vpop.f32.mrf.mxu1 }
 0x99d   :  { %v6006_v51 = vpop.f32.mrf.mxu1 }
 0x99f   :  { %v7658_v53 = vpop.f32.mrf.mxu1 }
 0x9a1   :  { %v6009_v11 = vpop.f32.mrf.mxu1 }
 0x9a3   :  { %v1637_v54 = vpop.f32.mrf.mxu1 }
 0x9a4   :  { %v1661_v48 = vmul.f32 0.35355338, %v1637_v54 }
 0x9a5   :  { %v6039_v56 = vpop.f32.mrf.mxu1 }
 0x9a6   :  { %v1666_v59 = vadd.f32 %v1661_v48, %v7359_v44 }
 0x9a7   :  { %v1642_v60 = vpop.f32.mrf.mxu1 }
 0x9a8   :  { %v1662_v61 = vmul.f32 0.35355338, %v1642_v60  ;;  %v1671_v63 = vsel %vm826_vm5, %v1666_v59, -inf }
 0x9a9   :  { %1672 = vmax.xlane.f32.xlu1 %v1671_v63  ;;  %v6042_v1 = vpop.f32.mrf.mxu1 }
 0x9aa   :  { %v1667_v2 = vadd.f32 %v1662_v61, %v7359_v44 }
 0x9ab   :  { %v1647_v3 = vpop.f32.mrf.mxu1 }
 0x9ac   :  { %v1663_v5 = vmul.f32 0.35355338, %v1647_v3  ;;  %v1674_v9 = vsel %vm826_vm5, %v1667_v2, -inf }
 0x9ad   :  { %1675 = vmax.xlane.f32.xlu0 %v1674_v9  ;;  %v6045_v32 = vpop.f32.mrf.mxu1 }
 0x9ae   :  { %v1668_v14 = vadd.f32 %v1663_v5, %v7378_v58 }
 0x9af   :  { %v1652_v12 = vpop.f32.mrf.mxu1 }
 0x9b0   :  { %v1664_v55 = vmul.f32 0.35355338, %v1652_v12  ;;  %v1677_v18 = vsel %vm826_vm5, %v1668_v14, -inf }
 0x9b1   :  { %1678 = vmax.xlane.f32.xlu0 %v1677_v18  ;;  %v6048_v62 = vpop.f32.mrf.mxu1 }
 0x9b2   :  { %v1669_v19 = vadd.f32 %v1664_v55, %v7387_v0 }
 0x9b3   :  { %v1657_v4 = vpop.f32.mrf.mxu1 }
 0x9b4   :  { %v1665_v20 = vmul.f32 0.35355338, %v1657_v4  ;;  %v1680_v16 = vsel %vm826_vm5, %v1669_v19, -inf }
 0x9b5   :  { %1681 = vmax.xlane.f32.xlu0 %v1680_v16  ;;  %v6051_v21 = vpop.f32.mrf.mxu1 }
 0x9b6   :  { %v1670_v23 = vadd.f32 %v1665_v20, %v7394_v7 }
 0x9b8   :  { %v1683_v24 = vsel %vm839_vm11, %v1670_v23, -inf }
 0x9b9   :  { %1684 = vmax.xlane.f32.xlu1 %v1683_v24 }
 0x9ca   :  { %1973 = vrot.lane.b32.xlu1 %v7245_v13, %s8849_s29 }
 0x9cb   :  { %1975 = vrot.lane.b32.xlu0 %v7249_v15, %s8849_s29 }
 0xa32   :  { %v1673_v25 = vpop.xlane.xlu1 %1672 }
 0xa33   :  { %v1686_v26 = vsub.f32 %v1666_v59, %v1673_v25 }
 0xa35   :  { %v1691_v29 = vmul.f32 1.442695, %v1686_v26 }
 0xa36   :  { %v1676_v27 = vpop.xlane.xlu0 %1675 }
 0xa37   :  { %6669 = vpow2.f32 %v1691_v29  ;;  %v1687_v33 = vsub.f32 %v1667_v2, %v1676_v27 }
 0xa39   :  { %v1693_v34 = vmul.f32 1.442695, %v1687_v33 }
 0xa3a   :  { %v1679_v42 = vpop.xlane.xlu0 %1678 }
 0xa3b   :  { %6671 = vpow2.f32 %v1693_v34  ;;  %v1688_v40 = vsub.f32 %v1668_v14, %v1679_v42 }
 0xa3d   :  { %v1695_v45 = vmul.f32 1.442695, %v1688_v40 }
 0xa3e   :  { %v1682_v59 = vpop.xlane.xlu0 %1681 }
 0xa3f   :  { %6673 = vpow2.f32 %v1695_v45  ;;  %v1689_v60 = vsub.f32 %v1669_v19, %v1682_v59 }
 0xa41   :  { %v1697_v63 = vmul.f32 1.442695, %v1689_v60 }
 0xa42   :  { %v1685_v61 = vpop.xlane.xlu1 %1684  ;;  %v1976_v14 = vpop.permute.xlu0 %1975 }
 0xa43   :  { %v1690_v1 = vsub.f32 %v1670_v23, %v1685_v61  ;;  %6675 = vpow2.f32 %v1697_v63 }
 0xa44   :  { %v6670_v49 = vpop.eup %6669 }
 0xa45   :  { %v1701_v51 = vsel %vm826_vm5, %v6670_v49, 0.0  ;;  %v1699_v2 = vmul.f32 1.442695, %v1690_v1 }
 0xa46   :  { %1702 = vadd.xlane.f32.xlu0 %v1701_v51  ;;  %v1974_v12 = vpop.permute.xlu1 %1973 }
 0xa47   :  { %6677 = vpow2.f32 %v1699_v2 }
 0xa48   :  { %v6672_v11 = vpop.eup %6671 }
 0xa49   :  { %v1704_v54 = vsel %vm826_vm5, %v6672_v11, 0.0 }
 0xa4a   :  { %1705 = vadd.xlane.f32.xlu1 %v1704_v54 }
 0xa4c   :  { %v6674_v48 = vpop.eup %6673 }
 0xa4d   :  { %v1707_v56 = vsel %vm826_vm5, %v6674_v48, 0.0 }
 0xa4e   :  { %1708 = vadd.xlane.f32.xlu0 %v1707_v56 }
 0xa50   :  { %v6676_v3 = vpop.eup %6675 }
 0xa51   :  { %v1710_v5 = vsel %vm826_vm5, %v6676_v3, 0.0 }
 0xa54   :  { %v6678_v9 = vpop.eup %6677 }
 0xa55   :  { %v1713_v32 = vsel %vm839_vm11, %v6678_v9, 0.0 }
 0xa5b   :  { %1969 = vrot.lane.b32.xlu1 %v7241_v8, %s8849_s29 }
 0xa64   :  { %1971 = vrot.lane.b32.xlu0 %v7243_v10, %s8849_s29 }
 0xa7f   :  { %1711 = vadd.xlane.f32.xlu1 %v1710_v5 }
 0xa83   :  { %1714 = vadd.xlane.f32.xlu0 %v1713_v32 }
 0xa90   :  { %1957 = vrot.lane.b32.xlu1 %v7239_v6, %s8847_s0 }
 0xa94   :  { %1961 = vrot.lane.b32.xlu1 %v7243_v10, %s8847_s0 }
 0xa98   :  { %1965 = vrot.lane.b32.xlu1 %v7249_v15, %s8847_s0 }
 0xa99   :  { %1967 = vrot.lane.b32.xlu0 %v7239_v6, %s8849_s29 }
 0xa9d   :  { %1959 = vrot.lane.b32.xlu0 %v7241_v8, %s8847_s0 }
 0xaa1   :  { %1963 = vrot.lane.b32.xlu0 %v7245_v13, %s8847_s0 }
 0xacf   :  { %v1703_v55 = vpop.xlane.xlu0 %1702 }
 0xad0   :  { %6679 = vrcp.f32 %v1703_v55 }
 0xad3   :  { %v1706_v18 = vpop.xlane.xlu1 %1705 }
 0xad4   :  { %6681 = vrcp.f32 %v1706_v18 }
 0xad7   :  { %v1709_v62 = vpop.xlane.xlu0 %1708  ;;  %v1970_v25 = vpop.permute.xlu1 %1969 }
 0xad8   :  { %6683 = vrcp.f32 %v1709_v62 }
 0xadb   :  { %v1972_v24 = vpop.permute.xlu0 %1971 }
 0xadd   :  { %v6680_v19 = vpop.eup %6679 }
 0xade   :  { %v1721_v4 = vmul.f32 %v6680_v19, %v6670_v49  ;;  %v688_v49 = vld [vmem:[%s8829_s12 + $0x10] sm:$0xff] }
 0xadf   :  { %6078 = vmatpush3.msra.mxu1 %v688_v49 }
 0xae0   :  { %6063 = vmatmul.mubr.msk.f32.vlgmr.msra.gmra.mxu0 %vm826_vm5, %v1721_v4  ;;  %6119 = vmatprep.subr.mxu1 %v6863_v35 }
 0xae1   :  { %v6682_v20 = vpop.eup %6681  ;;  %6095 = vmatpush3.xpose.msk.msra.mxu0 %vm705_vm7, %v1976_v14  ;;  %6065 = vmatprep.mubr.msk.f32.mxu0 %vm6864_vm2, %v6863_v35 }
 0xae2   :  { %6096 = vmatprep.subr.mxu0 %v6863_v35  ;;  %v1722_v16 = vmul.f32 %v6682_v20, %v6672_v11 }
 0xae4   :  { %6066 = vmatmul.mubr.msk.f32.gmra.mxu0 %vm826_vm5, %v1722_v16 }
 0xae5   :  { %v6684_v21 = vpop.eup %6683  ;;  %6097 = vmatpush3.xpose.msk.msra.mxu0 %vm705_vm7, %v1974_v12  ;;  %6068 = vmatprep.mubr.msk.f32.mxu0 %vm6864_vm2, %v6863_v35 }
 0xae6   :  { %6098 = vmatprep.subr.mxu0 %v6863_v35  ;;  %v1723_v23 = vmul.f32 %v6684_v21, %v6674_v48 }
 0xae8   :  { %6069 = vmatmul.mubr.msk.f32.gmra.mxu0 %vm826_vm5, %v1723_v23 }
 0xae9   :  { %6099 = vmatpush3.xpose.msk.msra.mxu0 %vm705_vm7, %v1972_v24  ;;  %6071 = vmatprep.mubr.msk.f32.mxu0 %vm6864_vm2, %v6863_v35 }
 0xaea   :  { %6100 = vmatprep.subr.mxu0 %v6863_v35 }
 0xaed   :  { %6101 = vmatpush3.xpose.msk.msra.mxu0 %vm705_vm7, %v1970_v25 }
 0xaee   :  { %6102 = vmatprep.subr.mxu0 %v6863_v35 }
 0xb08   :  { %v1712_v26 = vpop.xlane.xlu1 %1711 }
 0xb09   :  { %6685 = vrcp.f32 %v1712_v26 }
 0xb0c   :  { %v1715_v29 = vpop.xlane.xlu0 %1714  ;;  %v1958_v45 = vpop.permute.xlu1 %1957 }
 0xb0d   :  { %6687 = vrcp.f32 %v1715_v29 }
 0xb10   :  { %v1968_v27 = vpop.permute.xlu0 %1967  ;;  %v1962_v11 = vpop.permute.xlu1 %1961 }
 0xb11   :  { %6103 = vmatpush3.xpose.msk.msra.mxu0 %vm705_vm7, %v1968_v27 }
 0xb12   :  { %6144 = vmatprep.subr.mxu0 %v6863_v35 }
 0xb14   :  { %v1960_v51 = vpop.permute.xlu0 %1959  ;;  %v1966_v48 = vpop.permute.xlu1 %1965 }
 0xb16   :  { %v6686_v33 = vpop.eup %6685 }
 0xb17   :  { %v1724_v34 = vmul.f32 %v6686_v33, %v6676_v3 }
 0xb18   :  { %v1964_v54 = vpop.permute.xlu0 %1963 }
 0xb19   :  { %6072 = vmatmul.mubr.msk.f32.gmra.mxu0 %vm826_vm5, %v1724_v34 }
 0xb1a   :  { %v6688_v42 = vpop.eup %6687  ;;  %6074 = vmatprep.mubr.msk.f32.mxu0 %vm6864_vm2, %v6863_v35 }
 0xb1b   :  { %v1725_v40 = vmul.f32 %v6688_v42, %v6678_v9 }
 0xb1d   :  { %6075 = vmatmul.mubr.msk.f32.gmra.mxu0 %vm826_vm5, %v1725_v40 }
 0xb1e   :  { %6104 = vmatprep.mubr.msk.f32.mxu0 %vm6864_vm2, %v6863_v35 }
 0xb21   :  { %6105 = vmatmul.mubr.msk.f32.vlgmr.msra.gmra.mxu0 %vm705_vm7, %v1958_v45 }
 0xb22   :  { %6107 = vmatprep.mubr.msk.f32.mxu0 %vm6864_vm2, %v6863_v35 }
 0xb25   :  { %6108 = vmatmul.mubr.msk.f32.gmra.mxu0 %vm705_vm7, %v1960_v51 }
 0xb26   :  { %6110 = vmatprep.mubr.msk.f32.mxu0 %vm6864_vm2, %v6863_v35 }
 0xb29   :  { %6111 = vmatmul.mubr.msk.f32.gmra.mxu0 %vm705_vm7, %v1962_v11 }
 0xb2a   :  { %6113 = vmatprep.mubr.msk.f32.mxu0 %vm6864_vm2, %v6863_v35 }
 0xb2d   :  { %6114 = vmatmul.mubr.msk.f32.gmra.mxu0 %vm705_vm7, %v1964_v54  ;;  %v1508_v54 = vadd.f32 %v7640_v22, %v7650_v38 }
 0xb2e   :  { %6116 = vmatprep.mubr.msk.f32.mxu0 %vm6864_vm2, %v6863_v35 }
 0xb31   :  { %6117 = vmatmul.mubr.msk.f32.gmra.mxu0 %vm705_vm7, %v1966_v48 }
 0xb32   :  { %6146 = vmatprep.mubr.msk.f32.mxu0 %vm6864_vm2, %v6863_v35 }
 0xba0   :  { %v1823_v56 = vpop.f32.mrf.mxu0 }
 0xba1   :  { %6080 = vmatmul.mubr.msk.f32.vlgmr.msra.gmra.mxu1 %vm705_vm7, %v1823_v56 }
 0xba2   :  { %v6064_v59 = vpop.f32.mrf.mxu0  ;;  %6082 = vmatprep.mubr.msk.f32.mxu1 %vm6864_vm2, %v6863_v35 }
 0xba4   :  { %v1828_v60 = vpop.f32.mrf.mxu0 }
 0xba5   :  { %6083 = vmatmul.mubr.msk.f32.gmra.mxu1 %vm705_vm7, %v1828_v60  ;;  %v1513_v60 = vadd.f32 %v7642_v30, %v7652_v43 }
 0xba6   :  { %v6067_v61 = vpop.f32.mrf.mxu0  ;;  %6085 = vmatprep.mubr.msk.f32.mxu1 %vm6864_vm2, %v6863_v35 }
 0xba8   :  { %v1833_v63 = vpop.f32.mrf.mxu0 }
 0xba9   :  { %6086 = vmatmul.mubr.msk.f32.gmra.mxu1 %vm705_vm7, %v1833_v63 }
 0xbaa   :  { %v6070_v1 = vpop.f32.mrf.mxu0  ;;  %6088 = vmatprep.mubr.msk.f32.mxu1 %vm6864_vm2, %v6863_v35 }
 0xbd9   :  { %v1838_v2 = vpop.f32.mrf.mxu0 }
 0xbda   :  { %6089 = vmatmul.mubr.msk.f32.gmra.mxu1 %vm705_vm7, %v1838_v2 }
 0xbdb   :  { %v6073_v3 = vpop.f32.mrf.mxu0  ;;  %6091 = vmatprep.mubr.msk.f32.mxu1 %vm6864_vm2, %v6863_v35 }
 0xbdd   :  { %v1843_v5 = vpop.f32.mrf.mxu0 }
 0xbde   :  { %6092 = vmatmul.mubr.msk.f32.gmra.mxu1 %vm705_vm7, %v1843_v5 }
 0xbdf   :  { %v6076_v9 = vpop.f32.mrf.mxu0  ;;  %6129 = vmatprep.mubr.msk.f32.mxu1 %vm6864_vm2, %v6863_v35 }
 0xbe1   :  { %v2063_v32 = vpop.f32.mrf.mxu0 }
 0xbe2   :  { %v2087_v14 = vmul.f32 0.35355338, %v2063_v32 }
 0xbe3   :  { %v6106_v12 = vpop.f32.mrf.mxu0 }
 0xbe4   :  { %v2092_v55 = vadd.f32 %v2087_v14, %v7359_v44 }
 0xbe5   :  { %v2068_v18 = vpop.f32.mrf.mxu0 }
 0xbe6   :  { %v2088_v62 = vmul.f32 0.35355338, %v2068_v18  ;;  %v2097_v19 = vsel %vm826_vm5, %v2092_v55, -inf }
 0xbe7   :  { %2098 = vmax.xlane.f32.xlu0 %v2097_v19  ;;  %v6109_v4 = vpop.f32.mrf.mxu0 }
 0xbe8   :  { %v2093_v20 = vadd.f32 %v2088_v62, %v7359_v44 }
 0xbe9   :  { %v2073_v16 = vpop.f32.mrf.mxu0 }
 0xbea   :  { %v2089_v21 = vmul.f32 0.35355338, %v2073_v16  ;;  %v2100_v23 = vsel %vm826_vm5, %v2093_v20, -inf }
 0xbeb   :  { %2101 = vmax.xlane.f32.xlu1 %v2100_v23  ;;  %v6112_v24 = vpop.f32.mrf.mxu0 }
 0xbec   :  { %v2094_v25 = vadd.f32 %v2089_v21, %v7378_v58 }
 0xbed   :  { %v2078_v26 = vpop.f32.mrf.mxu0 }
 0xbee   :  { %v2090_v29 = vmul.f32 0.35355338, %v2078_v26  ;;  %v2103_v27 = vsel %vm826_vm5, %v2094_v25, -inf }
 0xbef   :  { %2104 = vmax.xlane.f32.xlu0 %v2103_v27  ;;  %v6115_v33 = vpop.f32.mrf.mxu0 }
 0xbf0   :  { %v2095_v34 = vadd.f32 %v2090_v29, %v7387_v0 }
 0xbf1   :  { %v2083_v42 = vpop.f32.mrf.mxu0 }
 0xbf2   :  { %v2091_v40 = vmul.f32 0.35355338, %v2083_v42  ;;  %v2106_v45 = vsel %vm826_vm5, %v2095_v34, -inf  ;;  %v1523_v42 = vadd.f32 %v7646_v36, %v7656_v50  ;;  %v689_v36 = vld [vmem:[%s8829_s12 + $0x18] sm:$0xff] }
 0xbf3   :  { %2107 = vmax.xlane.f32.xlu0 %v2106_v45  ;;  %v6118_v49 = vpop.f32.mrf.mxu0  ;;  %6145 = vmatpush3.msra.mxu0 %v689_v36 }
 0xbf4   :  { %v2096_v51 = vadd.f32 %v2091_v40, %v7394_v7  ;;  %6184 = vmatprep.subr.mxu0 %v6863_v35 }
 0xbf6   :  { %v2109_v11 = vsel %vm839_vm11, %v2096_v51, -inf }
 0xbf7   :  { %2110 = vmax.xlane.f32.xlu0 %v2109_v11 }
 0xbfc   :  { %2158 = vrot.lane.b32.xlu1 %v7245_v13, %s8845_s28 }
 0xc00   :  { %2156 = vrot.lane.b32.xlu1 %v7243_v10, %s8845_s28  ;;  %v1518_v10 = vadd.f32 %v7644_v31, %v7654_v46 }
 0xc0d   :  { %2160 = vrot.lane.b32.xlu0 %v7249_v15, %s8845_s28 }
 0xc61   :  { %v1928_v48 = vpop.f32.mrf.mxu1 }
 0xc62   :  { %v7772_v56 = vadd.f32 %v1928_v48, %v1508_v54 }
 0xc63   :  { %v6081_v59 = vpop.f32.mrf.mxu1 }
 0xc65   :  { %v1933_v61 = vpop.f32.mrf.mxu1 }
 0xc66   :  { %v7776_v63 = vadd.f32 %v1933_v61, %v1513_v60 }
 0xc67   :  { %v6084_v13 = vpop.f32.mrf.mxu1 }
 0xc69   :  { %v1938_v1 = vpop.f32.mrf.mxu1 }
 0xc6a   :  { %v7780_v2 = vadd.f32 %v1938_v1, %v1518_v10 }
 0xc6b   :  { %v6087_v15 = vpop.f32.mrf.mxu1 }
 0xc70   :  { %v2099_v3 = vpop.xlane.xlu0 %2098 }
 0xc71   :  { %v2112_v22 = vsub.f32 %v2092_v55, %v2099_v3 }
 0xc73   :  { %v2117_v38 = vmul.f32 1.442695, %v2112_v22 }
 0xc74   :  { %v2102_v5 = vpop.xlane.xlu1 %2101 }
 0xc75   :  { %6689 = vpow2.f32 %v2117_v38  ;;  %v2113_v9 = vsub.f32 %v2093_v20, %v2102_v5 }
 0xc77   :  { %v2119_v32 = vmul.f32 1.442695, %v2113_v9 }
 0xc78   :  { %v2105_v14 = vpop.xlane.xlu0 %2104  ;;  %v2159_v4 = vpop.permute.xlu1 %2158 }
 0xc79   :  { %6691 = vpow2.f32 %v2119_v32  ;;  %v2114_v30 = vsub.f32 %v2094_v25, %v2105_v14 }
 0xc7b   :  { %v2121_v43 = vmul.f32 1.442695, %v2114_v30 }
 0xc7c   :  { %v2108_v12 = vpop.xlane.xlu0 %2107  ;;  %v2157_v24 = vpop.permute.xlu1 %2156 }
 0xc7d   :  { %6693 = vpow2.f32 %v2121_v43  ;;  %v2115_v18 = vsub.f32 %v2095_v34, %v2108_v12 }
 0xc7f   :  { %v2123_v62 = vmul.f32 1.442695, %v2115_v18 }
 0xc80   :  { %v2111_v31 = vpop.xlane.xlu0 %2110 }
 0xc81   :  { %6695 = vpow2.f32 %v2123_v62  ;;  %v2116_v46 = vsub.f32 %v2096_v51, %v2111_v31  ;;  %v1528_v51 = vadd.f32 %v7648_v39, %v7658_v53 }
 0xc82   :  { %v6690_v19 = vpop.eup %6689 }
 0xc83   :  { %v2125_v16 = vmul.f32 1.442695, %v2116_v46  ;;  %v2127_v55 = vsel %vm826_vm5, %v6690_v19, 0.0 }
 0xc84   :  { %2128 = vadd.xlane.f32.xlu1 %v2127_v55  ;;  %v2161_v21 = vpop.permute.xlu0 %2160  ;;  %v5390_v55 = vld [vmem:[%s8830_s13] ss:$0 sm:$0xff] }
 0xc85   :  { %6697 = vpow2.f32 %v2125_v16  ;;  %6120 = vmatpush3.msk.msra.mxu1 %vm912_vm8, %v2161_v21 }
 0xc86   :  { %v6692_v20 = vpop.eup %6691  ;;  %6121 = vmatprep.subr.mxu1 %v6863_v35 }
 0xc87   :  { %6122 = vmatpush3.msra.mxu1 %v2159_v4  ;;  %v2130_v23 = vsel %vm826_vm5, %v6692_v20, 0.0 }
 0xc88   :  { %2131 = vadd.xlane.f32.xlu0 %v2130_v23  ;;  %6123 = vmatprep.subr.mxu1 %v6863_v35 }
 0xc89   :  { %6124 = vmatpush3.msra.mxu1 %v2157_v24 }
 0xc8a   :  { %v6694_v25 = vpop.eup %6693  ;;  %6125 = vmatprep.subr.mxu1 %v6863_v35 }
 0xc8b   :  { %v2133_v26 = vsel %vm826_vm5, %v6694_v25, 0.0 }
 0xc8c   :  { %2134 = vadd.xlane.f32.xlu1 %v2133_v26 }
 0xc8e   :  { %v6696_v29 = vpop.eup %6695 }
 0xc8f   :  { %v2136_v27 = vsel %vm826_vm5, %v6696_v29, 0.0 }
 0xc90   :  { %2137 = vadd.xlane.f32.xlu0 %v2136_v27 }
 0xc92   :  { %v6698_v33 = vpop.eup %6697 }
 0xc93   :  { %v2139_v34 = vsel %vm839_vm11, %v6698_v33, 0.0 }
 0xc94   :  { %2140 = vadd.xlane.f32.xlu1 %v2139_v34 }
 0xc9a   :  { %v1943_v40 = vpop.f32.mrf.mxu1 }
 0xc9b   :  { %v7793_v45 = vadd.f32 %v1943_v40, %v1523_v42 }
 0xc9c   :  { %v6090_v49 = vpop.f32.mrf.mxu1 }
 0xc9e   :  { %v1948_v11 = vpop.f32.mrf.mxu1 }
 0xc9f   :  { %v7797_v54 = vadd.f32 %v1948_v11, %v1528_v51 }
 0xca0   :  { %v6093_v48 = vpop.f32.mrf.mxu1 }
 0xca5   :  { %2154 = vrot.lane.b32.xlu1 %v7241_v8, %s8845_s28 }
 0xca6   :  { %2152 = vrot.lane.b32.xlu0 %v7239_v6, %s8845_s28  ;;  %s8878_s28 = smov 40  }
 0xd0d   :  { %v2129_v50 = vpop.xlane.xlu1 %2128 }
 0xd0e   :  { %6699 = vrcp.f32 %v2129_v50 }
 0xd11   :  { %v2132_v39 = vpop.xlane.xlu0 %2131 }
 0xd12   :  { %6701 = vrcp.f32 %v2132_v39 }
 0xd15   :  { %v2135_v53 = vpop.xlane.xlu1 %2134 }
 0xd16   :  { %6703 = vrcp.f32 %v2135_v53 }
 0xd19   :  { %v2138_v59 = vpop.xlane.xlu0 %2137 }
 0xd1a   :  { %6705 = vrcp.f32 %v2138_v59 }
 0xd1b   :  { %v6700_v8 = vpop.eup %6699 }
 0xd1c   :  { %v2147_v6 = vmul.f32 %v6700_v8, %v6690_v19 }
 0xd1d   :  { %v2141_v60 = vpop.xlane.xlu1 %2140  ;;  %v2153_v13 = vpop.permute.xlu0 %2152 }
 0xd1e   :  { %6707 = vrcp.f32 %v2141_v60 }
 0xd1f   :  { %v6702_v10 = vpop.eup %6701 }
 0xd20   :  { %v2148_v1 = vmul.f32 %v6702_v10, %v6692_v20 }
 0xd21   :  { %v2155_v61 = vpop.permute.xlu1 %2154 }
 0xd22   :  { %6126 = vmatpush3.msra.mxu1 %v2155_v61 }
 0xd23   :  { %6127 = vmatprep.subr.mxu1 %v6863_v35  ;;  %v6704_v15 = vpop.eup %6703 }
 0xd24   :  { %6128 = vmatpush3.msra.mxu1 %v2153_v13  ;;  %v2149_v3 = vmul.f32 %v6704_v15, %v6694_v25 }
 0xd25   :  { %6130 = vmatmul.mubr.msk.f32.vlgmr.msra.gmra.mxu1 %vm826_vm5, %v2147_v6  ;;  %6161 = vmatprep.subr.mxu1 %v6863_v35 }
 0xd26   :  { %6132 = vmatprep.mubr.msk.f32.mxu1 %vm6864_vm2, %v6863_v35 }
 0xd27   :  { %v6706_v22 = vpop.eup %6705 }
 0xd28   :  { %v2150_v38 = vmul.f32 %v6706_v22, %v6696_v29 }
 0xd29   :  { %6133 = vmatmul.mubr.msk.f32.gmra.mxu1 %vm826_vm5, %v2148_v1 }
 0xd2a   :  { %6135 = vmatprep.mubr.msk.f32.mxu1 %vm6864_vm2, %v6863_v35 }
 0xd2b   :  { %v6708_v5 = vpop.eup %6707 }
 0xd2c   :  { %v2151_v9 = vmul.f32 %v6708_v5, %v6698_v33 }
 0xd2d   :  { %6136 = vmatmul.mubr.msk.f32.gmra.mxu1 %vm826_vm5, %v2149_v3 }
 0xd2e   :  { %6138 = vmatprep.mubr.msk.f32.mxu1 %vm6864_vm2, %v6863_v35 }
 0xd31   :  { %6139 = vmatmul.mubr.msk.f32.gmra.mxu1 %vm826_vm5, %v2150_v38 }
 0xd32   :  { %6141 = vmatprep.mubr.msk.f32.mxu1 %vm6864_vm2, %v6863_v35 }
 0xd35   :  { %6142 = vmatmul.mubr.msk.f32.gmra.mxu1 %vm826_vm5, %v2151_v9 }
 0xd36   :  { %6169 = vmatprep.mubr.msk.f32.mxu1 %vm6864_vm2, %v6863_v35 }
 0xde5   :  { %v2249_v32 = vpop.f32.mrf.mxu1 }
 0xde6   :  { %6147 = vmatmul.mubr.msk.f32.vlgmr.msra.gmra.mxu0 %vm705_vm7, %v2249_v32 }
 0xde7   :  { %v6131_v14 = vpop.f32.mrf.mxu1  ;;  %6149 = vmatprep.mubr.msk.f32.mxu0 %vm6864_vm2, %v6863_v35 }
 0xde9   :  { %v2254_v30 = vpop.f32.mrf.mxu1 }
 0xdea   :  { %6150 = vmatmul.mubr.msk.f32.gmra.mxu0 %vm705_vm7, %v2254_v30 }
 0xdeb   :  { %v6134_v43 = vpop.f32.mrf.mxu1  ;;  %6152 = vmatprep.mubr.msk.f32.mxu0 %vm6864_vm2, %v6863_v35 }
 0xded   :  { %v2259_v12 = vpop.f32.mrf.mxu1 }
 0xdee   :  { %6153 = vmatmul.mubr.msk.f32.gmra.mxu0 %vm705_vm7, %v2259_v12 }
 0xdef   :  { %v6137_v18 = vpop.f32.mrf.mxu1  ;;  %6155 = vmatprep.mubr.msk.f32.mxu0 %vm6864_vm2, %v6863_v35 }
 0xdf1   :  { %v2264_v62 = vpop.f32.mrf.mxu1 }
 0xdf2   :  { %6156 = vmatmul.mubr.msk.f32.gmra.mxu0 %vm705_vm7, %v2264_v62 }
 0xdf3   :  { %v6140_v31 = vpop.f32.mrf.mxu1  ;;  %6158 = vmatprep.mubr.msk.f32.mxu0 %vm6864_vm2, %v6863_v35 }
 0xdf5   :  { %v2269_v46 = vpop.f32.mrf.mxu1 }
 0xdf6   :  { %6159 = vmatmul.mubr.msk.f32.gmra.mxu0 %vm705_vm7, %v2269_v46 }
 0xdf7   :  { %v6143_v19 = vpop.f32.mrf.mxu1  ;;  %6200 = vmatprep.mubr.msk.f32.mxu0 %vm6864_vm2, %v6863_v35 }
 0xdf8   :  { %v2492_v19 = vld [vmem:[%s8833_s16 + $0x18] sm:$0xff] }
 0xdf9   :  { %6162 = vmatpush3.msra.mxu1 %v2492_v19 }
 0xdfa   :  { %6163 = vmatprep.subr.mxu1 %v6863_v35 }
 0xea6   :  { %v2354_v4 = vpop.f32.mrf.mxu0 }
 0xea7   :  { %v2378_v16 = vadd.f32 %v2354_v4, %v7772_v56  ;;  %v2491_v4 = vld [vmem:[%s8833_s16 + $0x10] sm:$0xff] }
 0xea8   :  { %v6148_v21 = vpop.f32.mrf.mxu0  ;;  %6164 = vmatpush3.msra.mxu1 %v2491_v4 }
 0xea9   :  { %v2383_v20 = vadd.f32 %v2378_v16, %v7145_v28  ;;  %v2490_v16 = vld [vmem:[%s8833_s16 + $0x8] sm:$0xff]  ;;  %6165 = vmatprep.subr.mxu1 %v6863_v35 }
 0xeaa   :  { %v2359_v23 = vpop.f32.mrf.mxu0  ;;  %6166 = vmatpush3.msra.mxu1 %v2490_v16 }
 0xeab   :  { %v7844_v24 = vadd.f32 %v5390_v55, %v2383_v20  ;;  %v2379_v25 = vadd.f32 %v2359_v23, %v7776_v63  ;;  %6167 = vmatprep.subr.mxu1 %v6863_v35 }
 0xeac   :  { %v6151_v26 = vpop.f32.mrf.mxu0 }
 0xead   :  { %v2384_v29 = vadd.f32 %v2379_v25, %v7155_v37  ;;  %v2402_v27 = vsel %vm297_vm3, %v7844_v24, 0.0 }
 0xeae   :  { %2403 = vadd.xlane.f32.xlu1 %v2402_v27  ;;  %v2364_v56 = vpop.f32.mrf.mxu0 }
 0xeaf   :  { %v7850_v33 = vadd.f32 %v5390_v55, %v2384_v29  ;;  %v2380_v34 = vadd.f32 %v2364_v56, %v7780_v2 }
 0xeb0   :  { %v6154_v42 = vpop.f32.mrf.mxu0 }
 0xeb1   :  { %v2385_v28 = vadd.f32 %v2380_v34, %v7163_v47  ;;  %v2405_v40 = vsel %vm297_vm3, %v7850_v33, 0.0 }
 0xeb2   :  { %2406 = vadd.xlane.f32.xlu0 %v2405_v40  ;;  %v2369_v63 = vpop.f32.mrf.mxu0 }
 0xeb3   :  { %v7856_v49 = vadd.f32 %v5390_v55, %v2385_v28  ;;  %v2381_v37 = vadd.f32 %v2369_v63, %v7793_v45 }
 0xeb4   :  { %v6157_v51 = vpop.f32.mrf.mxu0 }
 0xeb5   :  { %v2386_v11 = vadd.f32 %v2381_v37, %v7171_v52  ;;  %v2408_v48 = vsel %vm297_vm3, %v7856_v49, 0.0 }
 0xeb6   :  { %2409 = vadd.xlane.f32.xlu0 %v2408_v48  ;;  %v2374_v2 = vpop.f32.mrf.mxu0 }
 0xeb7   :  { %v7862_v36 = vadd.f32 %v5390_v55, %v2386_v11  ;;  %v2382_v47 = vadd.f32 %v2374_v2, %v7797_v54  ;;  %v5391_v11 = vld [vmem:[%s8831_s14] ss:$0 sm:$0xff] }
 0xeb8   :  { %v6160_v50 = vpop.f32.mrf.mxu0 }
 0xeb9   :  { %v2387_v39 = vadd.f32 %v2382_v47, %v7178_v57  ;;  %v2411_v53 = vsel %vm297_vm3, %v7862_v36, 0.0  ;;  %v5392_v47 = vld [vmem:[%s8832_s15] ss:$0 sm:$0xff] }
 0xeba   :  { %2412 = vadd.xlane.f32.xlu0 %v2411_v53 }
 0xebb   :  { %v7868_v45 = vadd.f32 %v5390_v55, %v2387_v39  ;;  %v2489_v55 = vld [vmem:[%s8833_s16] sm:$0xff] }
 0xebc   :  { %6168 = vmatpush3.msra.mxu1 %v2489_v55 }
 0xebd   :  { %v2414_v52 = vsel %vm310_vm4, %v7868_v45, 0.0  ;;  %6215 = vmatprep.subr.mxu1 %v6863_v35 }
 0xebe   :  { %2415 = vadd.xlane.f32.xlu1 %v2414_v52 }
 0xf37   :  { %v2404_v59 = vpop.xlane.xlu1 %2403 }
 0xf38   :  { %v2417_v60 = vmul.f32 0.03125, %v2404_v59 }
 0xf3a   :  { %v2422_v8 = vsub.f32 %v7844_v24, %v2417_v60 }
 0xf3b   :  { %v2407_v61 = vpop.xlane.xlu0 %2406 }
 0xf3c   :  { %v2418_v6 = vmul.f32 0.03125, %v2407_v61  ;;  %v2427_v54 = vmul.f32 %v2422_v8, %v2422_v8 }
 0xf3e   :  { %v7874_v13 = vsub.f32 %v7850_v33, %v2418_v6  ;;  %v2432_v57 = vsel %vm297_vm3, %v2427_v54, 0.0 }
 0xf3f   :  { %v2410_v10 = vpop.xlane.xlu0 %2409  ;;  %2433 = vadd.xlane.f32.xlu0 %v2432_v57 }
 0xf40   :  { %v2419_v1 = vmul.f32 0.03125, %v2410_v10  ;;  %v2428_v15 = vmul.f32 %v7874_v13, %v7874_v13 }
 0xf42   :  { %v7880_v3 = vsub.f32 %v7856_v49, %v2419_v1  ;;  %v2435_v22 = vsel %vm297_vm3, %v2428_v15, 0.0 }
 0xf43   :  { %v2413_v38 = vpop.xlane.xlu0 %2412  ;;  %2436 = vadd.xlane.f32.xlu1 %v2435_v22 }
 0xf44   :  { %v2420_v5 = vmul.f32 0.03125, %v2413_v38  ;;  %v2429_v9 = vmul.f32 %v7880_v3, %v7880_v3 }
 0xf46   :  { %v7886_v32 = vsub.f32 %v7862_v36, %v2420_v5  ;;  %v2438_v14 = vsel %vm297_vm3, %v2429_v9, 0.0  ;;  %v2657_v5 = vld [vmem:[%s8835_s18 + $0x38] sm:$0xff]  ;;  %v2656_v9 = vld [vmem:[%s8835_s18 + $0x30] sm:$0xff] }
 0xf47   :  { %2439 = vadd.xlane.f32.xlu0 %v2438_v14  ;;  %v2416_v30 = vpop.xlane.xlu1 %2415  ;;  %6185 = vmatpush3.msra.mxu0 %v2657_v5  ;;  %v2654_v14 = vld [vmem:[%s8835_s18 + $0x20] sm:$0xff] }
 0xf48   :  { %v2421_v43 = vmul.f32 0.03125, %v2416_v30  ;;  %v2430_v12 = vmul.f32 %v7886_v32, %v7886_v32  ;;  %6186 = vmatprep.subr.mxu0 %v6863_v35  ;;  %v2653_v30 = vld [vmem:[%s8835_s18 + $0x18] sm:$0xff] }
 0xf49   :  { %6187 = vmatpush3.msra.mxu0 %v2656_v9 }
 0xf4a   :  { %v7892_v18 = vsub.f32 %v7868_v45, %v2421_v43  ;;  %v2441_v62 = vsel %vm297_vm3, %v2430_v12, 0.0  ;;  %6188 = vmatprep.subr.mxu0 %v6863_v35  ;;  %v2652_v43 = vld [vmem:[%s8835_s18 + $0x10] sm:$0xff]  ;;  %v2651_v12 = vld [vmem:[%s8835_s18 + $0x8] sm:$0xff] }
 0xf4b   :  { %2442 = vadd.xlane.f32.xlu1 %v2441_v62  ;;  %v5393_v62 = vld [vmem:[%s8834_s17] ss:$0 sm:$0xff] }
 0xf4c   :  { %v2431_v31 = vmul.f32 %v7892_v18, %v7892_v18 }
 0xf4e   :  { %v2444_v46 = vsel %vm310_vm4, %v2431_v31, 0.0 }
 0xf4f   :  { %2445 = vadd.xlane.f32.xlu0 %v2444_v46 }
 0xfc8   :  { %v2434_v21 = vpop.xlane.xlu0 %2433 }
 0xfc9   :  { %v2447_v20 = vmul.f32 0.03125, %v2434_v21 }
 0xfcb   :  { %v2452_v23 = vadd.f32 1e-05, %v2447_v20 }
 0xfcc   :  { %v2437_v25 = vpop.xlane.xlu1 %2436 }
 0xfcd   :  { %6709 = vrsqrt.f32 %v2452_v23  ;;  %v2448_v26 = vmul.f32 0.03125, %v2437_v25 }
 0xfcf   :  { %v2453_v29 = vadd.f32 1e-05, %v2448_v26 }
 0xfd0   :  { %v2440_v27 = vpop.xlane.xlu0 %2439 }
 0xfd1   :  { %6711 = vrsqrt.f32 %v2453_v29  ;;  %v2449_v56 = vmul.f32 0.03125, %v2440_v27 }
 0xfd3   :  { %v2454_v34 = vadd.f32 1e-05, %v2449_v56 }
 0xfd4   :  { %v2443_v42 = vpop.xlane.xlu1 %2442 }
 0xfd5   :  { %6713 = vrsqrt.f32 %v2454_v34  ;;  %v2450_v28 = vmul.f32 0.03125, %v2443_v42 }
 0xfd7   :  { %v2455_v40 = vadd.f32 1e-05, %v2450_v28 }
 0xfd8   :  { %v2446_v63 = vpop.xlane.xlu0 %2445 }
 0xfd9   :  { %6715 = vrsqrt.f32 %v2455_v40  ;;  %v2451_v37 = vmul.f32 0.03125, %v2446_v63 }
 0xfda   :  { %v6710_v51 = vpop.eup %6709 }
 0xfdb   :  { %v2462_v48 = vmul.f32 %v6710_v51, %v2422_v8  ;;  %v2456_v2 = vadd.f32 1e-05, %v2451_v37 }
 0xfdd   :  { %v2473_v50 = vmul.f32 %v5391_v11, %v2462_v48  ;;  %6717 = vrsqrt.f32 %v2456_v2 }
 0xfde   :  { %v6712_v39 = vpop.eup %6711 }
 0xfdf   :  { %v2484_v53 = vadd.f32 %v5392_v47, %v2473_v50  ;;  %v2463_v52 = vmul.f32 %v6712_v39, %v7874_v13 }
 0xfe1   :  { %6170 = vmatmul.mubr.msk.f32.vlgmr.msra.gmra.mxu1 %vm297_vm3, %v2484_v53  ;;  %v2474_v59 = vmul.f32 %v5391_v11, %v2463_v52 }
 0xfe2   :  { %v6714_v60 = vpop.eup %6713  ;;  %6172 = vmatprep.mubr.msk.f32.mxu1 %vm6864_vm2, %v6863_v35 }
 0xfe3   :  { %v2485_v61 = vadd.f32 %v5392_v47, %v2474_v59  ;;  %v2464_v8 = vmul.f32 %v6714_v60, %v7880_v3 }
 0xfe5   :  { %6173 = vmatmul.mubr.msk.f32.gmra.mxu1 %vm297_vm3, %v2485_v61  ;;  %v2475_v6 = vmul.f32 %v5391_v11, %v2464_v8 }
 0xfe6   :  { %v6716_v54 = vpop.eup %6715  ;;  %6175 = vmatprep.mubr.msk.f32.mxu1 %vm6864_vm2, %v6863_v35 }
 0xfe7   :  { %v2486_v57 = vadd.f32 %v5392_v47, %v2475_v6  ;;  %v2465_v13 = vmul.f32 %v6716_v54, %v7886_v32  ;;  %v2655_v32 = vld [vmem:[%s8835_s18 + $0x28] sm:$0xff] }
 0xfe8   :  { %6189 = vmatpush3.msra.mxu0 %v2655_v32 }
 0xfe9   :  { %6176 = vmatmul.mubr.msk.f32.gmra.mxu1 %vm297_vm3, %v2486_v57  ;;  %v2476_v10 = vmul.f32 %v5391_v11, %v2465_v13  ;;  %6190 = vmatprep.subr.mxu0 %v6863_v35 }
 0xfea   :  { %v6718_v1 = vpop.eup %6717  ;;  %6178 = vmatprep.mubr.msk.f32.mxu1 %vm6864_vm2, %v6863_v35  ;;  %6191 = vmatpush3.msra.mxu0 %v2654_v14 }
 0xfeb   :  { %v2487_v15 = vadd.f32 %v5392_v47, %v2476_v10  ;;  %v2466_v3 = vmul.f32 %v6718_v1, %v7892_v18  ;;  %6192 = vmatprep.subr.mxu0 %v6863_v35  ;;  %v2650_v18 = vld [vmem:[%s8835_s18] sm:$0xff] }
 0xfec   :  { %6193 = vmatpush3.msra.mxu0 %v2653_v30 }
 0xfed   :  { %6179 = vmatmul.mubr.msk.f32.gmra.mxu1 %vm297_vm3, %v2487_v15  ;;  %v2477_v22 = vmul.f32 %v5391_v11, %v2466_v3  ;;  %6194 = vmatprep.subr.mxu0 %v6863_v35 }
 0xfee   :  { %6181 = vmatprep.mubr.msk.f32.mxu1 %vm6864_vm2, %v6863_v35  ;;  %6195 = vmatpush3.msra.mxu0 %v2652_v43 }
 0xfef   :  { %v2488_v38 = vadd.f32 %v5392_v47, %v2477_v22  ;;  %6196 = vmatprep.subr.mxu0 %v6863_v35 }
 0xff0   :  { %6197 = vmatpush3.msra.mxu0 %v2651_v12 }
 0xff1   :  { %6182 = vmatmul.mubr.msk.f32.gmra.mxu1 %vm297_vm3, %v2488_v38  ;;  %6198 = vmatprep.subr.mxu0 %v6863_v35 }
 0xff2   :  { %6223 = vmatprep.mubr.msk.f32.mxu1 %vm6864_vm2, %v6863_v35  ;;  %6199 = vmatpush3.msra.mxu0 %v2650_v18 }
 0xff3   :  { %6238 = vmatprep.subr.mxu0 %v6863_v35 }
0x10a1   :  { %v2581_v31 = vpop.f32.mrf.mxu1 }
0x10a2   :  { %v2582_v46 = vadd.f32 %v5393_v62, %v2581_v31 }
0x10a3   :  { %v6171_v19 = vpop.f32.mrf.mxu1 }
0x10a4   :  { %v2610_v4 = vmul.f32 0.044715, %v2582_v46  ;;  %v2605_v3 = vmul.f32 0.5, %v2582_v46 }
0x10a5   :  { %v2586_v16 = vpop.f32.mrf.mxu1 }
0x10a6   :  { %v2615_v55 = vmul.f32 %v2610_v4, %v2582_v46  ;;  %v2587_v21 = vadd.f32 %v5393_v62, %v2586_v16 }
0x10a7   :  { %v6174_v20 = vpop.f32.mrf.mxu1 }
0x10a8   :  { %v2620_v23 = vmul.f32 %v2615_v55, %v2582_v46  ;;  %v2611_v25 = vmul.f32 0.044715, %v2587_v21  ;;  %v2606_v32 = vmul.f32 0.5, %v2587_v21 }
0x10a9   :  { %v2591_v26 = vpop.f32.mrf.mxu1 }
0x10aa   :  { %v2625_v29 = vadd.f32 %v2620_v23, %v2582_v46  ;;  %v2616_v27 = vmul.f32 %v2611_v25, %v2587_v21  ;;  %v2592_v56 = vadd.f32 %v5393_v62, %v2591_v26  ;;  %v5404_v25 = vld [vmem:[%s8836_s19] ss:$0 sm:$0xff] }
0x10ab   :  { %v6177_v34 = vpop.f32.mrf.mxu1 }
0x10ac   :  { %v2630_v42 = vmul.f32 0.7978846, %v2625_v29  ;;  %v2621_v28 = vmul.f32 %v2616_v27, %v2587_v21  ;;  %v2612_v40 = vmul.f32 0.044715, %v2592_v56  ;;  %v2607_v12 = vmul.f32 0.5, %v2592_v56 }
0x10ad   :  { %v2596_v63 = vpop.f32.mrf.mxu1 }
0x10ae   :  { %6719 = vtanh.f32 %v2630_v42  ;;  %v2626_v37 = vadd.f32 %v2621_v28, %v2587_v21  ;;  %v2617_v51 = vmul.f32 %v2612_v40, %v2592_v56  ;;  %v2597_v11 = vadd.f32 %v5393_v62, %v2596_v63 }
0x10af   :  { %v6180_v48 = vpop.f32.mrf.mxu1 }
0x10b0   :  { %v2622_v2 = vmul.f32 %v2617_v51, %v2592_v56  ;;  %v2613_v47 = vmul.f32 0.044715, %v2597_v11  ;;  %v2631_v50 = vmul.f32 0.7978846, %v2626_v37  ;;  %v2608_v46 = vmul.f32 0.5, %v2597_v11 }
0x10b1   :  { %v2601_v39 = vpop.f32.mrf.mxu1 }
0x10b2   :  { %v2627_v53 = vadd.f32 %v2622_v2, %v2592_v56  ;;  %v2618_v52 = vmul.f32 %v2613_v47, %v2597_v11  ;;  %v2602_v59 = vadd.f32 %v5393_v62, %v2601_v39  ;;  %6721 = vtanh.f32 %v2631_v50 }
0x10b3   :  { %v6183_v60 = vpop.f32.mrf.mxu1 }
0x10b4   :  { %v2623_v61 = vmul.f32 %v2618_v52, %v2597_v11  ;;  %v2614_v8 = vmul.f32 0.044715, %v2602_v59  ;;  %v2632_v6 = vmul.f32 0.7978846, %v2627_v53  ;;  %v2609_v55 = vmul.f32 0.5, %v2602_v59 }
0x10b6   :  { %v2628_v54 = vadd.f32 %v2623_v61, %v2597_v11  ;;  %v2619_v57 = vmul.f32 %v2614_v8, %v2602_v59  ;;  %6723 = vtanh.f32 %v2632_v6 }
0x10b8   :  { %v2624_v13 = vmul.f32 %v2619_v57, %v2602_v59  ;;  %v2633_v10 = vmul.f32 0.7978846, %v2628_v54 }
0x10ba   :  { %v2629_v1 = vadd.f32 %v2624_v13, %v2602_v59  ;;  %6725 = vtanh.f32 %v2633_v10 }
0x10bb   :  { %v6720_v15 = vpop.eup %6719 }
0x10bc   :  { %v2640_v22 = vadd.f32 1.0, %v6720_v15  ;;  %v2634_v38 = vmul.f32 0.7978846, %v2629_v1 }
0x10be   :  { %v2645_v5 = vmul.f32 %v2640_v22, %v2605_v3  ;;  %6727 = vtanh.f32 %v2634_v38 }
0x10bf   :  { %v6722_v9 = vpop.eup %6721 }
0x10c0   :  { %6201 = vmatmul.mubr.msk.f32.vlgmr.msra.gmra.mxu0 %vm85_vm0, %v2645_v5  ;;  %v2641_v14 = vadd.f32 1.0, %v6722_v9 }
0x10c1   :  { %6203 = vmatprep.mubr.msk.f32.mxu0 %vm6864_vm2, %v6863_v35 }
0x10c2   :  { %v2646_v30 = vmul.f32 %v2641_v14, %v2606_v32 }
0x10c3   :  { %v6724_v43 = vpop.eup %6723 }
0x10c4   :  { %6204 = vmatmul.mubr.msk.f32.gmra.mxu0 %vm85_vm0, %v2646_v30  ;;  %v2642_v18 = vadd.f32 1.0, %v6724_v43 }
0x10c5   :  { %6206 = vmatprep.mubr.msk.f32.mxu0 %vm6864_vm2, %v6863_v35 }
0x10c6   :  { %v2647_v62 = vmul.f32 %v2642_v18, %v2607_v12 }
0x10c7   :  { %v6726_v31 = vpop.eup %6725 }
0x10c8   :  { %6207 = vmatmul.mubr.msk.f32.gmra.mxu0 %vm85_vm0, %v2647_v62  ;;  %v2643_v19 = vadd.f32 1.0, %v6726_v31 }
0x10c9   :  { %6209 = vmatprep.mubr.msk.f32.mxu0 %vm6864_vm2, %v6863_v35 }
0x10ca   :  { %v2648_v4 = vmul.f32 %v2643_v19, %v2608_v46  ;;  %v5412_v19 = vld [vmem:[%s8828_s11 + $0x38] sm:$0xff] }
0x10cb   :  { %v6728_v16 = vpop.eup %6727  ;;  %6216 = vmatpush3.msra.mxu1 %v5412_v19 }
0x10cc   :  { %6210 = vmatmul.mubr.msk.f32.gmra.mxu0 %vm85_vm0, %v2648_v4  ;;  %v2644_v21 = vadd.f32 1.0, %v6728_v16  ;;  %6217 = vmatprep.subr.mxu1 %v6863_v35  ;;  %v5411_v4 = vld [vmem:[%s8828_s11 + $0x30] sm:$0xff]  ;;  %v5410_v16 = vld [vmem:[%s8828_s11 + $0x28] sm:$0xff] }
0x10cd   :  { %6212 = vmatprep.mubr.msk.f32.mxu0 %vm6864_vm2, %v6863_v35  ;;  %6218 = vmatpush3.msra.mxu1 %v5411_v4 }
0x10ce   :  { %v2649_v20 = vmul.f32 %v2644_v21, %v2609_v55  ;;  %6219 = vmatprep.subr.mxu1 %v6863_v35  ;;  %v5409_v55 = vld [vmem:[%s8828_s11 + $0x20] sm:$0xff] }
0x10cf   :  { %6220 = vmatpush3.msra.mxu1 %v5410_v16 }
0x10d0   :  { %6213 = vmatmul.mubr.msk.f32.gmra.mxu0 %vm85_vm0, %v2649_v20  ;;  %6221 = vmatprep.subr.mxu1 %v6863_v35 }
0x10d1   :  { %6248 = vmatprep.mubr.msk.f32.mxu0 %vm6864_vm2, %v6863_v35  ;;  %6222 = vmatpush3.msra.mxu1 %v5409_v55 }
0x10d2   :  { %6263 = vmatprep.subr.mxu1 %v6863_v35 }
0x1180   :  { %v2739_v23 = vpop.f32.mrf.mxu0 }
0x1181   :  { %v2763_v26 = vadd.f32 %v2739_v23, %v7844_v24 }
0x1182   :  { %v6202_v29 = vpop.f32.mrf.mxu0 }
0x1183   :  { %v7993_v27 = vadd.f32 %v5404_v25, %v2763_v26 }
0x1184   :  { %v2744_v56 = vpop.f32.mrf.mxu0 }
0x1185   :  { %v2764_v34 = vadd.f32 %v2744_v56, %v7850_v33  ;;  %v2784_v42 = vsel %vm297_vm3, %v7993_v27, 0.0 }
0x1186   :  { %2785 = vadd.xlane.f32.xlu1 %v2784_v42  ;;  %v6205_v28 = vpop.f32.mrf.mxu0 }
0x1187   :  { %v7998_v40 = vadd.f32 %v5404_v25, %v2764_v34 }
0x1188   :  { %v2749_v63 = vpop.f32.mrf.mxu0 }
0x1189   :  { %v2765_v37 = vadd.f32 %v2749_v63, %v7856_v49  ;;  %v2787_v51 = vsel %vm297_vm3, %v7998_v40, 0.0 }
0x118a   :  { %2788 = vadd.xlane.f32.xlu0 %v2787_v51  ;;  %v6208_v24 = vpop.f32.mrf.mxu0 }
0x118b   :  { %v8003_v11 = vadd.f32 %v5404_v25, %v2765_v37 }
0x118c   :  { %v2754_v48 = vpop.f32.mrf.mxu0 }
0x118d   :  { %v2766_v33 = vadd.f32 %v2754_v48, %v7862_v36  ;;  %v2790_v2 = vsel %vm297_vm3, %v8003_v11, 0.0 }
0x118e   :  { %2791 = vadd.xlane.f32.xlu1 %v2790_v2  ;;  %v6211_v47 = vpop.f32.mrf.mxu0 }
0x118f   :  { %v8008_v50 = vadd.f32 %v5404_v25, %v2766_v33  ;;  %v5407_v33 = vld [vmem:[%s8826_s9 + $0x1] ss:$0 sm:$0xff]  ;;  %s8875_s9 = smov 48  }
0x1190   :  { %v2759_v39 = vpop.f32.mrf.mxu0 }
0x1191   :  { %v2767_v49 = vadd.f32 %v2759_v39, %v7868_v45  ;;  %v2793_v53 = vsel %vm297_vm3, %v8008_v50, 0.0  ;;  %v5408_v39 = vld [vmem:[%s8827_s10 + $0x1] ss:$0 sm:$0xff] }
0x1192   :  { %2794 = vadd.xlane.f32.xlu0 %v2793_v53  ;;  %v6214_v52 = vpop.f32.mrf.mxu0 }
0x1193   :  { %v8013_v59 = vadd.f32 %v5404_v25, %v2767_v49 }
0x1195   :  { %v2796_v36 = vsel %vm310_vm4, %v8013_v59, 0.0 }
0x1196   :  { %2797 = vadd.xlane.f32.xlu1 %v2796_v36 }
0x120f   :  { %v2786_v60 = vpop.xlane.xlu1 %2785 }
0x1210   :  { %v2799_v61 = vmul.f32 0.03125, %v2786_v60 }
0x1212   :  { %v2804_v8 = vsub.f32 %v7993_v27, %v2799_v61 }
0x1213   :  { %v2789_v6 = vpop.xlane.xlu0 %2788 }
0x1214   :  { %v2800_v54 = vmul.f32 0.03125, %v2789_v6  ;;  %v2809_v57 = vmul.f32 %v2804_v8, %v2804_v8 }
0x1216   :  { %v8019_v45 = vsub.f32 %v7998_v40, %v2800_v54  ;;  %v2814_v13 = vsel %vm297_vm3, %v2809_v57, 0.0 }
0x1217   :  { %v2792_v10 = vpop.xlane.xlu1 %2791  ;;  %2815 = vadd.xlane.f32.xlu0 %v2814_v13 }
0x1218   :  { %v2801_v1 = vmul.f32 0.03125, %v2792_v10  ;;  %v2810_v15 = vmul.f32 %v8019_v45, %v8019_v45 }
0x121a   :  { %v8025_v3 = vsub.f32 %v8003_v11, %v2801_v1  ;;  %v2817_v22 = vsel %vm297_vm3, %v2810_v15, 0.0 }
0x121b   :  { %v2795_v38 = vpop.xlane.xlu0 %2794  ;;  %2818 = vadd.xlane.f32.xlu1 %v2817_v22 }
0x121c   :  { %v2802_v5 = vmul.f32 0.03125, %v2795_v38  ;;  %v2811_v9 = vmul.f32 %v8025_v3, %v8025_v3 }
0x121e   :  { %v8031_v32 = vsub.f32 %v8008_v50, %v2802_v5  ;;  %v2820_v14 = vsel %vm297_vm3, %v2811_v9, 0.0 }
0x121f   :  { %2821 = vadd.xlane.f32.xlu0 %v2820_v14  ;;  %v2798_v30 = vpop.xlane.xlu1 %2797 }
0x1220   :  { %v2803_v43 = vmul.f32 0.03125, %v2798_v30  ;;  %v2812_v12 = vmul.f32 %v8031_v32, %v8031_v32 }
0x1222   :  { %v8037_v18 = vsub.f32 %v8013_v59, %v2803_v43  ;;  %v2823_v62 = vsel %vm297_vm3, %v2812_v12, 0.0 }
0x1223   :  { %2824 = vadd.xlane.f32.xlu1 %v2823_v62 }
0x1224   :  { %v2813_v31 = vmul.f32 %v8037_v18, %v8037_v18 }
0x1226   :  { %v2826_v46 = vsel %vm310_vm4, %v2813_v31, 0.0 }
0x1227   :  { %2827 = vadd.xlane.f32.xlu0 %v2826_v46 }
0x12a0   :  { %v2816_v21 = vpop.xlane.xlu0 %2815 }
0x12a1   :  { %v2829_v20 = vmul.f32 0.03125, %v2816_v21 }
0x12a3   :  { %v2834_v23 = vadd.f32 1e-05, %v2829_v20 }
0x12a4   :  { %v2819_v25 = vpop.xlane.xlu1 %2818 }
0x12a5   :  { %6729 = vrsqrt.f32 %v2834_v23  ;;  %v2830_v26 = vmul.f32 0.03125, %v2819_v25 }
0x12a7   :  { %v2835_v29 = vadd.f32 1e-05, %v2830_v26 }
0x12a8   :  { %v2822_v56 = vpop.xlane.xlu0 %2821 }
0x12a9   :  { %6731 = vrsqrt.f32 %v2835_v29  ;;  %v2831_v34 = vmul.f32 0.03125, %v2822_v56 }
0x12ab   :  { %v2836_v42 = vadd.f32 1e-05, %v2831_v34 }
0x12ac   :  { %v2825_v28 = vpop.xlane.xlu1 %2824 }
0x12ad   :  { %6733 = vrsqrt.f32 %v2836_v42  ;;  %v2832_v63 = vmul.f32 0.03125, %v2825_v28 }
0x12af   :  { %v2837_v37 = vadd.f32 1e-05, %v2832_v63 }
0x12b0   :  { %v2828_v51 = vpop.xlane.xlu0 %2827 }
0x12b1   :  { %6735 = vrsqrt.f32 %v2837_v37  ;;  %v2833_v24 = vmul.f32 0.03125, %v2828_v51 }
0x12b2   :  { %v6730_v48 = vpop.eup %6729 }
0x12b3   :  { %v2844_v2 = vmul.f32 %v6730_v48, %v2804_v8  ;;  %v2838_v47 = vadd.f32 1e-05, %v2833_v24 }
0x12b5   :  { %v2855_v49 = vmul.f32 %v5407_v33, %v2844_v2  ;;  %6737 = vrsqrt.f32 %v2838_v47 }
0x12b6   :  { %v6732_v53 = vpop.eup %6731 }
0x12b7   :  { %v2866_v52 = vadd.f32 %v5408_v39, %v2855_v49  ;;  %v2845_v36 = vmul.f32 %v6732_v53, %v8019_v45 }
0x12b9   :  { %6224 = vmatmul.mubr.msk.f32.vlgmr.msra.gmra.mxu1 %vm297_vm3, %v2866_v52  ;;  %v2856_v60 = vmul.f32 %v5407_v33, %v2845_v36 }
0x12ba   :  { %v6734_v61 = vpop.eup %6733  ;;  %6226 = vmatprep.mubr.msk.f32.mxu1 %vm6864_vm2, %v6863_v35 }
0x12bb   :  { %v2867_v6 = vadd.f32 %v5408_v39, %v2856_v60  ;;  %v2846_v8 = vmul.f32 %v6734_v61, %v8025_v3 }
0x12bd   :  { %6227 = vmatmul.mubr.msk.f32.gmra.mxu1 %vm297_vm3, %v2867_v6  ;;  %v2857_v54 = vmul.f32 %v5407_v33, %v2846_v8 }
0x12be   :  { %v6736_v57 = vpop.eup %6735  ;;  %6229 = vmatprep.mubr.msk.f32.mxu1 %vm6864_vm2, %v6863_v35 }
0x12bf   :  { %v2868_v13 = vadd.f32 %v5408_v39, %v2857_v54  ;;  %v2847_v45 = vmul.f32 %v6736_v57, %v8031_v32 }
0x12c1   :  { %6230 = vmatmul.mubr.msk.f32.gmra.mxu1 %vm297_vm3, %v2868_v13  ;;  %v2858_v10 = vmul.f32 %v5407_v33, %v2847_v45 }
0x12c2   :  { %v6738_v1 = vpop.eup %6737  ;;  %6232 = vmatprep.mubr.msk.f32.mxu1 %vm6864_vm2, %v6863_v35 }
0x12c3   :  { %v2869_v15 = vadd.f32 %v5408_v39, %v2858_v10  ;;  %v2848_v3 = vmul.f32 %v6738_v1, %v8037_v18 }
0x12c5   :  { %6233 = vmatmul.mubr.msk.f32.gmra.mxu1 %vm297_vm3, %v2869_v15  ;;  %v2859_v22 = vmul.f32 %v5407_v33, %v2848_v3 }
0x12c6   :  { %6235 = vmatprep.mubr.msk.f32.mxu1 %vm6864_vm2, %v6863_v35 }
0x12c7   :  { %v2870_v38 = vadd.f32 %v5408_v39, %v2859_v22 }
0x12c9   :  { %6236 = vmatmul.mubr.msk.f32.gmra.mxu1 %vm297_vm3, %v2870_v38 }
0x12ca   :  { %6273 = vmatprep.mubr.msk.f32.mxu1 %vm6864_vm2, %v6863_v35 }
0x1379   :  { %v8084_v5 = vpop.f32.mrf.mxu1 }
0x137b   :  { %v6225_v9 = vpop.f32.mrf.mxu1 }
0x137d   :  { %v8086_v32 = vpop.f32.mrf.mxu1 }
0x137f   :  { %v6228_v14 = vpop.f32.mrf.mxu1 }
0x1381   :  { %v8088_v30 = vpop.f32.mrf.mxu1 }
0x1383   :  { %v6231_v43 = vpop.f32.mrf.mxu1 }
0x1385   :  { %v8090_v12 = vpop.f32.mrf.mxu1 }
0x1386   :  { %2997 = vrot.lane.b32.xlu0 %v8090_v12, %s6865_s30 }
0x1387   :  { %v6234_v18 = vpop.f32.mrf.mxu1 }
0x1389   :  { %v8094_v62 = vpop.f32.mrf.mxu1 }
0x138a   :  { %3315 = vrot.lane.b32.xlu0 %v8094_v62, %s6866_s3  ;;  %2999 = vrot.lane.b32.xlu1 %v8094_v62, %s6865_s30 }
0x138b   :  { %v6237_v31 = vpop.f32.mrf.mxu1 }
0x138e   :  { %3311 = vrot.lane.b32.xlu0 %v8088_v30, %s6866_s3  ;;  %2995 = vrot.lane.b32.xlu1 %v8088_v30, %s6865_s30 }
0x1392   :  { %3307 = vrot.lane.b32.xlu0 %v8084_v5, %s6866_s3  ;;  %2993 = vrot.lane.b32.xlu1 %v8086_v32, %s6865_s30 }
0x1396   :  { %3299 = vrot.lane.b32.xlu0 %v8086_v32, %s6867_s25  ;;  %2991 = vrot.lane.b32.xlu1 %v8084_v5, %s6865_s30 }
0x139a   :  { %3303 = vrot.lane.b32.xlu0 %v8090_v12, %s6867_s25  ;;  %3313 = vrot.lane.b32.xlu1 %v8090_v12, %s6866_s3 }
0x139e   :  { %3182 = vrot.lane.b32.xlu0 %v8090_v12, %s6868_s8  ;;  %3309 = vrot.lane.b32.xlu1 %v8086_v32, %s6866_s3 }
0x13a2   :  { %3297 = vrot.lane.b32.xlu1 %v8084_v5, %s6867_s25 }
0x13a6   :  { %3301 = vrot.lane.b32.xlu1 %v8088_v30, %s6867_s25 }
0x13aa   :  { %3305 = vrot.lane.b32.xlu1 %v8094_v62, %s6867_s25 }
0x13ae   :  { %3180 = vrot.lane.b32.xlu1 %v8088_v30, %s6868_s8 }
0x13b2   :  { %3184 = vrot.lane.b32.xlu1 %v8094_v62, %s6868_s8 }
0x13f8   :  { %v2998_v19 = vpop.permute.xlu0 %2997 }
0x13fc   :  { %v3000_v46 = vpop.permute.xlu1 %2999  ;;  %v3316_v55 = vpop.permute.xlu0 %3315 }
0x13fd   :  { %6239 = vmatpush3.xpose.msk.msra.mxu0 %vm705_vm7, %v3000_v46 }
0x13fe   :  { %6240 = vmatprep.subr.mxu0 %v6863_v35 }
0x1400   :  { %v2996_v4 = vpop.permute.xlu1 %2995  ;;  %v3312_v23 = vpop.permute.xlu0 %3311 }
0x1401   :  { %6241 = vmatpush3.xpose.msk.msra.mxu0 %vm705_vm7, %v2998_v19 }
0x1402   :  { %6242 = vmatprep.subr.mxu0 %v6863_v35 }
0x1404   :  { %v2994_v16 = vpop.permute.xlu1 %2993  ;;  %v3308_v26 = vpop.permute.xlu0 %3307 }
0x1405   :  { %6243 = vmatpush3.xpose.msk.msra.mxu0 %vm705_vm7, %v2996_v4 }
0x1406   :  { %6244 = vmatprep.subr.mxu0 %v6863_v35 }
0x1408   :  { %v2992_v21 = vpop.permute.xlu1 %2991  ;;  %v3300_v34 = vpop.permute.xlu0 %3299 }
0x1409   :  { %6245 = vmatpush3.xpose.msk.msra.mxu0 %vm705_vm7, %v2994_v16 }
0x140a   :  { %6246 = vmatprep.subr.mxu0 %v6863_v35 }
0x140c   :  { %v3314_v20 = vpop.permute.xlu1 %3313  ;;  %v3304_v28 = vpop.permute.xlu0 %3303 }
0x140d   :  { %6247 = vmatpush3.xpose.msk.msra.mxu0 %vm705_vm7, %v2992_v21 }
0x140e   :  { %6288 = vmatprep.subr.mxu0 %v6863_v35 }
0x1410   :  { %6249 = vmatmul.mubr.msk.f32.vlgmr.msra.gmra.mxu0 %vm705_vm7, %v8084_v5  ;;  %v3310_v25 = vpop.permute.xlu1 %3309  ;;  %v3183_v51 = vpop.permute.xlu0 %3182 }
0x1411   :  { %6289 = vmatpush3.xpose.msk.msra.mxu0 %vm705_vm7, %v3316_v55  ;;  %6251 = vmatprep.mubr.msk.f32.mxu0 %vm6864_vm2, %v6863_v35 }
0x1412   :  { %6290 = vmatprep.subr.mxu0 %v6863_v35 }
0x1414   :  { %6252 = vmatmul.mubr.msk.f32.gmra.mxu0 %vm705_vm7, %v8086_v32  ;;  %v3298_v29 = vpop.permute.xlu1 %3297 }
0x1415   :  { %6291 = vmatpush3.xpose.msk.msra.mxu0 %vm705_vm7, %v3314_v20  ;;  %6254 = vmatprep.mubr.msk.f32.mxu0 %vm6864_vm2, %v6863_v35 }
0x1416   :  { %6292 = vmatprep.subr.mxu0 %v6863_v35 }
0x1418   :  { %6255 = vmatmul.mubr.msk.f32.gmra.mxu0 %vm705_vm7, %v8088_v30  ;;  %v3302_v56 = vpop.permute.xlu1 %3301 }
0x1419   :  { %6293 = vmatpush3.xpose.msk.msra.mxu0 %vm705_vm7, %v3312_v23  ;;  %6257 = vmatprep.mubr.msk.f32.mxu0 %vm6864_vm2, %v6863_v35 }
0x141a   :  { %6294 = vmatprep.subr.mxu0 %v6863_v35 }
0x141c   :  { %6258 = vmatmul.mubr.msk.f32.gmra.mxu0 %vm705_vm7, %v8090_v12  ;;  %v3306_v42 = vpop.permute.xlu1 %3305 }
0x141d   :  { %6295 = vmatpush3.xpose.msk.msra.mxu0 %vm705_vm7, %v3310_v25  ;;  %6260 = vmatprep.mubr.msk.f32.mxu0 %vm6864_vm2, %v6863_v35 }
0x141e   :  { %6296 = vmatprep.subr.mxu0 %v6863_v35 }
0x1420   :  { %6261 = vmatmul.mubr.msk.f32.gmra.mxu0 %vm705_vm7, %v8094_v62  ;;  %v3181_v63 = vpop.permute.xlu1 %3180 }
0x1421   :  { %6297 = vmatpush3.xpose.msk.msra.mxu0 %vm705_vm7, %v3308_v26  ;;  %6298 = vmatprep.mubr.msk.f32.mxu0 %vm6864_vm2, %v6863_v35 }
0x1422   :  { %6338 = vmatprep.subr.mxu0 %v6863_v35 }
0x1424   :  { %6299 = vmatmul.mubr.msk.f32.vlgmr.msra.gmra.mxu0 %vm705_vm7, %v3298_v29  ;;  %v3185_v37 = vpop.permute.xlu1 %3184 }
0x1425   :  { %6264 = vmatpush3.msk.msra.mxu1 %vm912_vm8, %v3185_v37  ;;  %6301 = vmatprep.mubr.msk.f32.mxu0 %vm6864_vm2, %v6863_v35 }
0x1426   :  { %6265 = vmatprep.subr.mxu1 %v6863_v35 }
0x1427   :  { %6266 = vmatpush3.msra.mxu1 %v3183_v51 }
0x1428   :  { %6267 = vmatprep.subr.mxu1 %v6863_v35  ;;  %6302 = vmatmul.mubr.msk.f32.gmra.mxu0 %vm705_vm7, %v3300_v34 }
0x1429   :  { %6268 = vmatpush3.msra.mxu1 %v3181_v63  ;;  %6304 = vmatprep.mubr.msk.f32.mxu0 %vm6864_vm2, %v6863_v35 }
0x142a   :  { %6269 = vmatprep.subr.mxu1 %v6863_v35 }
0x142c   :  { %6305 = vmatmul.mubr.msk.f32.gmra.mxu0 %vm705_vm7, %v3302_v56 }
0x142d   :  { %6307 = vmatprep.mubr.msk.f32.mxu0 %vm6864_vm2, %v6863_v35 }
0x1430   :  { %6308 = vmatmul.mubr.msk.f32.gmra.mxu0 %vm705_vm7, %v3304_v28 }
0x1431   :  { %6310 = vmatprep.mubr.msk.f32.mxu0 %vm6864_vm2, %v6863_v35 }
0x1434   :  { %6311 = vmatmul.mubr.msk.f32.gmra.mxu0 %vm705_vm7, %v3306_v42 }
0x1435   :  { %6340 = vmatprep.mubr.msk.f32.mxu0 %vm6864_vm2, %v6863_v35 }
0x14d0   :  { %v3087_v24 = vpop.f32.mrf.mxu0 }
0x14d1   :  { %v3111_v48 = vmul.f32 0.35355338, %v3087_v24 }
0x14d2   :  { %v6250_v33 = vpop.f32.mrf.mxu0 }
0x14d3   :  { %v3116_v2 = vadd.f32 %v3111_v48, %v7359_v44 }
0x14d4   :  { %v3092_v47 = vpop.f32.mrf.mxu0 }
0x14d5   :  { %v3112_v39 = vmul.f32 0.35355338, %v3092_v47  ;;  %v3121_v49 = vsel %vm826_vm5, %v3116_v2, -inf }
0x14d6   :  { %3122 = vmax.xlane.f32.xlu0 %v3121_v49  ;;  %v6253_v53 = vpop.f32.mrf.mxu0 }
0x14d7   :  { %v3117_v52 = vadd.f32 %v3112_v39, %v7359_v44 }
0x14d8   :  { %v3097_v36 = vpop.f32.mrf.mxu0 }
0x14d9   :  { %v3113_v60 = vmul.f32 0.35355338, %v3097_v36  ;;  %v3124_v61 = vsel %vm826_vm5, %v3117_v52, -inf }
0x14da   :  { %3125 = vmax.xlane.f32.xlu1 %v3124_v61  ;;  %v6256_v6 = vpop.f32.mrf.mxu0 }
0x14db   :  { %v3118_v8 = vadd.f32 %v3113_v60, %v7378_v58 }
0x14dc   :  { %v3102_v54 = vpop.f32.mrf.mxu0 }
0x14dd   :  { %v3114_v57 = vmul.f32 0.35355338, %v3102_v54  ;;  %v3127_v13 = vsel %vm826_vm5, %v3118_v8, -inf }
0x14de   :  { %3128 = vmax.xlane.f32.xlu0 %v3127_v13  ;;  %v6259_v45 = vpop.f32.mrf.mxu0 }
0x14df   :  { %v3119_v10 = vadd.f32 %v3114_v57, %v7387_v0 }
0x14e0   :  { %v3107_v1 = vpop.f32.mrf.mxu0 }
0x14e1   :  { %v3115_v15 = vmul.f32 0.35355338, %v3107_v1  ;;  %v3130_v3 = vsel %vm826_vm5, %v3119_v10, -inf }
0x14e2   :  { %3131 = vmax.xlane.f32.xlu0 %v3130_v3  ;;  %v6262_v22 = vpop.f32.mrf.mxu0 }
0x14e3   :  { %v3120_v38 = vadd.f32 %v3115_v15, %v7394_v7 }
0x14e4   :  { %v3403_v9 = vpop.f32.mrf.mxu0 }
0x14e5   :  { %v3427_v14 = vmul.f32 0.35355338, %v3403_v9  ;;  %v3133_v43 = vsel %vm839_vm11, %v3120_v38, -inf }
0x14e6   :  { %3134 = vmax.xlane.f32.xlu0 %v3133_v43  ;;  %v6300_v18 = vpop.f32.mrf.mxu0 }
0x14e7   :  { %v3432_v31 = vadd.f32 %v3427_v14, %v7359_v44 }
0x14e8   :  { %v3408_v46 = vpop.f32.mrf.mxu0 }
0x14e9   :  { %v3428_v19 = vmul.f32 0.35355338, %v3408_v46  ;;  %v3437_v4 = vsel %vm826_vm5, %v3432_v31, -inf }
0x14ea   :  { %3438 = vmax.xlane.f32.xlu1 %v3437_v4  ;;  %v6303_v16 = vpop.f32.mrf.mxu0 }
0x14eb   :  { %v3433_v55 = vadd.f32 %v3428_v19, %v7359_v44 }
0x14ec   :  { %v3413_v21 = vpop.f32.mrf.mxu0 }
0x14ed   :  { %v3429_v20 = vmul.f32 0.35355338, %v3413_v21  ;;  %v3440_v23 = vsel %vm826_vm5, %v3433_v55, -inf }
0x14ee   :  { %3441 = vmax.xlane.f32.xlu0 %v3440_v23  ;;  %v6306_v25 = vpop.f32.mrf.mxu0 }
0x14ef   :  { %v3434_v26 = vadd.f32 %v3429_v20, %v7378_v58 }
0x14f0   :  { %v3418_v29 = vpop.f32.mrf.mxu0 }
0x14f1   :  { %v3443_v56 = vsel %vm826_vm5, %v3434_v26, -inf  ;;  %v3430_v63 = vmul.f32 0.35355338, %v3418_v29 }
0x14f2   :  { %3444 = vmax.xlane.f32.xlu1 %v3443_v56  ;;  %v6309_v34 = vpop.f32.mrf.mxu0 }
0x14f3   :  { %v8210_v37 = vadd.f32 %v3430_v63, %v7387_v0 }
0x14f4   :  { %v3423_v42 = vpop.f32.mrf.mxu0 }
0x14f5   :  { %v3431_v51 = vmul.f32 0.35355338, %v3423_v42  ;;  %v3446_v48 = vsel %vm826_vm5, %v8210_v37, -inf }
0x14f6   :  { %v6312_v28 = vpop.f32.mrf.mxu0 }
0x14f7   :  { %v8213_v24 = vadd.f32 %v3431_v51, %v7394_v7 }
0x14f9   :  { %v3449_v33 = vsel %vm839_vm11, %v8213_v24, -inf }
0x1503   :  { %3500 = vrot.lane.b32.xlu1 %v8094_v62, %s6870_s4 }
0x1504   :  { %3178 = vrot.lane.b32.xlu0 %v8086_v32, %s6868_s8 }
0x1523   :  { %3447 = vmax.xlane.f32.xlu0 %v3446_v48 }
0x1527   :  { %3450 = vmax.xlane.f32.xlu1 %v3449_v33 }
0x1539   :  { %3176 = vrot.lane.b32.xlu0 %v8084_v5, %s6868_s8  ;;  %s8876_s8 = smov 72  }
0x155f   :  { %v3123_v47 = vpop.xlane.xlu0 %3122 }
0x1560   :  { %v3136_v39 = vsub.f32 %v3116_v2, %v3123_v47 }
0x1562   :  { %v3141_v49 = vmul.f32 1.442695, %v3136_v39 }
0x1563   :  { %v3126_v53 = vpop.xlane.xlu1 %3125 }
0x1564   :  { %6739 = vpow2.f32 %v3141_v49  ;;  %v3137_v36 = vsub.f32 %v3117_v52, %v3126_v53 }
0x1566   :  { %v3143_v60 = vmul.f32 1.442695, %v3137_v36 }
0x1567   :  { %v3129_v61 = vpop.xlane.xlu0 %3128 }
0x1568   :  { %6741 = vpow2.f32 %v3143_v60  ;;  %v3138_v6 = vsub.f32 %v3118_v8, %v3129_v61 }
0x156a   :  { %v3145_v54 = vmul.f32 1.442695, %v3138_v6 }
0x156b   :  { %v3132_v57 = vpop.xlane.xlu0 %3131 }
0x156c   :  { %6743 = vpow2.f32 %v3145_v54  ;;  %v3139_v13 = vsub.f32 %v3119_v10, %v3132_v57 }
0x156e   :  { %v3147_v45 = vmul.f32 1.442695, %v3139_v13 }
0x156f   :  { %v3135_v1 = vpop.xlane.xlu0 %3134 }
0x1570   :  { %6745 = vpow2.f32 %v3147_v45  ;;  %v3140_v15 = vsub.f32 %v3120_v38, %v3135_v1 }
0x1571   :  { %v8221_v3 = vpop.eup %6739 }
0x1572   :  { %v3149_v22 = vmul.f32 1.442695, %v3140_v15  ;;  %v3151_v2 = vsel %vm826_vm5, %v8221_v3, 0.0 }
0x1573   :  { %3152 = vadd.xlane.f32.xlu0 %v3151_v2  ;;  %v3439_v52 = vpop.xlane.xlu1 %3438 }
0x1574   :  { %6747 = vpow2.f32 %v3149_v22  ;;  %v3452_v9 = vsub.f32 %v3432_v31, %v3439_v52 }
0x1575   :  { %v8225_v14 = vpop.eup %6741 }
0x1576   :  { %v3457_v8 = vmul.f32 1.442695, %v3452_v9  ;;  %v3154_v10 = vsel %vm826_vm5, %v8225_v14, 0.0 }
0x1577   :  { %v3442_v43 = vpop.xlane.xlu0 %3441  ;;  %3155 = vadd.xlane.f32.xlu1 %v3154_v10 }
0x1578   :  { %6749 = vpow2.f32 %v3457_v8  ;;  %v3453_v38 = vsub.f32 %v3433_v55, %v3442_v43 }
0x1579   :  { %v8229_v18 = vpop.eup %6743 }
0x157a   :  { %v3459_v46 = vmul.f32 1.442695, %v3453_v38  ;;  %v3157_v19 = vsel %vm826_vm5, %v8229_v18, 0.0 }
0x157b   :  { %v3179_v4 = vpop.permute.xlu0 %3178  ;;  %3158 = vadd.xlane.f32.xlu0 %v3157_v19  ;;  %v3445_v16 = vpop.xlane.xlu1 %3444 }
0x157c   :  { %6751 = vpow2.f32 %v3459_v46  ;;  %v3454_v31 = vsub.f32 %v3434_v26, %v3445_v16  ;;  %6270 = vmatpush3.msra.mxu1 %v3179_v4 }
0x157d   :  { %v8233_v21 = vpop.eup %6745  ;;  %6271 = vmatprep.subr.mxu1 %v6863_v35 }
0x157e   :  { %v3461_v20 = vmul.f32 1.442695, %v3454_v31  ;;  %v3160_v55 = vsel %vm826_vm5, %v8233_v21, 0.0 }
0x157f   :  { %3161 = vadd.xlane.f32.xlu1 %v3160_v55  ;;  %v3501_v63 = vpop.permute.xlu1 %3500  ;;  %v5418_v55 = vld [vmem:[%s8829_s12 + $0x20] sm:$0xff] }
0x1580   :  { %6753 = vpow2.f32 %v3461_v20 }
0x1581   :  { %v8238_v23 = vpop.eup %6747 }
0x1582   :  { %v3163_v25 = vsel %vm839_vm11, %v8238_v23, 0.0 }
0x1583   :  { %3164 = vadd.xlane.f32.xlu0 %v3163_v25 }
0x1585   :  { %v8242_v29 = vpop.eup %6749 }
0x1586   :  { %v3467_v26 = vsel %vm826_vm5, %v8242_v29, 0.0 }
0x1587   :  { %3468 = vadd.xlane.f32.xlu0 %v3467_v26 }
0x1589   :  { %v8246_v56 = vpop.eup %6751 }
0x158a   :  { %v3470_v34 = vsel %vm826_vm5, %v8246_v56, 0.0 }
0x158b   :  { %3471 = vadd.xlane.f32.xlu1 %v3470_v34 }
0x158d   :  { %v8250_v42 = vpop.eup %6753 }
0x158e   :  { %v3473_v28 = vsel %vm826_vm5, %v8250_v42, 0.0 }
0x158f   :  { %3474 = vadd.xlane.f32.xlu0 %v3473_v28  ;;  %v5419_v28 = vld [vmem:[%s8829_s12 + $0x28] sm:$0xff] }
0x1590   :  { %6339 = vmatpush3.msra.mxu0 %v5419_v28 }
0x1591   :  { %6372 = vmatprep.subr.mxu0 %v6863_v35 }
0x159c   :  { %3496 = vrot.lane.b32.xlu1 %v8088_v30, %s6870_s4 }
0x15a0   :  { %3494 = vrot.lane.b32.xlu1 %v8086_v32, %s6870_s4 }
0x15a5   :  { %3498 = vrot.lane.b32.xlu0 %v8090_v12, %s6870_s4 }
0x15a9   :  { %3841 = vrot.lane.b32.xlu0 %v8094_v62, %s6871_s1 }
0x15ac   :  { %v3448_v51 = vpop.xlane.xlu0 %3447 }
0x15ad   :  { %v3455_v48 = vsub.f32 %v8210_v37, %v3448_v51  ;;  %3837 = vrot.lane.b32.xlu0 %v8088_v30, %s6871_s1 }
0x15af   :  { %v3463_v33 = vmul.f32 1.442695, %v3455_v48 }
0x15b0   :  { %v3177_v47 = vpop.permute.xlu0 %3176  ;;  %v3451_v39 = vpop.xlane.xlu1 %3450 }
0x15b1   :  { %v3456_v49 = vsub.f32 %v8213_v24, %v3451_v39  ;;  %6272 = vmatpush3.msra.mxu1 %v3177_v47  ;;  %3833 = vrot.lane.b32.xlu0 %v8084_v5, %s6871_s1  ;;  %6755 = vpow2.f32 %v3463_v33 }
0x15b2   :  { %6313 = vmatprep.subr.mxu1 %v6863_v35 }
0x15b3   :  { %v3465_v53 = vmul.f32 1.442695, %v3456_v49 }
0x15b5   :  { %3825 = vrot.lane.b32.xlu0 %v8086_v32, %s6872_s5  ;;  %6757 = vpow2.f32 %v3465_v53 }
0x15b9   :  { %3829 = vrot.lane.b32.xlu0 %v8090_v12, %s6872_s5 }
0x15bd   :  { %4026 = vrot.lane.b32.xlu0 %v8094_v62, %s8875_s9 }
0x15be   :  { %v8275_v37 = vpop.eup %6755 }
0x15bf   :  { %v3476_v24 = vsel %vm826_vm5, %v8275_v37, 0.0 }
0x15c2   :  { %v8279_v36 = vpop.eup %6757 }
0x15c3   :  { %v3479_v60 = vsel %vm839_vm11, %v8279_v36, 0.0 }
0x15c4   :  { %3477 = vadd.xlane.f32.xlu1 %v3476_v24 }
0x15c8   :  { %3480 = vadd.xlane.f32.xlu1 %v3479_v60 }
0x15d9   :  { %3492 = vrot.lane.b32.xlu1 %v8084_v5, %s6870_s4  ;;  %s8877_s4 = smov 104  }
0x15dd   :  { %3839 = vrot.lane.b32.xlu1 %v8090_v12, %s6871_s1 }
0x15e1   :  { %3835 = vrot.lane.b32.xlu1 %v8086_v32, %s6871_s1 }
0x15e5   :  { %3823 = vrot.lane.b32.xlu1 %v8084_v5, %s6872_s5 }
0x15e9   :  { %3827 = vrot.lane.b32.xlu1 %v8088_v30, %s6872_s5 }
0x15ed   :  { %3831 = vrot.lane.b32.xlu1 %v8094_v62, %s6872_s5 }
0x15f1   :  { %4024 = vrot.lane.b32.xlu1 %v8090_v12, %s8875_s9 }
0x15f5   :  { %4022 = vrot.lane.b32.xlu1 %v8088_v30, %s8875_s9 }
0x15f9   :  { %4020 = vrot.lane.b32.xlu1 %v8086_v32, %s8875_s9 }
0x15fc   :  { %v3153_v61 = vpop.xlane.xlu0 %3152 }
0x15fd   :  { %6759 = vrcp.f32 %v3153_v61 }
0x1600   :  { %v3156_v6 = vpop.xlane.xlu1 %3155 }
0x1601   :  { %6761 = vrcp.f32 %v3156_v6 }
0x1604   :  { %v3159_v54 = vpop.xlane.xlu0 %3158 }
0x1605   :  { %6763 = vrcp.f32 %v3159_v54 }
0x1608   :  { %v3162_v57 = vpop.xlane.xlu1 %3161 }
0x1609   :  { %6765 = vrcp.f32 %v3162_v57 }
0x160a   :  { %v6760_v13 = vpop.eup %6759 }
0x160b   :  { %v3171_v45 = vmul.f32 %v6760_v13, %v8221_v3 }
0x160c   :  { %v3165_v1 = vpop.xlane.xlu0 %3164 }
0x160d   :  { %6767 = vrcp.f32 %v3165_v1  ;;  %6274 = vmatmul.mubr.msk.f32.vlgmr.msra.gmra.mxu1 %vm826_vm5, %v3171_v45 }
0x160e   :  { %v6762_v15 = vpop.eup %6761  ;;  %6314 = vmatpush3.msk.msra.mxu1 %vm912_vm8, %v3501_v63  ;;  %6276 = vmatprep.mubr.msk.f32.mxu1 %vm6864_vm2, %v6863_v35 }
0x160f   :  { %v3172_v22 = vmul.f32 %v6762_v15, %v8225_v14  ;;  %6315 = vmatprep.subr.mxu1 %v6863_v35 }
0x1610   :  { %v3469_v52 = vpop.xlane.xlu0 %3468 }
0x1611   :  { %6277 = vmatmul.mubr.msk.f32.gmra.mxu1 %vm826_vm5, %v3172_v22  ;;  %6769 = vrcp.f32 %v3469_v52 }
0x1612   :  { %v6764_v2 = vpop.eup %6763  ;;  %6279 = vmatprep.mubr.msk.f32.mxu1 %vm6864_vm2, %v6863_v35 }
0x1613   :  { %v3173_v3 = vmul.f32 %v6764_v2, %v8229_v18 }
0x1614   :  { %v3472_v9 = vpop.xlane.xlu1 %3471 }
0x1615   :  { %6280 = vmatmul.mubr.msk.f32.gmra.mxu1 %vm826_vm5, %v3173_v3  ;;  %6771 = vrcp.f32 %v3472_v9 }
0x1616   :  { %v6766_v8 = vpop.eup %6765  ;;  %6282 = vmatprep.mubr.msk.f32.mxu1 %vm6864_vm2, %v6863_v35 }
0x1617   :  { %v3174_v14 = vmul.f32 %v6766_v8, %v8233_v21 }
0x1618   :  { %v3475_v10 = vpop.xlane.xlu0 %3474  ;;  %v3497_v38 = vpop.permute.xlu1 %3496 }
0x1619   :  { %6283 = vmatmul.mubr.msk.f32.gmra.mxu1 %vm826_vm5, %v3174_v14  ;;  %6773 = vrcp.f32 %v3475_v10 }
0x161a   :  { %v6768_v43 = vpop.eup %6767  ;;  %6285 = vmatprep.mubr.msk.f32.mxu1 %vm6864_vm2, %v6863_v35 }
0x161b   :  { %v3175_v18 = vmul.f32 %v6768_v43, %v8238_v23 }
0x161c   :  { %v3499_v46 = vpop.permute.xlu0 %3498  ;;  %v3495_v19 = vpop.permute.xlu1 %3494 }
0x161d   :  { %6286 = vmatmul.mubr.msk.f32.gmra.mxu1 %vm826_vm5, %v3175_v18 }
0x161e   :  { %6316 = vmatpush3.msra.mxu1 %v3499_v46  ;;  %6323 = vmatprep.mubr.msk.f32.mxu1 %vm6864_vm2, %v6863_v35  ;;  %v6770_v31 = vpop.eup %6769 }
0x161f   :  { %6317 = vmatprep.subr.mxu1 %v6863_v35  ;;  %v3487_v21 = vmul.f32 %v6770_v31, %v8242_v29 }
0x1620   :  { %6318 = vmatpush3.msra.mxu1 %v3497_v38  ;;  %v3842_v48 = vpop.permute.xlu0 %3841 }
0x1621   :  { %6319 = vmatprep.subr.mxu1 %v6863_v35 }
0x1622   :  { %6320 = vmatpush3.msra.mxu1 %v3495_v19  ;;  %v6772_v23 = vpop.eup %6771 }
0x1623   :  { %6321 = vmatprep.subr.mxu1 %v6863_v35  ;;  %v3488_v25 = vmul.f32 %v6772_v23, %v8246_v56 }
0x1624   :  { %v3838_v47 = vpop.permute.xlu0 %3837 }
0x1626   :  { %v6774_v29 = vpop.eup %6773 }
0x1627   :  { %v3489_v26 = vmul.f32 %v6774_v29, %v8250_v42 }
0x1628   :  { %v8357_v49 = vpop.permute.xlu0 %3833 }
0x164d   :  { %v3478_v4 = vpop.xlane.xlu1 %3477 }
0x164e   :  { %6775 = vrcp.f32 %v3478_v4 }
0x1651   :  { %v3481_v16 = vpop.xlane.xlu1 %3480 }
0x1652   :  { %6777 = vrcp.f32 %v3481_v16 }
0x1655   :  { %v3493_v20 = vpop.permute.xlu1 %3492 }
0x1656   :  { %6322 = vmatpush3.msra.mxu1 %v3493_v20 }
0x1657   :  { %6324 = vmatmul.mubr.msk.f32.vlgmr.msra.gmra.mxu1 %vm826_vm5, %v3487_v21  ;;  %6355 = vmatprep.subr.mxu1 %v6863_v35 }
0x1658   :  { %6326 = vmatprep.mubr.msk.f32.mxu1 %vm6864_vm2, %v6863_v35  ;;  %6356 = vmatpush3.msra.mxu1 %v5418_v55 }
0x1659   :  { %6397 = vmatprep.subr.mxu1 %v6863_v35  ;;  %v3840_v51 = vpop.permute.xlu1 %3839 }
0x165b   :  { %6327 = vmatmul.mubr.msk.f32.gmra.mxu1 %vm826_vm5, %v3488_v25  ;;  %v6776_v34 = vpop.eup %6775 }
0x165c   :  { %6329 = vmatprep.mubr.msk.f32.mxu1 %vm6864_vm2, %v6863_v35  ;;  %v3490_v56 = vmul.f32 %v6776_v34, %v8275_v37  ;;  %v8361_v37 = vpop.permute.xlu0 %3825 }
0x165d   :  { %v3836_v33 = vpop.permute.xlu1 %3835 }
0x165f   :  { %6330 = vmatmul.mubr.msk.f32.gmra.mxu1 %vm826_vm5, %v3489_v26  ;;  %v6778_v63 = vpop.eup %6777 }
0x1660   :  { %6332 = vmatprep.mubr.msk.f32.mxu1 %vm6864_vm2, %v6863_v35  ;;  %v3491_v42 = vmul.f32 %v6778_v63, %v8279_v36  ;;  %v8365_v36 = vpop.permute.xlu0 %3829 }
0x1661   :  { %v8355_v39 = vpop.permute.xlu1 %3823 }
0x1663   :  { %6333 = vmatmul.mubr.msk.f32.gmra.mxu1 %vm826_vm5, %v3490_v56 }
0x1664   :  { %6335 = vmatprep.mubr.msk.f32.mxu1 %vm6864_vm2, %v6863_v35  ;;  %v4027_v6 = vpop.permute.xlu0 %4026 }
0x1665   :  { %v8359_v53 = vpop.permute.xlu1 %3827 }
0x1667   :  { %6336 = vmatmul.mubr.msk.f32.gmra.mxu1 %vm826_vm5, %v3491_v42 }
0x1668   :  { %6357 = vmatprep.mubr.msk.f32.mxu1 %vm6864_vm2, %v6863_v35 }
0x1669   :  { %v8363_v24 = vpop.permute.xlu1 %3831 }
0x166d   :  { %v4025_v60 = vpop.permute.xlu1 %4024 }
0x1671   :  { %v4023_v54 = vpop.permute.xlu1 %4022 }
0x1675   :  { %v4021_v1 = vpop.permute.xlu1 %4020 }
0x16cd   :  { %v3273_v61 = vpop.f32.mrf.mxu1 }
0x16ce   :  { %6358 = vmatmul.mubr.msk.f32.vlgmr.msra.gmra.mxu1 %vm705_vm7, %v3273_v61 }
0x16cf   :  { %6398 = vmatpush3.msk.msra.mxu1 %vm912_vm8, %v4027_v6  ;;  %v6275_v57 = vpop.f32.mrf.mxu1  ;;  %6360 = vmatprep.mubr.msk.f32.mxu1 %vm6864_vm2, %v6863_v35 }
0x16d0   :  { %6399 = vmatprep.subr.mxu1 %v6863_v35 }
0x16d1   :  { %6400 = vmatpush3.msra.mxu1 %v4025_v60  ;;  %v3278_v13 = vpop.f32.mrf.mxu1 }
0x16d2   :  { %6401 = vmatprep.subr.mxu1 %v6863_v35  ;;  %6361 = vmatmul.mubr.msk.f32.gmra.mxu1 %vm705_vm7, %v3278_v13 }
0x16d3   :  { %6402 = vmatpush3.msra.mxu1 %v4023_v54  ;;  %v6278_v45 = vpop.f32.mrf.mxu1  ;;  %6363 = vmatprep.mubr.msk.f32.mxu1 %vm6864_vm2, %v6863_v35 }
0x16d4   :  { %6403 = vmatprep.subr.mxu1 %v6863_v35 }
0x16d5   :  { %6404 = vmatpush3.msra.mxu1 %v4021_v1  ;;  %v3283_v15 = vpop.f32.mrf.mxu1 }
0x16d6   :  { %6364 = vmatmul.mubr.msk.f32.gmra.mxu1 %vm705_vm7, %v3283_v15  ;;  %6405 = vmatprep.subr.mxu1 %v6863_v35 }
0x16d7   :  { %v6281_v22 = vpop.f32.mrf.mxu1  ;;  %6366 = vmatprep.mubr.msk.f32.mxu1 %vm6864_vm2, %v6863_v35 }
0x16d9   :  { %v3288_v2 = vpop.f32.mrf.mxu1 }
0x16da   :  { %6367 = vmatmul.mubr.msk.f32.gmra.mxu1 %vm705_vm7, %v3288_v2 }
0x16db   :  { %v6284_v3 = vpop.f32.mrf.mxu1  ;;  %6369 = vmatprep.mubr.msk.f32.mxu1 %vm6864_vm2, %v6863_v35 }
0x16dd   :  { %v3293_v52 = vpop.f32.mrf.mxu1 }
0x16de   :  { %6370 = vmatmul.mubr.msk.f32.gmra.mxu1 %vm705_vm7, %v3293_v52 }
0x16df   :  { %v6287_v9 = vpop.f32.mrf.mxu1  ;;  %6407 = vmatprep.mubr.msk.f32.mxu1 %vm6864_vm2, %v6863_v35 }
0x1717   :  { %v3589_v8 = vpop.f32.mrf.mxu1 }
0x1718   :  { %6341 = vmatmul.mubr.msk.f32.vlgmr.msra.gmra.mxu0 %vm705_vm7, %v3589_v8 }
0x1719   :  { %6373 = vmatpush3.xpose.msk.msra.mxu0 %vm705_vm7, %v3842_v48  ;;  %v6325_v14 = vpop.f32.mrf.mxu1  ;;  %6343 = vmatprep.mubr.msk.f32.mxu0 %vm6864_vm2, %v6863_v35 }
0x171a   :  { %6374 = vmatprep.subr.mxu0 %v6863_v35 }
0x171b   :  { %v3594_v10 = vpop.f32.mrf.mxu1 }
0x171c   :  { %6344 = vmatmul.mubr.msk.f32.gmra.mxu0 %vm705_vm7, %v3594_v10 }
0x171d   :  { %6375 = vmatpush3.xpose.msk.msra.mxu0 %vm705_vm7, %v3840_v51  ;;  %v6328_v43 = vpop.f32.mrf.mxu1  ;;  %6346 = vmatprep.mubr.msk.f32.mxu0 %vm6864_vm2, %v6863_v35 }
0x171e   :  { %6376 = vmatprep.subr.mxu0 %v6863_v35 }
0x171f   :  { %v3599_v38 = vpop.f32.mrf.mxu1 }
0x1720   :  { %6347 = vmatmul.mubr.msk.f32.gmra.mxu0 %vm705_vm7, %v3599_v38 }
0x1721   :  { %6377 = vmatpush3.xpose.msk.msra.mxu0 %vm705_vm7, %v3838_v47  ;;  %v6331_v18 = vpop.f32.mrf.mxu1  ;;  %6349 = vmatprep.mubr.msk.f32.mxu0 %vm6864_vm2, %v6863_v35 }
0x1722   :  { %6378 = vmatprep.subr.mxu0 %v6863_v35 }
0x1723   :  { %v3604_v46 = vpop.f32.mrf.mxu1 }
0x1724   :  { %6350 = vmatmul.mubr.msk.f32.gmra.mxu0 %vm705_vm7, %v3604_v46 }
0x1725   :  { %6379 = vmatpush3.xpose.msk.msra.mxu0 %vm705_vm7, %v3836_v33  ;;  %v6334_v19 = vpop.f32.mrf.mxu1  ;;  %6352 = vmatprep.mubr.msk.f32.mxu0 %vm6864_vm2, %v6863_v35 }
0x1726   :  { %6380 = vmatprep.subr.mxu0 %v6863_v35 }
0x1727   :  { %v3609_v4 = vpop.f32.mrf.mxu1 }
0x1728   :  { %6353 = vmatmul.mubr.msk.f32.gmra.mxu0 %vm705_vm7, %v3609_v4 }
0x1729   :  { %6381 = vmatpush3.xpose.msk.msra.mxu0 %vm705_vm7, %v8357_v49  ;;  %v6337_v16 = vpop.f32.mrf.mxu1  ;;  %6382 = vmatprep.mubr.msk.f32.mxu0 %vm6864_vm2, %v6863_v35 }
0x172a   :  { %6422 = vmatprep.subr.mxu0 %v6863_v35 }
0x172c   :  { %6383 = vmatmul.mubr.msk.f32.vlgmr.msra.gmra.mxu0 %vm705_vm7, %v8355_v39 }
0x172d   :  { %6385 = vmatprep.mubr.msk.f32.mxu0 %vm6864_vm2, %v6863_v35 }
0x1730   :  { %6386 = vmatmul.mubr.msk.f32.gmra.mxu0 %vm705_vm7, %v8361_v37 }
0x1731   :  { %6388 = vmatprep.mubr.msk.f32.mxu0 %vm6864_vm2, %v6863_v35 }
0x1734   :  { %6389 = vmatmul.mubr.msk.f32.gmra.mxu0 %vm705_vm7, %v8359_v53 }
0x1735   :  { %6391 = vmatprep.mubr.msk.f32.mxu0 %vm6864_vm2, %v6863_v35 }
0x1738   :  { %6392 = vmatmul.mubr.msk.f32.gmra.mxu0 %vm705_vm7, %v8365_v36 }
0x1739   :  { %6394 = vmatprep.mubr.msk.f32.mxu0 %vm6864_vm2, %v6863_v35 }
0x173c   :  { %6395 = vmatmul.mubr.msk.f32.gmra.mxu0 %vm705_vm7, %v8363_v24 }
0x173d   :  { %6424 = vmatprep.mubr.msk.f32.mxu0 %vm6864_vm2, %v6863_v35 }
0x178e   :  { %v8433_v31 = vpop.f32.mrf.mxu1 }
0x1790   :  { %v6359_v21 = vpop.f32.mrf.mxu1 }
0x1792   :  { %v8435_v20 = vpop.f32.mrf.mxu1 }
0x1794   :  { %v6362_v55 = vpop.f32.mrf.mxu1 }
0x1796   :  { %v8437_v23 = vpop.f32.mrf.mxu1 }
0x1798   :  { %v6365_v25 = vpop.f32.mrf.mxu1 }
0x179a   :  { %v8439_v29 = vpop.f32.mrf.mxu1 }
0x179c   :  { %v6368_v26 = vpop.f32.mrf.mxu1 }
0x179e   :  { %v8441_v34 = vpop.f32.mrf.mxu1 }
0x17a0   :  { %v6371_v28 = vpop.f32.mrf.mxu1 }
0x17d8   :  { %v8443_v56 = vpop.f32.mrf.mxu0 }
0x17da   :  { %v6342_v63 = vpop.f32.mrf.mxu0 }
0x17dc   :  { %v8445_v42 = vpop.f32.mrf.mxu0 }
0x17de   :  { %v6345_v51 = vpop.f32.mrf.mxu0 }
0x17e0   :  { %v8447_v48 = vpop.f32.mrf.mxu0 }
0x17e2   :  { %v6348_v33 = vpop.f32.mrf.mxu0 }
0x17e4   :  { %v8449_v47 = vpop.f32.mrf.mxu0 }
0x17e6   :  { %v6351_v39 = vpop.f32.mrf.mxu0 }
0x17e8   :  { %v8451_v49 = vpop.f32.mrf.mxu0 }
0x17ea   :  { %v6354_v53 = vpop.f32.mrf.mxu0 }
0x17ec   :  { %v3929_v37 = vpop.f32.mrf.mxu0 }
0x17ed   :  { %v3953_v24 = vmul.f32 0.35355338, %v3929_v37 }
0x17ee   :  { %v6384_v36 = vpop.f32.mrf.mxu0 }
0x17ef   :  { %v3958_v60 = vadd.f32 %v3953_v24, %v7359_v44 }
0x17f0   :  { %v3934_v61 = vpop.f32.mrf.mxu0 }
0x17f1   :  { %v3954_v6 = vmul.f32 0.35355338, %v3934_v61  ;;  %v3963_v54 = vsel %vm826_vm5, %v3958_v60, -inf }
0x17f2   :  { %3964 = vmax.xlane.f32.xlu0 %v3963_v54  ;;  %v6387_v57 = vpop.f32.mrf.mxu0 }
0x17f3   :  { %v3959_v13 = vadd.f32 %v3954_v6, %v7359_v44 }
0x17f4   :  { %v3939_v45 = vpop.f32.mrf.mxu0 }
0x17f5   :  { %v3955_v1 = vmul.f32 0.35355338, %v3939_v45  ;;  %v3966_v15 = vsel %vm826_vm5, %v3959_v13, -inf }
0x17f6   :  { %3967 = vmax.xlane.f32.xlu1 %v3966_v15  ;;  %v6390_v22 = vpop.f32.mrf.mxu0 }
0x17f7   :  { %v3960_v2 = vadd.f32 %v3955_v1, %v7378_v58 }
0x17f8   :  { %v3944_v3 = vpop.f32.mrf.mxu0 }
0x17f9   :  { %v3956_v52 = vmul.f32 0.35355338, %v3944_v3  ;;  %v3969_v9 = vsel %vm826_vm5, %v3960_v2, -inf }
0x17fa   :  { %3970 = vmax.xlane.f32.xlu0 %v3969_v9  ;;  %v6393_v8 = vpop.f32.mrf.mxu0 }
0x17fb   :  { %v3961_v14 = vadd.f32 %v3956_v52, %v7387_v0 }
0x17fc   :  { %v3949_v10 = vpop.f32.mrf.mxu0 }
0x17fd   :  { %v3957_v43 = vmul.f32 0.35355338, %v3949_v10  ;;  %v3972_v38 = vsel %vm826_vm5, %v3961_v14, -inf }
0x17fe   :  { %3973 = vmax.xlane.f32.xlu0 %v3972_v38  ;;  %v6396_v18 = vpop.f32.mrf.mxu0 }
0x17ff   :  { %v3962_v46 = vadd.f32 %v3957_v43, %v7394_v7 }
0x1801   :  { %v3975_v19 = vsel %vm839_vm11, %v3962_v46, -inf }
0x1802   :  { %3976 = vmax.xlane.f32.xlu0 %v3975_v19 }
0x1807   :  { %4267 = vrot.lane.b32.xlu1 %v8094_v62, %s8876_s8 }
0x1818   :  { %4018 = vrot.lane.b32.xlu0 %v8084_v5, %s8875_s9 }
0x187b   :  { %v3965_v4 = vpop.xlane.xlu0 %3964 }
0x187c   :  { %v3978_v16 = vsub.f32 %v3958_v60, %v3965_v4 }
0x187e   :  { %v3983_v21 = vmul.f32 1.442695, %v3978_v16 }
0x187f   :  { %v3968_v55 = vpop.xlane.xlu1 %3967 }
0x1880   :  { %6779 = vpow2.f32 %v3983_v21  ;;  %v3979_v25 = vsub.f32 %v3959_v13, %v3968_v55 }
0x1882   :  { %v3985_v26 = vmul.f32 1.442695, %v3979_v25 }
0x1883   :  { %v3971_v28 = vpop.xlane.xlu0 %3970  ;;  %v4268_v3 = vpop.permute.xlu1 %4267 }
0x1884   :  { %6781 = vpow2.f32 %v3985_v26  ;;  %v3980_v36 = vsub.f32 %v3960_v2, %v3971_v28  ;;  %v5420_v28 = vld [vmem:[%s8829_s12 + $0x30] sm:$0xff] }
0x1885   :  { %6423 = vmatpush3.msra.mxu0 %v5420_v28 }
0x1886   :  { %v3987_v60 = vmul.f32 1.442695, %v3980_v36  ;;  %6464 = vmatprep.subr.mxu0 %v6863_v35 }
0x1887   :  { %v3974_v63 = vpop.xlane.xlu0 %3973 }
0x1888   :  { %v3981_v61 = vsub.f32 %v3961_v14, %v3974_v63  ;;  %6783 = vpow2.f32 %v3987_v60 }
0x188a   :  { %v3989_v6 = vmul.f32 1.442695, %v3981_v61 }
0x188b   :  { %v3977_v51 = vpop.xlane.xlu0 %3976 }
0x188c   :  { %6785 = vpow2.f32 %v3989_v6  ;;  %v3982_v1 = vsub.f32 %v3962_v46, %v3977_v51 }
0x188d   :  { %v6780_v33 = vpop.eup %6779 }
0x188e   :  { %v3993_v39 = vsel %vm826_vm5, %v6780_v33, 0.0  ;;  %v3991_v15 = vmul.f32 1.442695, %v3982_v1 }
0x188f   :  { %3994 = vadd.xlane.f32.xlu1 %v3993_v39  ;;  %v4019_v53 = vpop.permute.xlu0 %4018 }
0x1890   :  { %6406 = vmatpush3.msra.mxu1 %v4019_v53  ;;  %6787 = vpow2.f32 %v3991_v15 }
0x1891   :  { %v6782_v37 = vpop.eup %6781  ;;  %6439 = vmatprep.subr.mxu1 %v6863_v35 }
0x1892   :  { %v3996_v24 = vsel %vm826_vm5, %v6782_v37, 0.0 }
0x1893   :  { %3997 = vadd.xlane.f32.xlu0 %v3996_v24 }
0x1895   :  { %v6784_v54 = vpop.eup %6783 }
0x1896   :  { %v3999_v57 = vsel %vm826_vm5, %v6784_v54, 0.0 }
0x1899   :  { %v6786_v13 = vpop.eup %6785 }
0x189a   :  { %v4002_v45 = vsel %vm826_vm5, %v6786_v13, 0.0 }
0x189d   :  { %v6788_v22 = vpop.eup %6787 }
0x189e   :  { %v4005_v2 = vsel %vm839_vm11, %v6788_v22, 0.0 }
0x18a0   :  { %4263 = vrot.lane.b32.xlu1 %v8088_v30, %s8876_s8 }
0x18a9   :  { %4265 = vrot.lane.b32.xlu0 %v8090_v12, %s8876_s8 }
0x18c4   :  { %4000 = vadd.xlane.f32.xlu1 %v3999_v57 }
0x18c8   :  { %4003 = vadd.xlane.f32.xlu0 %v4002_v45 }
0x18d5   :  { %4259 = vrot.lane.b32.xlu1 %v8084_v5, %s8876_s8 }
0x18de   :  { %4261 = vrot.lane.b32.xlu0 %v8086_v32, %s8876_s8 }
0x18e2   :  { %4249 = vrot.lane.b32.xlu0 %v8084_v5, %s8877_s4 }
0x18e6   :  { %4253 = vrot.lane.b32.xlu0 %v8088_v30, %s8877_s4 }
0x18ea   :  { %4257 = vrot.lane.b32.xlu0 %v8094_v62, %s8877_s4 }
0x18f9   :  { %4006 = vadd.xlane.f32.xlu1 %v4005_v2 }
0x190a   :  { %4251 = vrot.lane.b32.xlu1 %v8086_v32, %s8877_s4 }
0x190e   :  { %4255 = vrot.lane.b32.xlu1 %v8090_v12, %s8877_s4 }
0x1918   :  { %v3995_v52 = vpop.xlane.xlu1 %3994 }
0x1919   :  { %6789 = vrcp.f32 %v3995_v52 }
0x191c   :  { %v3998_v9 = vpop.xlane.xlu0 %3997  ;;  %v4264_v18 = vpop.permute.xlu1 %4263 }
0x191d   :  { %6791 = vrcp.f32 %v3998_v9 }
0x1920   :  { %v4266_v38 = vpop.permute.xlu0 %4265 }
0x1926   :  { %v6790_v8 = vpop.eup %6789 }
0x1927   :  { %v4013_v14 = vmul.f32 %v6790_v8, %v6780_v33 }
0x1929   :  { %6408 = vmatmul.mubr.msk.f32.vlgmr.msra.gmra.mxu1 %vm826_vm5, %v4013_v14 }
0x192a   :  { %v6792_v10 = vpop.eup %6791  ;;  %6440 = vmatpush3.xpose.msk.msra.mxu1 %vm705_vm7, %v4268_v3  ;;  %6410 = vmatprep.mubr.msk.f32.mxu1 %vm6864_vm2, %v6863_v35 }
0x192b   :  { %6441 = vmatprep.subr.mxu1 %v6863_v35  ;;  %v4014_v43 = vmul.f32 %v6792_v10, %v6782_v37 }
0x192d   :  { %6411 = vmatmul.mubr.msk.f32.gmra.mxu1 %vm826_vm5, %v4014_v43 }
0x192e   :  { %6442 = vmatpush3.xpose.msk.msra.mxu1 %vm705_vm7, %v4266_v38  ;;  %6413 = vmatprep.mubr.msk.f32.mxu1 %vm6864_vm2, %v6863_v35 }
0x192f   :  { %6443 = vmatprep.subr.mxu1 %v6863_v35 }
0x1932   :  { %6444 = vmatpush3.xpose.msk.msra.mxu1 %vm705_vm7, %v4264_v18 }
0x1933   :  { %6445 = vmatprep.subr.mxu1 %v6863_v35 }
0x194d   :  { %v4001_v46 = vpop.xlane.xlu1 %4000 }
0x194e   :  { %6793 = vrcp.f32 %v4001_v46 }
0x1951   :  { %v4004_v19 = vpop.xlane.xlu0 %4003  ;;  %v4260_v16 = vpop.permute.xlu1 %4259 }
0x1952   :  { %6795 = vrcp.f32 %v4004_v19 }
0x1955   :  { %v4262_v4 = vpop.permute.xlu0 %4261 }
0x1956   :  { %6446 = vmatpush3.xpose.msk.msra.mxu1 %vm705_vm7, %v4262_v4 }
0x1957   :  { %6447 = vmatprep.subr.mxu1 %v6863_v35 }
0x1959   :  { %v4250_v39 = vpop.permute.xlu0 %4249 }
0x195a   :  { %6448 = vmatpush3.xpose.msk.msra.mxu1 %vm705_vm7, %v4260_v16 }
0x195b   :  { %v6794_v21 = vpop.eup %6793  ;;  %6489 = vmatprep.subr.mxu1 %v6863_v35 }
0x195c   :  { %v4015_v55 = vmul.f32 %v6794_v21, %v6784_v54 }
0x195d   :  { %v4254_v37 = vpop.permute.xlu0 %4253 }
0x195e   :  { %6414 = vmatmul.mubr.msk.f32.gmra.mxu1 %vm826_vm5, %v4015_v55 }
0x195f   :  { %v6796_v25 = vpop.eup %6795  ;;  %6416 = vmatprep.mubr.msk.f32.mxu1 %vm6864_vm2, %v6863_v35 }
0x1960   :  { %v4016_v26 = vmul.f32 %v6796_v25, %v6786_v13 }
0x1961   :  { %v4258_v36 = vpop.permute.xlu0 %4257 }
0x1962   :  { %6417 = vmatmul.mubr.msk.f32.gmra.mxu1 %vm826_vm5, %v4016_v26 }
0x1963   :  { %6419 = vmatprep.mubr.msk.f32.mxu1 %vm6864_vm2, %v6863_v35 }
0x1982   :  { %v4007_v63 = vpop.xlane.xlu1 %4006 }
0x1983   :  { %6797 = vrcp.f32 %v4007_v63 }
0x1986   :  { %v4252_v53 = vpop.permute.xlu1 %4251 }
0x198a   :  { %v4256_v24 = vpop.permute.xlu1 %4255 }
0x1990   :  { %v6798_v51 = vpop.eup %6797 }
0x1991   :  { %v4017_v33 = vmul.f32 %v6798_v51, %v6788_v22 }
0x1993   :  { %6420 = vmatmul.mubr.msk.f32.gmra.mxu1 %vm826_vm5, %v4017_v33 }
0x1994   :  { %6449 = vmatprep.mubr.msk.f32.mxu1 %vm6864_vm2, %v6863_v35 }
0x1997   :  { %6450 = vmatmul.mubr.msk.f32.vlgmr.msra.gmra.mxu1 %vm705_vm7, %v4250_v39 }
0x1998   :  { %6452 = vmatprep.mubr.msk.f32.mxu1 %vm6864_vm2, %v6863_v35 }
0x199b   :  { %6453 = vmatmul.mubr.msk.f32.gmra.mxu1 %vm705_vm7, %v4252_v53 }
0x199c   :  { %6455 = vmatprep.mubr.msk.f32.mxu1 %vm6864_vm2, %v6863_v35 }
0x199f   :  { %6456 = vmatmul.mubr.msk.f32.gmra.mxu1 %vm705_vm7, %v4254_v37 }
0x19a0   :  { %6458 = vmatprep.mubr.msk.f32.mxu1 %vm6864_vm2, %v6863_v35 }
0x19a3   :  { %6459 = vmatmul.mubr.msk.f32.gmra.mxu1 %vm705_vm7, %v4256_v24 }
0x19a4   :  { %6461 = vmatprep.mubr.msk.f32.mxu1 %vm6864_vm2, %v6863_v35 }
0x19a7   :  { %6462 = vmatmul.mubr.msk.f32.gmra.mxu1 %vm705_vm7, %v4258_v36  ;;  %v3805_v36 = vadd.f32 %v8435_v20, %v8445_v42 }
0x19a8   :  { %6491 = vmatprep.mubr.msk.f32.mxu1 %vm6864_vm2, %v6863_v35 }
0x19e9   :  { %v4115_v60 = vpop.f32.mrf.mxu1 }
0x19ea   :  { %6425 = vmatmul.mubr.msk.f32.vlgmr.msra.gmra.mxu0 %vm705_vm7, %v4115_v60 }
0x19eb   :  { %v6409_v61 = vpop.f32.mrf.mxu1  ;;  %6427 = vmatprep.mubr.msk.f32.mxu0 %vm6864_vm2, %v6863_v35 }
0x19ed   :  { %v4120_v6 = vpop.f32.mrf.mxu1 }
0x19ee   :  { %6428 = vmatmul.mubr.msk.f32.gmra.mxu0 %vm705_vm7, %v4120_v6  ;;  %v3810_v6 = vadd.f32 %v8437_v23, %v8447_v48 }
0x19ef   :  { %v6412_v54 = vpop.f32.mrf.mxu1  ;;  %6430 = vmatprep.mubr.msk.f32.mxu0 %vm6864_vm2, %v6863_v35 }
0x1a1e   :  { %v4125_v57 = vpop.f32.mrf.mxu1 }
0x1a1f   :  { %6431 = vmatmul.mubr.msk.f32.gmra.mxu0 %vm705_vm7, %v4125_v57 }
0x1a20   :  { %v6415_v13 = vpop.f32.mrf.mxu1  ;;  %6433 = vmatprep.mubr.msk.f32.mxu0 %vm6864_vm2, %v6863_v35 }
0x1a22   :  { %v4130_v45 = vpop.f32.mrf.mxu1 }
0x1a23   :  { %6434 = vmatmul.mubr.msk.f32.gmra.mxu0 %vm705_vm7, %v4130_v45 }
0x1a24   :  { %v6418_v1 = vpop.f32.mrf.mxu1  ;;  %6436 = vmatprep.mubr.msk.f32.mxu0 %vm6864_vm2, %v6863_v35 }
0x1a53   :  { %v4135_v15 = vpop.f32.mrf.mxu1 }
0x1a54   :  { %6437 = vmatmul.mubr.msk.f32.gmra.mxu0 %vm705_vm7, %v4135_v15 }
0x1a55   :  { %v6421_v22 = vpop.f32.mrf.mxu1  ;;  %6474 = vmatprep.mubr.msk.f32.mxu0 %vm6864_vm2, %v6863_v35 }
0x1a57   :  { %v4355_v2 = vpop.f32.mrf.mxu1 }
0x1a58   :  { %v4379_v3 = vmul.f32 0.35355338, %v4355_v2 }
0x1a59   :  { %v6451_v52 = vpop.f32.mrf.mxu1 }
0x1a5a   :  { %v4384_v9 = vadd.f32 %v4379_v3, %v7359_v44 }
0x1a5b   :  { %v4360_v8 = vpop.f32.mrf.mxu1 }
0x1a5c   :  { %v4380_v14 = vmul.f32 0.35355338, %v4360_v8  ;;  %v4389_v10 = vsel %vm826_vm5, %v4384_v9, -inf }
0x1a5d   :  { %4390 = vmax.xlane.f32.xlu1 %v4389_v10  ;;  %v6454_v43 = vpop.f32.mrf.mxu1 }
0x1a5e   :  { %v4385_v38 = vadd.f32 %v4380_v14, %v7359_v44 }
0x1a5f   :  { %v4365_v18 = vpop.f32.mrf.mxu1 }
0x1a60   :  { %v4381_v46 = vmul.f32 0.35355338, %v4365_v18  ;;  %v4392_v19 = vsel %vm826_vm5, %v4385_v38, -inf }
0x1a61   :  { %4393 = vmax.xlane.f32.xlu0 %v4392_v19  ;;  %v6457_v4 = vpop.f32.mrf.mxu1 }
0x1a62   :  { %v4386_v16 = vadd.f32 %v4381_v46, %v7378_v58  ;;  %v3800_v58 = vadd.f32 %v8433_v31, %v8443_v56  ;;  %v3815_v31 = vadd.f32 %v8439_v29, %v8449_v47 }
0x1a63   :  { %v4370_v21 = vpop.f32.mrf.mxu1 }
0x1a64   :  { %v4382_v55 = vmul.f32 0.35355338, %v4370_v21  ;;  %v4395_v25 = vsel %vm826_vm5, %v4386_v16, -inf }
0x1a65   :  { %4396 = vmax.xlane.f32.xlu0 %v4395_v25  ;;  %v6460_v26 = vpop.f32.mrf.mxu1 }
0x1a66   :  { %v4387_v28 = vadd.f32 %v4382_v55, %v7387_v0  ;;  %v3820_v26 = vadd.f32 %v8441_v34, %v8451_v49  ;;  %v5421_v34 = vld [vmem:[%s8829_s12 + $0x38] sm:$0xff] }
0x1a67   :  { %v4375_v63 = vpop.f32.mrf.mxu1  ;;  %6490 = vmatpush3.msra.mxu1 %v5421_v34 }
0x1a68   :  { %v4383_v51 = vmul.f32 0.35355338, %v4375_v63  ;;  %v4398_v44 = vsel %vm826_vm5, %v4387_v28, -inf  ;;  %6529 = vmatprep.subr.mxu1 %v6863_v35 }
0x1a69   :  { %4399 = vmax.xlane.f32.xlu0 %v4398_v44  ;;  %v6463_v33 = vpop.f32.mrf.mxu1 }
0x1a6a   :  { %v4388_v39 = vadd.f32 %v4383_v51, %v7394_v7 }
0x1a6c   :  { %v4401_v53 = vsel %vm839_vm11, %v4388_v39, -inf }
0x1a6d   :  { %4402 = vmax.xlane.f32.xlu1 %v4401_v53 }
0x1a7e   :  { %4452 = vrot.lane.b32.xlu1 %v8094_v62, %s8878_s28 }
0x1aaa   :  { %v4220_v37 = vpop.f32.mrf.mxu0 }
0x1aab   :  { %v8564_v24 = vadd.f32 %v4220_v37, %v3800_v58 }
0x1aac   :  { %v6426_v0 = vpop.f32.mrf.mxu0 }
0x1aae   :  { %v4225_v60 = vpop.f32.mrf.mxu0 }
0x1aaf   :  { %v8568_v61 = vadd.f32 %v4225_v60, %v3805_v36 }
0x1ab0   :  { %v6429_v7 = vpop.f32.mrf.mxu0 }
0x1adf   :  { %v4230_v54 = vpop.f32.mrf.mxu0 }
0x1ae0   :  { %v8572_v57 = vadd.f32 %v4230_v54, %v3810_v6 }
0x1ae1   :  { %v6432_v62 = vpop.f32.mrf.mxu0 }
0x1ae3   :  { %v4235_v56 = vpop.f32.mrf.mxu0 }
0x1ae4   :  { %v8576_v13 = vadd.f32 %v4235_v56, %v3815_v31 }
0x1ae5   :  { %v6435_v45 = vpop.f32.mrf.mxu0 }
0x1ae6   :  { %v4391_v1 = vpop.xlane.xlu1 %4390 }
0x1ae7   :  { %v4404_v20 = vsub.f32 %v4384_v9, %v4391_v1 }
0x1ae9   :  { %v4409_v42 = vmul.f32 1.442695, %v4404_v20 }
0x1aea   :  { %v4394_v15 = vpop.xlane.xlu0 %4393 }
0x1aeb   :  { %6799 = vpow2.f32 %v4409_v42  ;;  %v4405_v22 = vsub.f32 %v4385_v38, %v4394_v15 }
0x1aed   :  { %v4411_v2 = vmul.f32 1.442695, %v4405_v22 }
0x1aee   :  { %v4397_v3 = vpop.xlane.xlu0 %4396 }
0x1aef   :  { %6801 = vpow2.f32 %v4411_v2  ;;  %v4406_v23 = vsub.f32 %v4386_v16, %v4397_v3 }
0x1af1   :  { %v4413_v48 = vmul.f32 1.442695, %v4406_v23 }
0x1af2   :  { %v4400_v52 = vpop.xlane.xlu0 %4399 }
0x1af3   :  { %6803 = vpow2.f32 %v4413_v48  ;;  %v4407_v8 = vsub.f32 %v4387_v28, %v4400_v52 }
0x1af5   :  { %v4415_v14 = vmul.f32 1.442695, %v4407_v8  ;;  %v5507_v8 = vld [vmem:[%s8830_s13 + $0x1] ss:$0 sm:$0xff] }
0x1af6   :  { %v4403_v29 = vpop.xlane.xlu1 %4402 }
0x1af7   :  { %6805 = vpow2.f32 %v4415_v14  ;;  %v4408_v47 = vsub.f32 %v4388_v39, %v4403_v29 }
0x1af8   :  { %v6800_v10 = vpop.eup %6799 }
0x1af9   :  { %v4417_v43 = vmul.f32 1.442695, %v4408_v47  ;;  %v4419_v9 = vsel %vm826_vm5, %v6800_v10, 0.0 }
0x1afa   :  { %4420 = vadd.xlane.f32.xlu0 %v4419_v9  ;;  %v4453_v18 = vpop.permute.xlu1 %4452 }
0x1afb   :  { %6807 = vpow2.f32 %v4417_v43  ;;  %6465 = vmatpush3.msk.msra.mxu0 %vm912_vm8, %v4453_v18 }
0x1afc   :  { %v6802_v38 = vpop.eup %6801  ;;  %6466 = vmatprep.subr.mxu0 %v6863_v35 }
0x1afd   :  { %v4422_v46 = vsel %vm826_vm5, %v6802_v38, 0.0 }
0x1afe   :  { %4423 = vadd.xlane.f32.xlu1 %v4422_v46 }
0x1b00   :  { %v6804_v19 = vpop.eup %6803 }
0x1b01   :  { %v4425_v4 = vsel %vm826_vm5, %v6804_v19, 0.0 }
0x1b02   :  { %4426 = vadd.xlane.f32.xlu0 %v4425_v4 }
0x1b04   :  { %v6806_v16 = vpop.eup %6805 }
0x1b05   :  { %v4428_v21 = vsel %vm826_vm5, %v6806_v16, 0.0 }
0x1b06   :  { %4429 = vadd.xlane.f32.xlu1 %v4428_v21 }
0x1b08   :  { %v6808_v55 = vpop.eup %6807 }
0x1b09   :  { %v4431_v25 = vsel %vm839_vm11, %v6808_v55, 0.0 }
0x1b0a   :  { %4432 = vadd.xlane.f32.xlu0 %v4431_v25 }
0x1b14   :  { %v4240_v28 = vpop.f32.mrf.mxu0 }
0x1b15   :  { %v8587_v63 = vadd.f32 %v4240_v28, %v3820_v26 }
0x1b16   :  { %v6438_v51 = vpop.f32.mrf.mxu0 }
0x1b17   :  { %4448 = vrot.lane.b32.xlu1 %v8088_v30, %s8878_s28 }
0x1b1b   :  { %4446 = vrot.lane.b32.xlu1 %v8086_v32, %s8878_s28 }
0x1b1f   :  { %4444 = vrot.lane.b32.xlu1 %v8084_v5, %s8878_s28 }
0x1b20   :  { %4450 = vrot.lane.b32.xlu0 %v8090_v12, %s8878_s28 }
0x1b83   :  { %v4421_v49 = vpop.xlane.xlu0 %4420 }
0x1b84   :  { %6809 = vrcp.f32 %v4421_v49 }
0x1b87   :  { %v4424_v44 = vpop.xlane.xlu1 %4423 }
0x1b88   :  { %6811 = vrcp.f32 %v4424_v44 }
0x1b8b   :  { %v4427_v30 = vpop.xlane.xlu0 %4426 }
0x1b8c   :  { %6813 = vrcp.f32 %v4427_v30 }
0x1b8f   :  { %v4430_v33 = vpop.xlane.xlu1 %4429 }
0x1b90   :  { %6815 = vrcp.f32 %v4430_v33 }
0x1b91   :  { %v6810_v12 = vpop.eup %6809 }
0x1b92   :  { %v4439_v58 = vmul.f32 %v6810_v12, %v6800_v10 }
0x1b93   :  { %v4433_v32 = vpop.xlane.xlu0 %4432  ;;  %v4449_v39 = vpop.permute.xlu1 %4448 }
0x1b94   :  { %6817 = vrcp.f32 %v4433_v32 }
0x1b95   :  { %v6812_v0 = vpop.eup %6811 }
0x1b96   :  { %v4440_v36 = vmul.f32 %v6812_v0, %v6802_v38 }
0x1b97   :  { %v4451_v5 = vpop.permute.xlu0 %4450  ;;  %v4447_v53 = vpop.permute.xlu1 %4446 }
0x1b98   :  { %6467 = vmatpush3.msra.mxu0 %v4451_v5 }
0x1b99   :  { %6468 = vmatprep.subr.mxu0 %v6863_v35  ;;  %v6814_v60 = vpop.eup %6813 }
0x1b9a   :  { %6469 = vmatpush3.msra.mxu0 %v4449_v39  ;;  %v4441_v7 = vmul.f32 %v6814_v60, %v6804_v19 }
0x1b9b   :  { %6470 = vmatprep.subr.mxu0 %v6863_v35  ;;  %v4445_v37 = vpop.permute.xlu1 %4444 }
0x1b9c   :  { %6471 = vmatpush3.msra.mxu0 %v4447_v53 }
0x1b9d   :  { %6472 = vmatprep.subr.mxu0 %v6863_v35  ;;  %v6816_v6 = vpop.eup %6815 }
0x1b9e   :  { %6473 = vmatpush3.msra.mxu0 %v4445_v37  ;;  %v4442_v54 = vmul.f32 %v6816_v6, %v6806_v16 }
0x1b9f   :  { %6475 = vmatmul.mubr.msk.f32.vlgmr.msra.gmra.mxu0 %vm826_vm5, %v4439_v58  ;;  %6506 = vmatprep.subr.mxu0 %v6863_v35 }
0x1ba0   :  { %6477 = vmatprep.mubr.msk.f32.mxu0 %vm6864_vm2, %v6863_v35 }
0x1ba1   :  { %v6818_v62 = vpop.eup %6817 }
0x1ba2   :  { %v4443_v31 = vmul.f32 %v6818_v62, %v6808_v55 }
0x1ba3   :  { %6478 = vmatmul.mubr.msk.f32.gmra.mxu0 %vm826_vm5, %v4440_v36 }
0x1ba4   :  { %6480 = vmatprep.mubr.msk.f32.mxu0 %vm6864_vm2, %v6863_v35 }
0x1ba7   :  { %6481 = vmatmul.mubr.msk.f32.gmra.mxu0 %vm826_vm5, %v4441_v7 }
0x1ba8   :  { %6483 = vmatprep.mubr.msk.f32.mxu0 %vm6864_vm2, %v6863_v35 }
0x1bab   :  { %6484 = vmatmul.mubr.msk.f32.gmra.mxu0 %vm826_vm5, %v4442_v54 }
0x1bac   :  { %6486 = vmatprep.mubr.msk.f32.mxu0 %vm6864_vm2, %v6863_v35 }
0x1baf   :  { %6487 = vmatmul.mubr.msk.f32.gmra.mxu0 %vm826_vm5, %v4443_v31 }
0x1bb0   :  { %6514 = vmatprep.mubr.msk.f32.mxu0 %vm6864_vm2, %v6863_v35 }
0x1c5f   :  { %v4541_v56 = vpop.f32.mrf.mxu0 }
0x1c60   :  { %6492 = vmatmul.mubr.msk.f32.vlgmr.msra.gmra.mxu1 %vm705_vm7, %v4541_v56 }
0x1c61   :  { %v6476_v45 = vpop.f32.mrf.mxu0  ;;  %6494 = vmatprep.mubr.msk.f32.mxu1 %vm6864_vm2, %v6863_v35 }
0x1c63   :  { %v4546_v1 = vpop.f32.mrf.mxu0 }
0x1c64   :  { %6495 = vmatmul.mubr.msk.f32.gmra.mxu1 %vm705_vm7, %v4546_v1 }
0x1c65   :  { %v6479_v20 = vpop.f32.mrf.mxu0  ;;  %6497 = vmatprep.mubr.msk.f32.mxu1 %vm6864_vm2, %v6863_v35 }
0x1c67   :  { %v4551_v42 = vpop.f32.mrf.mxu0 }
0x1c68   :  { %6498 = vmatmul.mubr.msk.f32.gmra.mxu1 %vm705_vm7, %v4551_v42 }
0x1c69   :  { %v6482_v15 = vpop.f32.mrf.mxu0  ;;  %6500 = vmatprep.mubr.msk.f32.mxu1 %vm6864_vm2, %v6863_v35 }
0x1c6a   :  { %v5515_v15 = vld [vmem:[%s8833_s16 + $0x38] sm:$0xff] }
0x1c6b   :  { %v4556_v22 = vpop.f32.mrf.mxu0  ;;  %6507 = vmatpush3.msra.mxu0 %v5515_v15 }
0x1c6c   :  { %6501 = vmatmul.mubr.msk.f32.gmra.mxu1 %vm705_vm7, %v4556_v22  ;;  %6508 = vmatprep.subr.mxu0 %v6863_v35  ;;  %v5514_v22 = vld [vmem:[%s8833_s16 + $0x30] sm:$0xff] }
0x1c6d   :  { %v6485_v2 = vpop.f32.mrf.mxu0  ;;  %6503 = vmatprep.mubr.msk.f32.mxu1 %vm6864_vm2, %v6863_v35  ;;  %6509 = vmatpush3.msra.mxu0 %v5514_v22 }
0x1c6e   :  { %6510 = vmatprep.subr.mxu0 %v6863_v35  ;;  %v5513_v2 = vld [vmem:[%s8833_s16 + $0x28] sm:$0xff] }
0x1c6f   :  { %v4561_v3 = vpop.f32.mrf.mxu0  ;;  %6511 = vmatpush3.msra.mxu0 %v5513_v2 }
0x1c70   :  { %6504 = vmatmul.mubr.msk.f32.gmra.mxu1 %vm705_vm7, %v4561_v3  ;;  %6512 = vmatprep.subr.mxu0 %v6863_v35  ;;  %v5512_v3 = vld [vmem:[%s8833_s16 + $0x20] sm:$0xff] }
0x1c71   :  { %v6488_v23 = vpop.f32.mrf.mxu0  ;;  %6545 = vmatprep.mubr.msk.f32.mxu1 %vm6864_vm2, %v6863_v35  ;;  %6513 = vmatpush3.msra.mxu0 %v5512_v3 }
0x1c72   :  { %6560 = vmatprep.subr.mxu0 %v6863_v35 }
0x1d20   :  { %v4646_v48 = vpop.f32.mrf.mxu1 }
0x1d21   :  { %v4670_v52 = vadd.f32 %v4646_v48, %v8564_v24 }
0x1d22   :  { %v6493_v14 = vpop.f32.mrf.mxu1 }
0x1d23   :  { %v4675_v29 = vadd.f32 %v4670_v52, %v7993_v27 }
0x1d24   :  { %v4651_v47 = vpop.f32.mrf.mxu1 }
0x1d25   :  { %v8640_v10 = vadd.f32 %v5507_v8, %v4675_v29  ;;  %v4671_v43 = vadd.f32 %v4651_v47, %v8568_v61 }
0x1d26   :  { %v6496_v9 = vpop.f32.mrf.mxu1 }
0x1d27   :  { %v4676_v18 = vadd.f32 %v4671_v43, %v7998_v40  ;;  %v4697_v38 = vsel %vm297_vm3, %v8640_v10, 0.0 }
0x1d28   :  { %4698 = vadd.xlane.f32.xlu0 %v4697_v38  ;;  %v4656_v24 = vpop.f32.mrf.mxu1 }
0x1d29   :  { %v8646_v46 = vadd.f32 %v5507_v8, %v4676_v18  ;;  %v4672_v19 = vadd.f32 %v4656_v24, %v8572_v57 }
0x1d2a   :  { %v6499_v4 = vpop.f32.mrf.mxu1 }
0x1d2b   :  { %v4677_v27 = vadd.f32 %v4672_v19, %v8003_v11  ;;  %v4700_v16 = vsel %vm297_vm3, %v8646_v46, 0.0 }
0x1d2c   :  { %4701 = vadd.xlane.f32.xlu1 %v4700_v16  ;;  %v4661_v61 = vpop.f32.mrf.mxu1  ;;  %v5510_v16 = vld [vmem:[%s8831_s14 + $0x1] ss:$0 sm:$0xff] }
0x1d2d   :  { %v8652_v21 = vadd.f32 %v5507_v8, %v4677_v27  ;;  %v4673_v40 = vadd.f32 %v4661_v61, %v8576_v13 }
0x1d2e   :  { %v6502_v55 = vpop.f32.mrf.mxu1 }
0x1d2f   :  { %v4678_v25 = vadd.f32 %v4673_v40, %v8008_v50  ;;  %v4703_v26 = vsel %vm297_vm3, %v8652_v21, 0.0  ;;  %v5511_v55 = vld [vmem:[%s8832_s15 + $0x1] ss:$0 sm:$0xff] }
0x1d30   :  { %4704 = vadd.xlane.f32.xlu0 %v4703_v26  ;;  %v4666_v57 = vpop.f32.mrf.mxu1 }
0x1d31   :  { %v8658_v28 = vadd.f32 %v5507_v8, %v4678_v25  ;;  %v4674_v11 = vadd.f32 %v4666_v57, %v8587_v63 }
0x1d32   :  { %v6505_v51 = vpop.f32.mrf.mxu1 }
0x1d33   :  { %v4679_v34 = vadd.f32 %v4674_v11, %v8013_v59  ;;  %v4706_v49 = vsel %vm297_vm3, %v8658_v28, 0.0 }
0x1d34   :  { %4707 = vadd.xlane.f32.xlu0 %v4706_v49 }
0x1d35   :  { %v8664_v13 = vadd.f32 %v5507_v8, %v4679_v34 }
0x1d37   :  { %v4709_v50 = vsel %vm310_vm4, %v8664_v13, 0.0 }
0x1d38   :  { %4710 = vadd.xlane.f32.xlu0 %v4709_v50 }
0x1db1   :  { %v4699_v44 = vpop.xlane.xlu0 %4698 }
0x1db2   :  { %v4712_v30 = vmul.f32 0.03125, %v4699_v44 }
0x1db4   :  { %v4717_v33 = vsub.f32 %v8640_v10, %v4712_v30 }
0x1db5   :  { %v4702_v32 = vpop.xlane.xlu1 %4701 }
0x1db6   :  { %v4713_v39 = vmul.f32 0.03125, %v4702_v32  ;;  %v4722_v63 = vmul.f32 %v4717_v33, %v4717_v33 }
0x1db8   :  { %v8670_v5 = vsub.f32 %v8646_v46, %v4713_v39  ;;  %v4727_v59 = vsel %vm297_vm3, %v4722_v63, 0.0 }
0x1db9   :  { %4728 = vadd.xlane.f32.xlu1 %v4727_v59  ;;  %v4705_v53 = vpop.xlane.xlu0 %4704 }
0x1dba   :  { %v4714_v12 = vmul.f32 0.03125, %v4705_v53  ;;  %v4723_v58 = vmul.f32 %v8670_v5, %v8670_v5 }
0x1dbc   :  { %v4719_v37 = vsub.f32 %v8652_v21, %v4714_v12  ;;  %v4730_v0 = vsel %vm297_vm3, %v4723_v58, 0.0  ;;  %v5530_v58 = vld [vmem:[%s8835_s18 + $0x78] sm:$0xff] }
0x1dbd   :  { %v4708_v36 = vpop.xlane.xlu0 %4707  ;;  %4731 = vadd.xlane.f32.xlu0 %v4730_v0  ;;  %6530 = vmatpush3.msra.mxu1 %v5530_v58  ;;  %v5528_v0 = vld [vmem:[%s8835_s18 + $0x68] sm:$0xff] }
0x1dbe   :  { %v4715_v60 = vmul.f32 0.03125, %v4708_v36  ;;  %v4724_v7 = vmul.f32 %v4719_v37, %v4719_v37  ;;  %6531 = vmatprep.subr.mxu1 %v6863_v35  ;;  %v5527_v36 = vld [vmem:[%s8835_s18 + $0x60] sm:$0xff] }
0x1dc0   :  { %v4720_v6 = vsub.f32 %v8658_v28, %v4715_v60  ;;  %v4733_v54 = vsel %vm297_vm3, %v4724_v7, 0.0  ;;  %v5526_v60 = vld [vmem:[%s8835_s18 + $0x58] sm:$0xff]  ;;  %v5525_v7 = vld [vmem:[%s8835_s18 + $0x50] sm:$0xff] }
0x1dc1   :  { %4734 = vadd.xlane.f32.xlu1 %v4733_v54  ;;  %v4711_v62 = vpop.xlane.xlu0 %4710  ;;  %v5523_v54 = vld [vmem:[%s8835_s18 + $0x40] sm:$0xff] }
0x1dc2   :  { %v4716_v31 = vmul.f32 0.03125, %v4711_v62  ;;  %v4725_v56 = vmul.f32 %v4720_v6, %v4720_v6  ;;  %v5517_v62 = vld [vmem:[%s8834_s17 + $0x1] ss:$0 sm:$0xff] }
0x1dc4   :  { %v4721_v45 = vsub.f32 %v8664_v13, %v4716_v31  ;;  %v4736_v1 = vsel %vm297_vm3, %v4725_v56, 0.0 }
0x1dc5   :  { %4737 = vadd.xlane.f32.xlu0 %v4736_v1 }
0x1dc6   :  { %v4726_v20 = vmul.f32 %v4721_v45, %v4721_v45 }
0x1dc8   :  { %v4739_v42 = vsel %vm310_vm4, %v4726_v20, 0.0 }
0x1dc9   :  { %4740 = vadd.xlane.f32.xlu1 %v4739_v42 }
0x1e42   :  { %v4729_v23 = vpop.xlane.xlu1 %4728 }
0x1e43   :  { %v4742_v48 = vmul.f32 0.03125, %v4729_v23 }
0x1e45   :  { %v4747_v52 = vadd.f32 1e-05, %v4742_v48 }
0x1e46   :  { %v4732_v8 = vpop.xlane.xlu0 %4731 }
0x1e47   :  { %6819 = vrsqrt.f32 %v4747_v52  ;;  %v4743_v14 = vmul.f32 0.03125, %v4732_v8 }
0x1e49   :  { %v4748_v29 = vadd.f32 1e-05, %v4743_v14 }
0x1e4a   :  { %v4735_v47 = vpop.xlane.xlu1 %4734 }
0x1e4b   :  { %6821 = vrsqrt.f32 %v4748_v29  ;;  %v4744_v43 = vmul.f32 0.03125, %v4735_v47 }
0x1e4d   :  { %v4749_v9 = vadd.f32 1e-05, %v4744_v43 }
0x1e4e   :  { %v4738_v18 = vpop.xlane.xlu0 %4737 }
0x1e4f   :  { %6823 = vrsqrt.f32 %v4749_v9  ;;  %v4745_v38 = vmul.f32 0.03125, %v4738_v18 }
0x1e51   :  { %v4750_v24 = vadd.f32 1e-05, %v4745_v38 }
0x1e52   :  { %v4741_v19 = vpop.xlane.xlu1 %4740 }
0x1e53   :  { %6825 = vrsqrt.f32 %v4750_v24  ;;  %v4746_v4 = vmul.f32 0.03125, %v4741_v19 }
0x1e54   :  { %v6820_v27 = vpop.eup %6819 }
0x1e55   :  { %v4757_v61 = vmul.f32 %v6820_v27, %v4717_v33  ;;  %v4751_v40 = vadd.f32 1e-05, %v4746_v4 }
0x1e57   :  { %v4768_v25 = vmul.f32 %v5510_v16, %v4757_v61  ;;  %6827 = vrsqrt.f32 %v4751_v40 }
0x1e58   :  { %v6822_v26 = vpop.eup %6821 }
0x1e59   :  { %v4779_v57 = vadd.f32 %v5511_v55, %v4768_v25  ;;  %v4758_v11 = vmul.f32 %v6822_v26, %v8670_v5 }
0x1e5b   :  { %6515 = vmatmul.mubr.msk.f32.vlgmr.msra.gmra.mxu0 %vm297_vm3, %v4779_v57  ;;  %v4769_v51 = vmul.f32 %v5510_v16, %v4758_v11 }
0x1e5c   :  { %v6824_v34 = vpop.eup %6823  ;;  %6517 = vmatprep.mubr.msk.f32.mxu0 %vm6864_vm2, %v6863_v35 }
0x1e5d   :  { %v4759_v49 = vmul.f32 %v6824_v34, %v4719_v37  ;;  %v4780_v50 = vadd.f32 %v5511_v55, %v4769_v51  ;;  %v5529_v37 = vld [vmem:[%s8835_s18 + $0x70] sm:$0xff] }
0x1e5e   :  { %6532 = vmatpush3.msra.mxu1 %v5529_v37 }
0x1e5f   :  { %6518 = vmatmul.mubr.msk.f32.gmra.mxu0 %vm297_vm3, %v4780_v50  ;;  %v4770_v44 = vmul.f32 %v5510_v16, %v4759_v49  ;;  %6533 = vmatprep.subr.mxu1 %v6863_v35 }
0x1e60   :  { %v6826_v30 = vpop.eup %6825  ;;  %6520 = vmatprep.mubr.msk.f32.mxu0 %vm6864_vm2, %v6863_v35  ;;  %6534 = vmatpush3.msra.mxu1 %v5528_v0 }
0x1e61   :  { %v4760_v33 = vmul.f32 %v6826_v30, %v4720_v6  ;;  %v4781_v32 = vadd.f32 %v5511_v55, %v4770_v44  ;;  %6535 = vmatprep.subr.mxu1 %v6863_v35  ;;  %v5524_v6 = vld [vmem:[%s8835_s18 + $0x48] sm:$0xff] }
0x1e62   :  { %6536 = vmatpush3.msra.mxu1 %v5527_v36 }
0x1e63   :  { %6521 = vmatmul.mubr.msk.f32.gmra.mxu0 %vm297_vm3, %v4781_v32  ;;  %v4771_v39 = vmul.f32 %v5510_v16, %v4760_v33  ;;  %6537 = vmatprep.subr.mxu1 %v6863_v35 }
0x1e64   :  { %v6828_v63 = vpop.eup %6827  ;;  %6523 = vmatprep.mubr.msk.f32.mxu0 %vm6864_vm2, %v6863_v35  ;;  %6538 = vmatpush3.msra.mxu1 %v5526_v60 }
0x1e65   :  { %v4761_v5 = vmul.f32 %v6828_v63, %v4721_v45  ;;  %v4782_v59 = vadd.f32 %v5511_v55, %v4771_v39  ;;  %6539 = vmatprep.subr.mxu1 %v6863_v35 }
0x1e66   :  { %6540 = vmatpush3.msra.mxu1 %v5525_v7 }
0x1e67   :  { %6524 = vmatmul.mubr.msk.f32.gmra.mxu0 %vm297_vm3, %v4782_v59  ;;  %v4772_v53 = vmul.f32 %v5510_v16, %v4761_v5  ;;  %6541 = vmatprep.subr.mxu1 %v6863_v35 }
0x1e68   :  { %6526 = vmatprep.mubr.msk.f32.mxu0 %vm6864_vm2, %v6863_v35  ;;  %6542 = vmatpush3.msra.mxu1 %v5524_v6 }
0x1e69   :  { %v4783_v12 = vadd.f32 %v5511_v55, %v4772_v53  ;;  %6543 = vmatprep.subr.mxu1 %v6863_v35 }
0x1e6a   :  { %6544 = vmatpush3.msra.mxu1 %v5523_v54 }
0x1e6b   :  { %6527 = vmatmul.mubr.msk.f32.gmra.mxu0 %vm297_vm3, %v4783_v12 }
0x1e6c   :  { %6570 = vmatprep.mubr.msk.f32.mxu0 %vm6864_vm2, %v6863_v35 }
0x1f1b   :  { %v4878_v31 = vpop.f32.mrf.mxu0 }
0x1f1c   :  { %v4879_v56 = vadd.f32 %v5517_v62, %v4878_v31 }
0x1f1d   :  { %v6516_v45 = vpop.f32.mrf.mxu0 }
0x1f1e   :  { %v4907_v1 = vmul.f32 0.044715, %v4879_v56  ;;  %v4902_v32 = vmul.f32 0.5, %v4879_v56 }
0x1f1f   :  { %v4883_v20 = vpop.f32.mrf.mxu0 }
0x1f20   :  { %v4912_v42 = vmul.f32 %v4907_v1, %v4879_v56  ;;  %v4884_v15 = vadd.f32 %v5517_v62, %v4883_v20 }
0x1f21   :  { %v6519_v22 = vpop.f32.mrf.mxu0 }
0x1f22   :  { %v4917_v2 = vmul.f32 %v4912_v42, %v4879_v56  ;;  %v4908_v3 = vmul.f32 0.044715, %v4884_v15  ;;  %v4903_v53 = vmul.f32 0.5, %v4884_v15 }
0x1f23   :  { %v4888_v23 = vpop.f32.mrf.mxu0 }
0x1f24   :  { %v4922_v48 = vadd.f32 %v4917_v2, %v4879_v56  ;;  %v4913_v52 = vmul.f32 %v4908_v3, %v4884_v15  ;;  %v4889_v8 = vadd.f32 %v5517_v62, %v4888_v23 }
0x1f25   :  { %v6522_v14 = vpop.f32.mrf.mxu0 }
0x1f26   :  { %v4927_v29 = vmul.f32 0.7978846, %v4922_v48  ;;  %v4918_v47 = vmul.f32 %v4913_v52, %v4884_v15  ;;  %v4909_v43 = vmul.f32 0.044715, %v4889_v8  ;;  %v4904_v0 = vmul.f32 0.5, %v4889_v8 }
0x1f27   :  { %v4893_v9 = vpop.f32.mrf.mxu0 }
0x1f28   :  { %6829 = vtanh.f32 %v4927_v29  ;;  %v4923_v18 = vadd.f32 %v4918_v47, %v4884_v15  ;;  %v4914_v38 = vmul.f32 %v4909_v43, %v4889_v8  ;;  %v4894_v24 = vadd.f32 %v5517_v62, %v4893_v9  ;;  %v5537_v29 = vld [vmem:[%s8836_s19 + $0x1] ss:$0 sm:$0xff] }
0x1f29   :  { %v6525_v19 = vpop.f32.mrf.mxu0 }
0x1f2a   :  { %v4928_v4 = vmul.f32 0.7978846, %v4923_v18  ;;  %v4919_v27 = vmul.f32 %v4914_v38, %v4889_v8  ;;  %v4910_v16 = vmul.f32 0.044715, %v4894_v24  ;;  %v4905_v6 = vmul.f32 0.5, %v4894_v24 }
0x1f2b   :  { %v4898_v61 = vpop.f32.mrf.mxu0  ;;  %v5079_v18 = vmul.u32 17, %v7133_v17 }
0x1f2c   :  { %6831 = vtanh.f32 %v4928_v4  ;;  %v4924_v40 = vadd.f32 %v4919_v27, %v4889_v8  ;;  %v4915_v55 = vmul.f32 %v4910_v16, %v4894_v24  ;;  %v4899_v25 = vadd.f32 %v5517_v62, %v4898_v61 }
0x1f2d   :  { %v6528_v26 = vpop.f32.mrf.mxu0 }
0x1f2e   :  { %v4929_v57 = vmul.f32 0.7978846, %v4924_v40  ;;  %v4920_v11 = vmul.f32 %v4915_v55, %v4894_v24  ;;  %v4911_v51 = vmul.f32 0.044715, %v4899_v25  ;;  %v4906_v56 = vmul.f32 0.5, %v4899_v25  ;;  %v5191_v55 = vld [vmem:[%s8839_s22 + $0x18] sm:$0xff] }
0x1f2f   :  { %v5189_v26 = vld [vmem:[%s8839_s22 + $0x8] sm:$0xff] }
0x1f30   :  { %6833 = vtanh.f32 %v4929_v57  ;;  %v4925_v34 = vadd.f32 %v4920_v11, %v4894_v24  ;;  %v4916_v49 = vmul.f32 %v4911_v51, %v4899_v25  ;;  %v5188_v57 = vld [vmem:[%s8839_s22] sm:$0xff] }
0x1f32   :  { %v4930_v50 = vmul.f32 0.7978846, %v4925_v34  ;;  %v4921_v44 = vmul.f32 %v4916_v49, %v4899_v25 }
0x1f34   :  { %6835 = vtanh.f32 %v4930_v50  ;;  %v4926_v30 = vadd.f32 %v4921_v44, %v4899_v25  ;;  %v5190_v25 = vld [vmem:[%s8839_s22 + $0x10] sm:$0xff]  ;;  %v5541_v50 = vld [vmem:[%s8837_s20] ss:$0 sm:$0xff]  ;;  %s6841_s20 = scalar_lea.vmem %s5281_s2, 32 }
0x1f35   :  { %v6830_v33 = vpop.eup %6829  ;;  %p6842_p0 = scmp.ne.s32.totalorder %s5281_s2, %s6841_s20  ;;  %p6847_p2 = scmp.lt.s32.totalorder %s6841_s20, %s6841_s20 }
0x1f36   :  { %v4937_v39 = vadd.f32 1.0, %v6830_v33  ;;  %v4931_v63 = vmul.f32 0.7978846, %v4926_v30  ;;  %v5542_v30 = vld [vmem:[%s8838_s21] ss:$0 sm:$0xff] }
0x1f37   :  { %p6848_p3 = por %p6847_p2, %p6846_p1 }
0x1f38   :  { %v4942_v5 = vmul.f32 %v4937_v39, %v4902_v32  ;;  %6837 = vtanh.f32 %v4931_v63 }
0x1f39   :  { %v6832_v59 = vpop.eup %6831  ;;  %p6849_p4 = pnand %p6848_p3, %p6842_p0 }
0x1f3a   :  { %6546 = vmatmul.mubr.msk.f32.vlgmr.msra.gmra.mxu1 %vm85_vm0, %v4942_v5  ;;  %v4938_v12 = vadd.f32 1.0, %v6832_v59 }
0x1f3b   :  { %6548 = vmatprep.mubr.msk.f32.mxu1 %vm6864_vm2, %v6863_v35 }
0x1f3c   :  { %v4943_v58 = vmul.f32 %v4938_v12, %v4903_v53 }
0x1f3d   :  { %v6834_v37 = vpop.eup %6833 }
0x1f3e   :  { %6549 = vmatmul.mubr.msk.f32.gmra.mxu1 %vm85_vm0, %v4943_v58  ;;  %v4939_v36 = vadd.f32 1.0, %v6834_v37 }
0x1f3f   :  { %6551 = vmatprep.mubr.msk.f32.mxu1 %vm6864_vm2, %v6863_v35 }
0x1f40   :  { %v4944_v60 = vmul.f32 %v4939_v36, %v4904_v0 }
0x1f41   :  { %v6836_v7 = vpop.eup %6835 }
0x1f42   :  { %6552 = vmatmul.mubr.msk.f32.gmra.mxu1 %vm85_vm0, %v4944_v60  ;;  %v4940_v54 = vadd.f32 1.0, %v6836_v7 }
0x1f43   :  { %6554 = vmatprep.mubr.msk.f32.mxu1 %vm6864_vm2, %v6863_v35 }
0x1f44   :  { %v4945_v62 = vmul.f32 %v4940_v54, %v4905_v6 }
0x1f45   :  { %v6838_v31 = vpop.eup %6837 }
0x1f46   :  { %6555 = vmatmul.mubr.msk.f32.gmra.mxu1 %vm85_vm0, %v4945_v62  ;;  %v4941_v45 = vadd.f32 1.0, %v6838_v31 }
0x1f47   :  { %6557 = vmatprep.mubr.msk.f32.mxu1 %vm6864_vm2, %v6863_v35 }
0x1f48   :  { %v4946_v1 = vmul.f32 %v4941_v45, %v4906_v56 }
0x1f4a   :  { %6558 = vmatmul.mubr.msk.f32.gmra.mxu1 %vm85_vm0, %v4946_v1  ;;  %vm5080_vm0 = vcmp.eq.s32.totalorder %v7348_v41, %v5079_v18 }
0x1ffa   :  { %v5037_v20 = vpop.f32.mrf.mxu1 }
0x1ffc   :  { %v6547_v42 = vpop.f32.mrf.mxu1 }
0x1ffe   :  { %v5042_v15 = vpop.f32.mrf.mxu1 }
0x1fff   :  { %v5062_v38 = vadd.f32 %v5042_v15, %v8646_v46  ;;  %v5538_v46 = vsel %vm5080_vm0, 1.0, %v6863_v35 }
0x2000   :  { %v6550_v22 = vpop.f32.mrf.mxu1 }
0x2001   :  { %v5075_v19 = vadd.f32 %v5537_v29, %v5062_v38 }
0x2002   :  { %v5047_v2 = vpop.f32.mrf.mxu1 }
0x2003   :  { %v5063_v43 = vadd.f32 %v5047_v2, %v8652_v21 }
0x2004   :  { %v6553_v3 = vpop.f32.mrf.mxu1 }
0x2006   :  { %v5052_v23 = vpop.f32.mrf.mxu1 }
0x2007   :  { %v5064_v8 = vadd.f32 %v5052_v23, %v8658_v28  ;;  %v5061_v28 = vadd.f32 %v5037_v20, %v8640_v10 }
0x2008   :  { %v6556_v48 = vpop.f32.mrf.mxu1 }
0x2009   :  { %v5077_v24 = vadd.f32 %v5537_v29, %v5064_v8  ;;  %v5074_v17 = vadd.f32 %v5537_v29, %v5061_v28 }
0x200a   :  { %v5057_v52 = vpop.f32.mrf.mxu1 }
0x200b   :  { %v5065_v14 = vadd.f32 %v5057_v52, %v8664_v13  ;;  %v5076_v13 = vadd.f32 %v5537_v29, %v5063_v43 }
0x200c   :  { %v6559_v47 = vpop.f32.mrf.mxu1 }
0x200d   :  { %v5078_v9 = vadd.f32 %v5537_v29, %v5065_v14 }
0x200f   :  { %6561 = vmatpush3.msk.msra.mxu0 %vm912_vm8, %v5078_v9 }
0x2010   :  { %6562 = vmatprep.subr.mxu0 %v6863_v35 }
0x2011   :  { %6563 = vmatpush3.msra.mxu0 %v5077_v24 }
0x2012   :  { %6564 = vmatprep.subr.mxu0 %v6863_v35 }
0x2013   :  { %6565 = vmatpush3.msra.mxu0 %v5076_v13 }
0x2014   :  { %6566 = vmatprep.subr.mxu0 %v6863_v35 }
0x2015   :  { %6567 = vmatpush3.msra.mxu0 %v5075_v19 }
0x2016   :  { %6568 = vmatprep.subr.mxu0 %v6863_v35 }
0x2017   :  { %6569 = vmatpush3.msra.mxu0 %v5074_v17 }
0x2018   :  { %6571 = vmatmul.mubr.msk.f32.vlgmr.msra.gmra.mxu0 %vm826_vm5, %v5538_v46  ;;  %6573 = vmatprep.subr.mxu0 %v6863_v35 }
0x2019   :  { %6581 = vmatprep.mubr.msk.f32.mxu0 %vm6864_vm2, %v6863_v35  ;;  %6574 = vmatpush3.msra.mxu0 %v5191_v55  ;;  %vm5272_vm2 = vcmask 74752  }
0x201a   :  { %6575 = vmatprep.subr.mxu0 %v6863_v35 }
0x201b   :  { %6576 = vmatpush3.msra.mxu0 %v5190_v25 }
0x201c   :  { %6577 = vmatprep.subr.mxu0 %v6863_v35 }
0x201d   :  { %6578 = vmatpush3.msra.mxu0 %v5189_v26 }
0x201e   :  { %6579 = vmatprep.subr.mxu0 %v6863_v35  ;;  %v5543_v35 = vld [vmem:[%s8840_s23] ss:$0 sm:$0xff] }
0x201f   :  { %6580 = vmatpush3.msra.mxu0 %v5188_v57 }
0x20d8   :  { %v5155_v10 = vpop.f32.mrf.mxu0 }
0x20d9   :  { %v5161_v41 = vsel %vm310_vm4, %v5155_v10, 0.0 }
0x20da   :  { %5162 = vadd.xlane.f32.xlu0 %v5161_v41  ;;  %v6572_v21 = vpop.f32.mrf.mxu0 }
0x2163   :  { %v5163_v4 = vpop.xlane.xlu0 %5162 }
0x2164   :  { %v5164_v27 = vmul.f32 0.03125, %v5163_v4 }
0x2166   :  { %v5165_v16 = vsub.f32 %v5155_v10, %v5164_v27 }
0x2168   :  { %v5166_v61 = vmul.f32 %v5165_v16, %v5165_v16 }
0x216a   :  { %v5167_v40 = vsel %vm310_vm4, %v5166_v61, 0.0 }
0x216b   :  { %5168 = vadd.xlane.f32.xlu1 %v5167_v40 }
0x21f4   :  { %v5169_v11 = vpop.xlane.xlu1 %5168 }
0x21f5   :  { %v5170_v51 = vmul.f32 0.03125, %v5169_v11 }
0x21f7   :  { %v5171_v34 = vadd.f32 1e-05, %v5170_v51 }
0x21f9   :  { %6839 = vrsqrt.f32 %v5171_v34 }
0x2206   :  { %v6840_v49 = vpop.eup %6839 }
0x2207   :  { %v5173_v44 = vmul.f32 %v6840_v49, %v5165_v16 }
0x2209   :  { %v5180_v33 = vmul.f32 %v5541_v50, %v5173_v44 }
0x220b   :  { %v5187_v32 = vadd.f32 %v5542_v30, %v5180_v33 }
0x220d   :  { %6582 = vmatmul.mubr.msk.f32.vlgmr.msra.gmra.mxu0 %vm297_vm3, %v5187_v32 }
0x22cd   :  { %v5268_v39 = vpop.f32.mrf.mxu0 }
0x22ce   :  { %v5269_v63 = vadd.f32 %v5543_v35, %v5268_v39 }
0x22cf   :  { %v6583_v5 = vpop.f32.mrf.mxu0 }
0x22d0   :  { %5273 = vst.msk [vmem:[#allocation2] sm:$0x3] %vm5272_vm2, %v5269_v63 }
0x22d1   :  { %6852 = shalt.err (!%p6849_p4)
}
0x22d2   :  { %5283 = dma.vmem_to_hbm [thread:$0]  %s5281_s2, 32, %s8841_s24, [#allocation3]  }
0x22d3   :  { %6861 = dma.done.wait [#allocation3], 32  }
0x22d4   :  { %6862 = vsyncadd [#allocation3], 4294967264 }
0x22d5   :  { %5287 = vsyncpa [#allocation3], 1 }

</bundles_post_ra>
